<compile_context>
chip_gen: v6e
topology: v6e:2x2x1
jax: 0.10.0
libtpu: 0.0.40
codegen_flags: <defaults>
</compile_context>

<pallas_src>
import functools

import numpy as np
import jax
import jax.numpy as jnp
from jax import lax
from jax.experimental import pallas as pl
from jax.experimental.pallas import tpu as pltpu

# ----- synthetic model configuration (small, deterministic) -----
MIN_MIDI, MAX_MIDI, PITCH_SHIFT = 21, 36, 0
N_STATE = 4
OUTPUT_SIZE = MAX_MIDI - MIN_MIDI + 1 + 2 * PITCH_SHIFT        # 16 pitches
INPUT_FEATURES = 16                                            # n_mels
MODEL_COMPLEXITY_CONV = 2                                      # -> model_size_conv = 32
MODEL_COMPLEXITY_LSTM = 2                                      # -> model_size_lstm = 32
MODEL_SIZE_CONV = MODEL_COMPLEXITY_CONV * 16
MODEL_SIZE_LSTM = MODEL_COMPLEXITY_LSTM * 16
C1 = MODEL_SIZE_CONV // 16                                     # conv1/conv2 channels
C2 = MODEL_SIZE_CONV // 8                                      # conv3 channels
BN_EPS = 1e-5
HP = jax.lax.Precision.HIGHEST
NSP = N_STATE * OUTPUT_SIZE                                    # valid post columns (64)
POST_PAD = -(-NSP // 128) * 128                                # padded to full lanes (128)


# =============================================================================
# Shared math (used by the Pallas kernel AND by the pure-JAX mirror reference)
# =============================================================================
def _bf16_dot(a, b):
    # MXU single pass: bf16 operands, f32 accumulation.
    return jnp.dot(a.astype(jnp.bfloat16), b.astype(jnp.bfloat16),
                   preferred_element_type=jnp.float32)


def _f32_dot(a, b):
    return jnp.dot(a, b, preferred_element_type=jnp.float32, precision=HP)


def _conv_phase(xpad, batch, tb, dot, m1, b1, m2e, m2o, b2, m3e, m3o, b3, wfc, bfc):
    """ConvStack as banded matmuls.

    xpad : ((T+2)*B, F) time-padded mel, rows ordered (time, batch), 2 leading zero frames.
    m*   : (3, K, N) per-time-tap banded matrices (freq conv + channel mix, BN folded;
           m2*/m3* also fold the MaxPool(1,2) even/odd frequency selection).
    Returns the pre-projected LSTM layer-0 gate contributions, shape (T*B, 4H).
    """
    def conv(xp, m):                                 # xp: (tb + 2*batch, K)
        acc = dot(xp[0:tb, :], m[0])
        for kh in (1, 2):
            acc = acc + dot(xp[kh * batch: kh * batch + tb, :], m[kh])
        return acc

    def pad_time(y):                                 # prepend the 2-frame causal zero pad
        return jnp.concatenate([jnp.zeros((2 * batch, y.shape[1]), y.dtype), y], axis=0)

    y1 = jnp.maximum(conv(xpad, m1) + b1, 0.0)                               # conv1+BN+ReLU
    x1 = pad_time(y1)
    y2 = jnp.maximum(jnp.maximum(conv(x1, m2e), conv(x1, m2o)) + b2, 0.0)    # conv2+BN+ReLU+pool
    x2 = pad_time(y2)
    y3 = jnp.maximum(jnp.maximum(conv(x2, m3e), conv(x2, m3o)) + b3, 0.0)    # conv3+BN+ReLU+pool
    return dot(y3, wfc) + bfc       # fc folded with wa and the layer-0 LSTM bias -> (T*B, 4H)


def _decoder_step(a_t, onehot, h0, c0, h1, c1, dot, w0, w1, b1l, wpost, bpost, hdim):
    """One AR step: 2-layer LSTM cell (merged matmuls) + language_post (padded to 128 lanes)."""
    g0 = a_t + dot(jnp.concatenate([onehot, h0], axis=1), w0)      # (B, 4H)
    sg0 = jax.nn.sigmoid(g0)                                       # one EUP slab for i,f,o
    th0 = jnp.tanh(g0)                                             # one EUP slab for g
    c0n = sg0[:, hdim:2 * hdim] * c0 + sg0[:, 0:hdim] * th0[:, 2 * hdim:3 * hdim]
    h0n = sg0[:, 3 * hdim:4 * hdim] * jnp.tanh(c0n)

    g1 = dot(jnp.concatenate([h0n, h1], axis=1), w1) + b1l
    sg1 = jax.nn.sigmoid(g1)
    th1 = jnp.tanh(g1)
    c1n = sg1[:, hdim:2 * hdim] * c1 + sg1[:, 0:hdim] * th1[:, 2 * hdim:3 * hdim]
    h1n = sg1[:, 3 * hdim:4 * hdim] * jnp.tanh(c1n)

    logits = dot(h1n, wpost) + bpost                               # (B, POST_PAD)
    return logits, h0n, c0n, h1n, c1n


# =============================================================================
# The fused Pallas kernel
# =============================================================================
def _fused_kernel(melp_ref, m1_ref, b1_ref, m2e_ref, m2o_ref, b2_ref,
                  m3e_ref, m3o_ref, b3_ref, wfc_ref, bfc_ref,
                  w0_ref, w1_ref, b1l_ref, wpost_ref, bpost_ref,
                  out_ref, *, n_state):
    T, B = out_ref.shape[0], out_ref.shape[1]
    H = w1_ref.shape[0] // 2
    nsp = w0_ref.shape[0] - H
    P = nsp // n_state

    # ---------------- ConvStack (amortized over all timesteps, hoisted out of the loop) ----
    ac = _conv_phase(melp_ref[...], B, T * B, _bf16_dot,
                     m1_ref[...], b1_ref[...], m2e_ref[...], m2o_ref[...], b2_ref[...],
                     m3e_ref[...], m3o_ref[...], b3_ref[...], wfc_ref[...], bfc_ref[...])

    w0 = w0_ref[...]
    w1 = w1_ref[...]
    b1l = b1l_ref[...]
    wpost = wpost_ref[...]
    bpost = bpost_ref[...]

    # ---------------- autoregressive decoder: state carried in vregs ------------------------
    # T is static & tiny -> full unrolling (== lax.fori_loop(..., unroll=True)).
    # TODO(synk): for long sequences, tile the time axis with a grid (state in scratch,
    #             acoustic/output via BlockSpec, vmem_limit_bytes set for v7x's 64 MiB VMEM).
    zero_h = jnp.zeros((B, H), jnp.float32)
    h0, c0, h1, c1 = zero_h, zero_h, zero_h, zero_h
    # prev prediction starts as class 0 for every pitch -> one-hot block s = 0.
    onehot = jnp.concatenate(
        [jnp.ones((B, P), jnp.float32),
         jnp.zeros((B, (n_state - 1) * P), jnp.float32)], axis=1)

    for t in range(T):
        a_t = ac[t * B:(t + 1) * B, :]
        logits, h0, c0, h1, c1 = _decoder_step(
            a_t, onehot, h0, c0, h1, c1, _bf16_dot, w0, w1, b1l, wpost, bpost, H)
        out_ref[t] = logits                                   # lane-dense (B, 128) store

        # argmax over states (kernel column layout: s*P + p); first-max tie break.
        lg = logits[:, 0:nsp]
        best_val = lg[:, 0:P]
        best_idx = jnp.zeros((B, P), jnp.int32)
        for s in range(1, n_state):
            vs = lg[:, s * P:(s + 1) * P]
            m = vs > best_val
            best_idx = jnp.where(m, jnp.int32(s), best_idx)
            best_val = jnp.where(m, vs, best_val)
        # one-hot feedback; the class embedding is folded into w0's W_sp block.
        onehot = jnp.concatenate(
            [(best_idx == s).astype(jnp.float32) for s in range(n_state)], axis=1)


# =============================================================================
# Wrapper: weight restructuring (all trace-time glue) + pallas_call
# =============================================================================
def fold_bn(w_hwio, conv_b, gamma, beta, mean, var):
    scale = gamma / jnp.sqrt(var + BN_EPS)
    return w_hwio * scale[None, None, None, :], (conv_b - mean) * scale + beta


def prepare_kernel_params(p):
    """Restructure the PyTorch-layout parameters for the fused kernel."""
    F, P, NS, H, Ca = INPUT_FEATURES, OUTPUT_SIZE, N_STATE, MODEL_SIZE_LSTM, MODEL_SIZE_CONV

    def banded(w_hwio, f_in):
        # per time-tap kh: (f_in*Cin, f_in*Cout) banded matrix = freq conv (pad 1/1) + channel mix
        mats = []
        for kh in range(3):
            m = sum(jnp.kron(np.eye(f_in, k=1 - kw, dtype=np.float32), w_hwio[kh, kw])
                    for kw in range(3))
            mats.append(m)
        return jnp.stack(mats)

    def pool_sel(f_in, c):
        se = np.kron(np.eye(f_in, dtype=np.float32)[:, 0::2], np.eye(c, dtype=np.float32))
        so = np.kron(np.eye(f_in, dtype=np.float32)[:, 1::2], np.eye(c, dtype=np.float32))
        return se, so

    m1 = banded(p['w1'], F)                                   # (3, F,        F*C1)
    m2 = banded(p['w2'], F)                                   # (3, F*C1,     F*C1)
    m3 = banded(p['w3'], F // 2)                              # (3, F/2*C1,   F/2*C2)
    s2e, s2o = pool_sel(F, C1)
    s3e, s3o = pool_sel(F // 2, C2)
    m2e = jnp.einsum('kij,jn->kin', m2, s2e, precision=HP)    # MaxPool folded: even freqs
    m2o = jnp.einsum('kij,jn->kin', m2, s2o, precision=HP)    #                 odd  freqs
    m3e = jnp.einsum('kij,jn->kin', m3, s3e, precision=HP)
    m3o = jnp.einsum('kij,jn->kin', m3, s3o, precision=HP)
    b1t = jnp.tile(p['b1'], F).reshape(1, F * C1)
    b2t = jnp.tile(p['b2'], F // 2).reshape(1, (F // 2) * C1)
    b3t = jnp.tile(p['b3'], F // 4).reshape(1, (F // 4) * C2)

    # fc: permute rows from torch [channel, freq] order to kernel [freq, channel] order,
    # then fold the acoustic->gate projection (wa) and the layer-0 LSTM bias into it.
    F4 = F // 4
    perm = np.array([c * F4 + f for f in range(F4) for c in range(C2)], dtype=np.int32)
    wih0_t = p['wih0'].T                                      # (Ca + 2P, 4H)
    wa = wih0_t[:Ca]
    wfc = jnp.dot(p['w_fc'][perm, :], wa, precision=HP)       # (F4*C2, 4H)
    bfc = (jnp.dot(p['b_fc'], wa, precision=HP) + p['bih0'] + p['bhh0']).reshape(1, 4 * H)

    # layer-0 merged recurrent weights, rows = [one-hot (NS*P) | h0 (H)].
    # W_sp[s*P+p, :] = emb[s,0]*wih0_t[Ca+2p] + emb[s,1]*wih0_t[Ca+2p+1]   (embedding fold)
    wemb = wih0_t[Ca:].reshape(P, 2, 4 * H)
    w_sp = jnp.einsum('sd,pdh->sph', p['emb'], wemb, precision=HP).reshape(NS * P, 4 * H)
    w0 = jnp.concatenate([w_sp, p['whh0'].T], axis=0)         # (NS*P + H, 4H)

    w1c = jnp.concatenate([p['wih1'].T, p['whh1'].T], axis=0)  # (2H, 4H)
    b1l = (p['bih1'] + p['bhh1']).reshape(1, 4 * H)

    # language_post: torch column p*NS+s -> kernel column s*P+p, padded to POST_PAD lanes.
    wpost = p['wpost'].T.reshape(H, P, NS).transpose(0, 2, 1).reshape(H, NS * P)
    bpost = p['bpost'].reshape(P, NS).T.reshape(NS * P)
    wpost = jnp.concatenate([wpost, jnp.zeros((H, POST_PAD - NS * P), jnp.float32)], axis=1)
    bpost = jnp.concatenate([bpost, jnp.zeros((POST_PAD - NS * P,), jnp.float32)]).reshape(1, POST_PAD)

    return dict(m1=m1, b1=b1t, m2e=m2e, m2o=m2o, b2=b2t, m3e=m3e, m3o=m3o, b3=b3t,
                wfc=wfc, bfc=bfc, w0=w0, w1=w1c, b1l=b1l, wpost=wpost, bpost=bpost)


_BF16_KEYS = ('m1', 'm2e', 'm2o', 'm3e', 'm3o', 'wfc', 'w0', 'w1', 'wpost')


def _cast_matmul_weights(prep):
    return {k: (v.astype(jnp.bfloat16) if k in _BF16_KEYS else v) for k, v in prep.items()}


def _padded_mel_2d(mel):
    B, T, F = mel.shape
    melp = jnp.concatenate([jnp.zeros((2, B, F), mel.dtype),
                            jnp.transpose(mel, (1, 0, 2))], axis=0)
    return melp.reshape((T + 2) * B, F)           # rows ordered (time, batch)


def ar_transcriber_forward(mel, params):
    B, T, _ = mel.shape
    prep = _cast_matmul_weights(prepare_kernel_params(params))
    melp = _padded_mel_2d(mel)

    vmem = pl.BlockSpec(memory_space=pltpu.MemorySpace.VMEM)
    out = pl.pallas_call(
        functools.partial(_fused_kernel, n_state=N_STATE),
        out_shape=jax.ShapeDtypeStruct((T, B, POST_PAD), jnp.float32),
        in_specs=[vmem] * 16,
        out_specs=vmem,
    )(melp, prep['m1'], prep['b1'], prep['m2e'], prep['m2o'], prep['b2'],
      prep['m3e'], prep['m3o'], prep['b3'], prep['wfc'], prep['bfc'],
      prep['w0'], prep['w1'], prep['b1l'], prep['wpost'], prep['bpost'])

    out = out[:, :, :NSP].reshape(T, B, N_STATE, OUTPUT_SIZE)
    return jnp.transpose(out, (1, 0, 3, 2))       # (B, T, output_size, N_STATE)


# =============================================================================
# Deterministic parameter init (shapes follow the PyTorch __init__)
# =============================================================================
def init_params(key):
    ks = list(jax.random.split(key, 40))
    it = iter(ks)

    def nrm(shape, scale=0.1):
        return scale * jax.random.normal(next(it), shape, dtype=jnp.float32)

    def make_conv(cin, cout):
        w = nrm((3, 3, cin, cout))
        cb = nrm((cout,))
        gamma = 1.0 + nrm((cout,))
        beta = nrm((cout,))
        mean = nrm((cout,))
        var = 1.0 + jnp.abs(nrm((cout,)))
        return fold_bn(w, cb, gamma, beta, mean, var)

    p = {}
    p['w1'], p['b1'] = make_conv(1, C1)
    p['w2'], p['b2'] = make_conv(C1, C1)
    p['w3'], p['b3'] = make_conv(C1, C2)
    fc_in = C2 * (INPUT_FEATURES // 4)
    p['w_fc'] = nrm((fc_in, MODEL_SIZE_CONV))
    p['b_fc'] = nrm((MODEL_SIZE_CONV,))

    I0 = MODEL_SIZE_CONV + 2 * OUTPUT_SIZE
    H = MODEL_SIZE_LSTM
    p['wih0'] = nrm((4 * H, I0));  p['whh0'] = nrm((4 * H, H))
    p['bih0'] = nrm((4 * H,));     p['bhh0'] = nrm((4 * H,))
    p['wih1'] = nrm((4 * H, H));   p['whh1'] = nrm((4 * H, H))
    p['bih1'] = nrm((4 * H,));     p['bhh1'] = nrm((4 * H,))
    p['wpost'] = nrm((OUTPUT_SIZE * N_STATE, H))
    p['bpost'] = nrm((OUTPUT_SIZE * N_STATE,))
    p['emb'] = nrm((N_STATE, 2), scale=1.0)
    return p


# =============================================================================
# Pure-JAX references
# =============================================================================
def ref_forward_mirror(mel, params, use_bf16):
    """Re-implements the exact kernel math (same prepared weights / dot precision) in pure JAX."""
    B, T, _ = mel.shape
    H, P, NS = MODEL_SIZE_LSTM, OUTPUT_SIZE, N_STATE
    prep = prepare_kernel_params(params)
    dot = _bf16_dot if use_bf16 else _f32_dot
    if use_bf16:
        prep = _cast_matmul_weights(prep)
    ac = _conv_phase(_padded_mel_2d(mel), B, T * B, dot,
                     prep['m1'], prep['b1'], prep['m2e'], prep['m2o'], prep['b2'],
                     prep['m3e'], prep['m3o'], prep['b3'], prep['wfc'], prep['bfc'])
    h0 = c0 = h1 = c1 = jnp.zeros((B, H), jnp.float32)
    prev_idx = jnp.zeros((B, P), jnp.int32)
    outs = []
    for t in range(T):
        onehot = jnp.concatenate([(prev_idx == s).astype(jnp.float32) for s in range(NS)], axis=1)
        logits, h0, c0, h1, c1 = _decoder_step(
            ac[t * B:(t + 1) * B, :], onehot, h0, c0, h1, c1, dot,
            prep['w0'], prep['w1'], prep['b1l'], prep['wpost'], prep['bpost'], H)
        lg = logits[:, :NS * P].reshape(B, NS, P)
        prev_idx = jnp.argmax(lg, axis=1).astype(jnp.int32)
        outs.append(jnp.transpose(lg, (0, 2, 1)))             # (B, P, NS)
    return jnp.stack(outs, axis=1)                            # (B, T, P, NS)


def _maxpool_1x2(x):
    B, Ht, W, C = x.shape
    return x.reshape(B, Ht, W // 2, 2, C).max(axis=3)


def ref_conv_stack(mel, p):
    B, T, F = mel.shape
    x = mel[..., None]

    def conv(x, w, b):
        y = lax.conv_general_dilated(x, w, window_strides=(1, 1),
                                     padding=((2, 0), (1, 1)),
                                     dimension_numbers=('NHWC', 'HWIO', 'NHWC'),
                                     precision=HP)
        return jnp.maximum(y + b[None, None, None, :], 0.0)

    x = conv(x, p['w1'], p['b1'])
    x = conv(x, p['w2'], p['b2'])
    x = _maxpool_1x2(x)                                       # Dropout(0.1): eval -> identity
    x = conv(x, p['w3'], p['b3'])
    x = _maxpool_1x2(x)                                       # Dropout(0.1): eval -> identity
    x = jnp.transpose(x, (0, 1, 3, 2)).reshape(B, T, -1)      # [channel, freq] flatten
    return jnp.einsum('btk,kn->btn', x, p['w_fc'], precision=HP) + p['b_fc']


def ref_ar_decode(acoustic, p):
    B, T, _ = acoustic.shape
    H, P = MODEL_SIZE_LSTM, OUTPUT_SIZE
    h0 = c0 = h1 = c1 = jnp.zeros((B, H), jnp.float32)
    prev_idx = jnp.zeros((B, P), dtype=jnp.int32)
    outs = []
    for t in range(T):
        emb = p['emb'][prev_idx].reshape(B, 2 * P)            # interleaved [pitch, emb_dim]
        xt = jnp.concatenate([acoustic[:, t, :], emb], axis=1)
        g0 = (jnp.dot(xt, p['wih0'].T, precision=HP)
              + jnp.dot(h0, p['whh0'].T, precision=HP) + p['bih0'] + p['bhh0'])
        i0, f0, gg0, o0 = jnp.split(g0, 4, axis=1)
        c0 = jax.nn.sigmoid(f0) * c0 + jax.nn.sigmoid(i0) * jnp.tanh(gg0)
        h0 = jax.nn.sigmoid(o0) * jnp.tanh(c0)
        g1 = (jnp.dot(h0, p['wih1'].T, precision=HP)
              + jnp.dot(h1, p['whh1'].T, precision=HP) + p['bih1'] + p['bhh1'])
        i1, f1, gg1, o1 = jnp.split(g1, 4, axis=1)
        c1 = jax.nn.sigmoid(f1) * c1 + jax.nn.sigmoid(i1) * jnp.tanh(gg1)
        h1 = jax.nn.sigmoid(o1) * jnp.tanh(c1)
        logits = jnp.dot(h1, p['wpost'].T, precision=HP) + p['bpost']
        out_t = logits.reshape(B, P, N_STATE)
        prev_idx = jnp.argmax(out_t, axis=-1).astype(jnp.int32)
        outs.append(out_t)
    return jnp.stack(outs, axis=1)


def ref_forward_spec(mel, p):
    return ref_ar_decode(ref_conv_stack(mel, p), p)


def _ar_max_diff(out, ref, tie_tol=1e-3):
    """Max |out-ref| over the prefix up to (and including) the first timestep where the argmax
    feedback diverges, provided the divergence is a genuine numerical tie in `ref` (top-2 gap
    < tie_tol).  A divergence with a large gap indicates a real feedback-path bug -> inf."""
    o, r = np.asarray(out), np.asarray(ref)
    pk, pr = o.argmax(-1), r.argmax(-1)                       # (B, T, P)
    agree = (pk == pr).all(axis=(0, 2))                       # (T,)
    if agree.all():
        t_cmp = o.shape[1]
    else:
        t0 = int(np.argmin(agree))
        srt = np.sort(r[:, t0], axis=-1)
        gap = srt[..., -1] - srt[..., -2]                     # (B, P)
        if ((pk[:, t0] != pr[:, t0]) & (gap > tie_tol)).any():
            return float('inf')
        t_cmp = t0 + 1
    return float(np.abs(o[:, :t_cmp] - r[:, :t_cmp]).max())


# TODO(synk): training-time branches (teacher forcing with random.random()<0.8, Dropout,
#             batch-mode BatchNorm statistics, run_on_batch melspectrogram/loss) are not part
#             of this inference kernel.

if __name__ == "__main__":
    key = jax.random.PRNGKey(0)
    kp, kx = jax.random.split(key)
    params = init_params(kp)

    B, T = 2, 8
    mel = jax.random.normal(kx, (B, T, INPUT_FEATURES), dtype=jnp.float32)

    fwd = jax.jit(ar_transcriber_forward)
    out = jax.block_until_ready(fwd(mel, params))
    assert out.shape == (B, T, OUTPUT_SIZE, N_STATE), out.shape

    # 1) restructured math (banded convs, pool/fc/embedding folds, merged matmuls) vs the
    #    PyTorch-faithful reference, both pure JAX at f32 / HIGHEST.
    spec = jax.jit(ref_forward_spec)(mel, params)
    mir32 = jax.jit(functools.partial(ref_forward_mirror, use_bf16=False))(mel, params)
    err_restructure = _ar_max_diff(mir32, spec)
    assert err_restructure < 1e-3, f"restructured math mismatch: {err_restructure}"

    # 2) Pallas kernel vs a pure-JAX mirror of the same (bf16-operand) math.
    mir16 = jax.jit(functools.partial(ref_forward_mirror, use_bf16=True))(mel, params)
    err_kernel = _ar_max_diff(out, mir16)
    assert err_kernel < 1e-3, f"Pallas kernel mismatch vs mirror: {err_kernel}"

    # 3) first-timestep logits (no AR feedback involved): bf16 kernel vs f32/HIGHEST spec.
    err_t0 = float(jnp.max(jnp.abs(out[:, 0] - spec[:, 0])))
    assert err_t0 < 3e-2, f"t=0 logits mismatch vs spec: {err_t0}"

    print("KERNEL_OK")
</pallas_src>

<mosaic_0001>
module attributes {stable_mosaic.version = 11 : i64} {
  func.func @_fused_kernel(%arg0: memref<20x16xf32, #tpu.memory_space<vmem>>, %arg1: memref<3x16x32xbf16, #tpu.memory_space<vmem>>, %arg2: memref<1x32xf32, #tpu.memory_space<vmem>>, %arg3: memref<3x32x16xbf16, #tpu.memory_space<vmem>>, %arg4: memref<3x32x16xbf16, #tpu.memory_space<vmem>>, %arg5: memref<1x16xf32, #tpu.memory_space<vmem>>, %arg6: memref<3x16x16xbf16, #tpu.memory_space<vmem>>, %arg7: memref<3x16x16xbf16, #tpu.memory_space<vmem>>, %arg8: memref<1x16xf32, #tpu.memory_space<vmem>>, %arg9: memref<16x128xbf16, #tpu.memory_space<vmem>>, %arg10: memref<1x128xf32, #tpu.memory_space<vmem>>, %arg11: memref<96x128xbf16, #tpu.memory_space<vmem>>, %arg12: memref<64x128xbf16, #tpu.memory_space<vmem>>, %arg13: memref<1x128xf32, #tpu.memory_space<vmem>>, %arg14: memref<32x128xbf16, #tpu.memory_space<vmem>>, %arg15: memref<1x128xf32, #tpu.memory_space<vmem>>, %arg16: memref<8x2x128xf32, #tpu.memory_space<vmem>>) attributes {dimension_semantics = [], scalar_prefetch = 0 : i64, scratch_operands = 0 : i64, tpu.core_type = #tpu.core_type<tc>} {
    %c0 = arith.constant 0 : index
    %c0_0 = arith.constant 0 : index
    %0 = vector.load %arg0[%c0, %c0_0] : memref<20x16xf32, #tpu.memory_space<vmem>>, vector<20x16xf32>
    %c0_1 = arith.constant 0 : index
    %c0_2 = arith.constant 0 : index
    %c0_3 = arith.constant 0 : index
    %1 = vector.load %arg1[%c0_1, %c0_2, %c0_3] : memref<3x16x32xbf16, #tpu.memory_space<vmem>>, vector<3x16x32xbf16>
    %c0_4 = arith.constant 0 : index
    %c0_5 = arith.constant 0 : index
    %2 = vector.load %arg2[%c0_4, %c0_5] : memref<1x32xf32, #tpu.memory_space<vmem>>, vector<1x32xf32>
    %c0_6 = arith.constant 0 : index
    %c0_7 = arith.constant 0 : index
    %c0_8 = arith.constant 0 : index
    %3 = vector.load %arg3[%c0_6, %c0_7, %c0_8] : memref<3x32x16xbf16, #tpu.memory_space<vmem>>, vector<3x32x16xbf16>
    %c0_9 = arith.constant 0 : index
    %c0_10 = arith.constant 0 : index
    %c0_11 = arith.constant 0 : index
    %4 = vector.load %arg4[%c0_9, %c0_10, %c0_11] : memref<3x32x16xbf16, #tpu.memory_space<vmem>>, vector<3x32x16xbf16>
    %c0_12 = arith.constant 0 : index
    %c0_13 = arith.constant 0 : index
    %5 = vector.load %arg5[%c0_12, %c0_13] : memref<1x16xf32, #tpu.memory_space<vmem>>, vector<1x16xf32>
    %c0_14 = arith.constant 0 : index
    %c0_15 = arith.constant 0 : index
    %c0_16 = arith.constant 0 : index
    %6 = vector.load %arg6[%c0_14, %c0_15, %c0_16] : memref<3x16x16xbf16, #tpu.memory_space<vmem>>, vector<3x16x16xbf16>
    %c0_17 = arith.constant 0 : index
    %c0_18 = arith.constant 0 : index
    %c0_19 = arith.constant 0 : index
    %7 = vector.load %arg7[%c0_17, %c0_18, %c0_19] : memref<3x16x16xbf16, #tpu.memory_space<vmem>>, vector<3x16x16xbf16>
    %c0_20 = arith.constant 0 : index
    %c0_21 = arith.constant 0 : index
    %8 = vector.load %arg8[%c0_20, %c0_21] : memref<1x16xf32, #tpu.memory_space<vmem>>, vector<1x16xf32>
    %c0_22 = arith.constant 0 : index
    %c0_23 = arith.constant 0 : index
    %9 = vector.load %arg9[%c0_22, %c0_23] : memref<16x128xbf16, #tpu.memory_space<vmem>>, vector<16x128xbf16>
    %c0_24 = arith.constant 0 : index
    %c0_25 = arith.constant 0 : index
    %10 = vector.load %arg10[%c0_24, %c0_25] : memref<1x128xf32, #tpu.memory_space<vmem>>, vector<1x128xf32>
    %11 = vector.extract_strided_slice %0 {offsets = [0, 0], sizes = [16, 16], strides = [1, 1]} : vector<20x16xf32> to vector<16x16xf32>
    %12 = vector.extract_strided_slice %1 {offsets = [0, 0, 0], sizes = [1, 16, 32], strides = [1, 1, 1]} : vector<3x16x32xbf16> to vector<1x16x32xbf16>
    %13 = vector.shape_cast %12 : vector<1x16x32xbf16> to vector<16x32xbf16>
    %14 = arith.truncf %11 : vector<16x16xf32> to vector<16x16xbf16>
    %cst = arith.constant dense<0.000000e+00> : vector<16x32xf32>
    %15 = tpu.matmul %14, %13, %cst {dimension_numbers = #tpu.dot_dimension_numbers<[1], [0], [0], [1], [0, 0, 1, 1], [], []>} : vector<16x16xbf16>, vector<16x32xbf16>, vector<16x32xf32> -> vector<16x32xf32>
    %16 = vector.extract_strided_slice %0 {offsets = [2, 0], sizes = [16, 16], strides = [1, 1]} : vector<20x16xf32> to vector<16x16xf32>
    %17 = vector.extract_strided_slice %1 {offsets = [1, 0, 0], sizes = [1, 16, 32], strides = [1, 1, 1]} : vector<3x16x32xbf16> to vector<1x16x32xbf16>
    %18 = vector.shape_cast %17 : vector<1x16x32xbf16> to vector<16x32xbf16>
    %19 = arith.truncf %16 : vector<16x16xf32> to vector<16x16xbf16>
    %cst_26 = arith.constant dense<0.000000e+00> : vector<16x32xf32>
    %20 = tpu.matmul %19, %18, %cst_26 {dimension_numbers = #tpu.dot_dimension_numbers<[1], [0], [0], [1], [0, 0, 1, 1], [], []>} : vector<16x16xbf16>, vector<16x32xbf16>, vector<16x32xf32> -> vector<16x32xf32>
    %21 = arith.addf %15, %20 : vector<16x32xf32>
    %22 = vector.extract_strided_slice %0 {offsets = [4, 0], sizes = [16, 16], strides = [1, 1]} : vector<20x16xf32> to vector<16x16xf32>
    %23 = vector.extract_strided_slice %1 {offsets = [2, 0, 0], sizes = [1, 16, 32], strides = [1, 1, 1]} : vector<3x16x32xbf16> to vector<1x16x32xbf16>
    %24 = vector.shape_cast %23 : vector<1x16x32xbf16> to vector<16x32xbf16>
    %25 = arith.truncf %22 : vector<16x16xf32> to vector<16x16xbf16>
    %cst_27 = arith.constant dense<0.000000e+00> : vector<16x32xf32>
    %26 = tpu.matmul %25, %24, %cst_27 {dimension_numbers = #tpu.dot_dimension_numbers<[1], [0], [0], [1], [0, 0, 1, 1], [], []>} : vector<16x16xbf16>, vector<16x32xbf16>, vector<16x32xf32> -> vector<16x32xf32>
    %27 = arith.addf %21, %26 : vector<16x32xf32>
    %28 = vector.broadcast %2 : vector<1x32xf32> to vector<16x32xf32>
    %29 = arith.addf %27, %28 : vector<16x32xf32>
    %cst_28 = arith.constant 0.000000e+00 : f32
    %30 = vector.broadcast %cst_28 : f32 to vector<16x32xf32>
    %31 = arith.maximumf %29, %30 : vector<16x32xf32>
    %cst_29 = arith.constant 0.000000e+00 : f32
    %32 = vector.broadcast %cst_29 : f32 to vector<4x32xf32>
    %33 = tpu.concatenate %32, %31 in 0 : vector<4x32xf32>, vector<16x32xf32> -> vector<20x32xf32>
    %34 = vector.extract_strided_slice %33 {offsets = [0, 0], sizes = [16, 32], strides = [1, 1]} : vector<20x32xf32> to vector<16x32xf32>
    %35 = vector.extract_strided_slice %3 {offsets = [0, 0, 0], sizes = [1, 32, 16], strides = [1, 1, 1]} : vector<3x32x16xbf16> to vector<1x32x16xbf16>
    %36 = vector.shape_cast %35 : vector<1x32x16xbf16> to vector<32x16xbf16>
    %37 = arith.truncf %34 : vector<16x32xf32> to vector<16x32xbf16>
    %cst_30 = arith.constant dense<0.000000e+00> : vector<16x16xf32>
    %38 = tpu.matmul %37, %36, %cst_30 {dimension_numbers = #tpu.dot_dimension_numbers<[1], [0], [0], [1], [0, 0, 1, 1], [], []>} : vector<16x32xbf16>, vector<32x16xbf16>, vector<16x16xf32> -> vector<16x16xf32>
    %39 = vector.extract_strided_slice %33 {offsets = [2, 0], sizes = [16, 32], strides = [1, 1]} : vector<20x32xf32> to vector<16x32xf32>
    %40 = vector.extract_strided_slice %3 {offsets = [1, 0, 0], sizes = [1, 32, 16], strides = [1, 1, 1]} : vector<3x32x16xbf16> to vector<1x32x16xbf16>
    %41 = vector.shape_cast %40 : vector<1x32x16xbf16> to vector<32x16xbf16>
    %42 = arith.truncf %39 : vector<16x32xf32> to vector<16x32xbf16>
    %cst_31 = arith.constant dense<0.000000e+00> : vector<16x16xf32>
    %43 = tpu.matmul %42, %41, %cst_31 {dimension_numbers = #tpu.dot_dimension_numbers<[1], [0], [0], [1], [0, 0, 1, 1], [], []>} : vector<16x32xbf16>, vector<32x16xbf16>, vector<16x16xf32> -> vector<16x16xf32>
    %44 = arith.addf %38, %43 : vector<16x16xf32>
    %45 = vector.extract_strided_slice %33 {offsets = [4, 0], sizes = [16, 32], strides = [1, 1]} : vector<20x32xf32> to vector<16x32xf32>
    %46 = vector.extract_strided_slice %3 {offsets = [2, 0, 0], sizes = [1, 32, 16], strides = [1, 1, 1]} : vector<3x32x16xbf16> to vector<1x32x16xbf16>
    %47 = vector.shape_cast %46 : vector<1x32x16xbf16> to vector<32x16xbf16>
    %48 = arith.truncf %45 : vector<16x32xf32> to vector<16x32xbf16>
    %cst_32 = arith.constant dense<0.000000e+00> : vector<16x16xf32>
    %49 = tpu.matmul %48, %47, %cst_32 {dimension_numbers = #tpu.dot_dimension_numbers<[1], [0], [0], [1], [0, 0, 1, 1], [], []>} : vector<16x32xbf16>, vector<32x16xbf16>, vector<16x16xf32> -> vector<16x16xf32>
    %50 = arith.addf %44, %49 : vector<16x16xf32>
    %51 = vector.extract_strided_slice %33 {offsets = [0, 0], sizes = [16, 32], strides = [1, 1]} : vector<20x32xf32> to vector<16x32xf32>
    %52 = vector.extract_strided_slice %4 {offsets = [0, 0, 0], sizes = [1, 32, 16], strides = [1, 1, 1]} : vector<3x32x16xbf16> to vector<1x32x16xbf16>
    %53 = vector.shape_cast %52 : vector<1x32x16xbf16> to vector<32x16xbf16>
    %54 = arith.truncf %51 : vector<16x32xf32> to vector<16x32xbf16>
    %cst_33 = arith.constant dense<0.000000e+00> : vector<16x16xf32>
    %55 = tpu.matmul %54, %53, %cst_33 {dimension_numbers = #tpu.dot_dimension_numbers<[1], [0], [0], [1], [0, 0, 1, 1], [], []>} : vector<16x32xbf16>, vector<32x16xbf16>, vector<16x16xf32> -> vector<16x16xf32>
    %56 = vector.extract_strided_slice %33 {offsets = [2, 0], sizes = [16, 32], strides = [1, 1]} : vector<20x32xf32> to vector<16x32xf32>
    %57 = vector.extract_strided_slice %4 {offsets = [1, 0, 0], sizes = [1, 32, 16], strides = [1, 1, 1]} : vector<3x32x16xbf16> to vector<1x32x16xbf16>
    %58 = vector.shape_cast %57 : vector<1x32x16xbf16> to vector<32x16xbf16>
    %59 = arith.truncf %56 : vector<16x32xf32> to vector<16x32xbf16>
    %cst_34 = arith.constant dense<0.000000e+00> : vector<16x16xf32>
    %60 = tpu.matmul %59, %58, %cst_34 {dimension_numbers = #tpu.dot_dimension_numbers<[1], [0], [0], [1], [0, 0, 1, 1], [], []>} : vector<16x32xbf16>, vector<32x16xbf16>, vector<16x16xf32> -> vector<16x16xf32>
    %61 = arith.addf %55, %60 : vector<16x16xf32>
    %62 = vector.extract_strided_slice %33 {offsets = [4, 0], sizes = [16, 32], strides = [1, 1]} : vector<20x32xf32> to vector<16x32xf32>
    %63 = vector.extract_strided_slice %4 {offsets = [2, 0, 0], sizes = [1, 32, 16], strides = [1, 1, 1]} : vector<3x32x16xbf16> to vector<1x32x16xbf16>
    %64 = vector.shape_cast %63 : vector<1x32x16xbf16> to vector<32x16xbf16>
    %65 = arith.truncf %62 : vector<16x32xf32> to vector<16x32xbf16>
    %cst_35 = arith.constant dense<0.000000e+00> : vector<16x16xf32>
    %66 = tpu.matmul %65, %64, %cst_35 {dimension_numbers = #tpu.dot_dimension_numbers<[1], [0], [0], [1], [0, 0, 1, 1], [], []>} : vector<16x32xbf16>, vector<32x16xbf16>, vector<16x16xf32> -> vector<16x16xf32>
    %67 = arith.addf %61, %66 : vector<16x16xf32>
    %68 = arith.maximumf %50, %67 : vector<16x16xf32>
    %69 = vector.broadcast %5 : vector<1x16xf32> to vector<16x16xf32>
    %70 = arith.addf %68, %69 : vector<16x16xf32>
    %cst_36 = arith.constant 0.000000e+00 : f32
    %71 = vector.broadcast %cst_36 : f32 to vector<16x16xf32>
    %72 = arith.maximumf %70, %71 : vector<16x16xf32>
    %cst_37 = arith.constant 0.000000e+00 : f32
    %73 = vector.broadcast %cst_37 : f32 to vector<4x16xf32>
    %74 = tpu.concatenate %73, %72 in 0 : vector<4x16xf32>, vector<16x16xf32> -> vector<20x16xf32>
    %75 = vector.extract_strided_slice %74 {offsets = [0, 0], sizes = [16, 16], strides = [1, 1]} : vector<20x16xf32> to vector<16x16xf32>
    %76 = vector.extract_strided_slice %6 {offsets = [0, 0, 0], sizes = [1, 16, 16], strides = [1, 1, 1]} : vector<3x16x16xbf16> to vector<1x16x16xbf16>
    %77 = vector.shape_cast %76 : vector<1x16x16xbf16> to vector<16x16xbf16>
    %78 = arith.truncf %75 : vector<16x16xf32> to vector<16x16xbf16>
    %cst_38 = arith.constant dense<0.000000e+00> : vector<16x16xf32>
    %79 = tpu.matmul %78, %77, %cst_38 {dimension_numbers = #tpu.dot_dimension_numbers<[1], [0], [0], [1], [0, 0, 1, 1], [], []>} : vector<16x16xbf16>, vector<16x16xbf16>, vector<16x16xf32> -> vector<16x16xf32>
    %80 = vector.extract_strided_slice %74 {offsets = [2, 0], sizes = [16, 16], strides = [1, 1]} : vector<20x16xf32> to vector<16x16xf32>
    %81 = vector.extract_strided_slice %6 {offsets = [1, 0, 0], sizes = [1, 16, 16], strides = [1, 1, 1]} : vector<3x16x16xbf16> to vector<1x16x16xbf16>
    %82 = vector.shape_cast %81 : vector<1x16x16xbf16> to vector<16x16xbf16>
    %83 = arith.truncf %80 : vector<16x16xf32> to vector<16x16xbf16>
    %cst_39 = arith.constant dense<0.000000e+00> : vector<16x16xf32>
    %84 = tpu.matmul %83, %82, %cst_39 {dimension_numbers = #tpu.dot_dimension_numbers<[1], [0], [0], [1], [0, 0, 1, 1], [], []>} : vector<16x16xbf16>, vector<16x16xbf16>, vector<16x16xf32> -> vector<16x16xf32>
    %85 = arith.addf %79, %84 : vector<16x16xf32>
    %86 = vector.extract_strided_slice %74 {offsets = [4, 0], sizes = [16, 16], strides = [1, 1]} : vector<20x16xf32> to vector<16x16xf32>
    %87 = vector.extract_strided_slice %6 {offsets = [2, 0, 0], sizes = [1, 16, 16], strides = [1, 1, 1]} : vector<3x16x16xbf16> to vector<1x16x16xbf16>
    %88 = vector.shape_cast %87 : vector<1x16x16xbf16> to vector<16x16xbf16>
    %89 = arith.truncf %86 : vector<16x16xf32> to vector<16x16xbf16>
    %cst_40 = arith.constant dense<0.000000e+00> : vector<16x16xf32>
    %90 = tpu.matmul %89, %88, %cst_40 {dimension_numbers = #tpu.dot_dimension_numbers<[1], [0], [0], [1], [0, 0, 1, 1], [], []>} : vector<16x16xbf16>, vector<16x16xbf16>, vector<16x16xf32> -> vector<16x16xf32>
    %91 = arith.addf %85, %90 : vector<16x16xf32>
    %92 = vector.extract_strided_slice %74 {offsets = [0, 0], sizes = [16, 16], strides = [1, 1]} : vector<20x16xf32> to vector<16x16xf32>
    %93 = vector.extract_strided_slice %7 {offsets = [0, 0, 0], sizes = [1, 16, 16], strides = [1, 1, 1]} : vector<3x16x16xbf16> to vector<1x16x16xbf16>
    %94 = vector.shape_cast %93 : vector<1x16x16xbf16> to vector<16x16xbf16>
    %95 = arith.truncf %92 : vector<16x16xf32> to vector<16x16xbf16>
    %cst_41 = arith.constant dense<0.000000e+00> : vector<16x16xf32>
    %96 = tpu.matmul %95, %94, %cst_41 {dimension_numbers = #tpu.dot_dimension_numbers<[1], [0], [0], [1], [0, 0, 1, 1], [], []>} : vector<16x16xbf16>, vector<16x16xbf16>, vector<16x16xf32> -> vector<16x16xf32>
    %97 = vector.extract_strided_slice %74 {offsets = [2, 0], sizes = [16, 16], strides = [1, 1]} : vector<20x16xf32> to vector<16x16xf32>
    %98 = vector.extract_strided_slice %7 {offsets = [1, 0, 0], sizes = [1, 16, 16], strides = [1, 1, 1]} : vector<3x16x16xbf16> to vector<1x16x16xbf16>
    %99 = vector.shape_cast %98 : vector<1x16x16xbf16> to vector<16x16xbf16>
    %100 = arith.truncf %97 : vector<16x16xf32> to vector<16x16xbf16>
    %cst_42 = arith.constant dense<0.000000e+00> : vector<16x16xf32>
    %101 = tpu.matmul %100, %99, %cst_42 {dimension_numbers = #tpu.dot_dimension_numbers<[1], [0], [0], [1], [0, 0, 1, 1], [], []>} : vector<16x16xbf16>, vector<16x16xbf16>, vector<16x16xf32> -> vector<16x16xf32>
    %102 = arith.addf %96, %101 : vector<16x16xf32>
    %103 = vector.extract_strided_slice %74 {offsets = [4, 0], sizes = [16, 16], strides = [1, 1]} : vector<20x16xf32> to vector<16x16xf32>
    %104 = vector.extract_strided_slice %7 {offsets = [2, 0, 0], sizes = [1, 16, 16], strides = [1, 1, 1]} : vector<3x16x16xbf16> to vector<1x16x16xbf16>
    %105 = vector.shape_cast %104 : vector<1x16x16xbf16> to vector<16x16xbf16>
    %106 = arith.truncf %103 : vector<16x16xf32> to vector<16x16xbf16>
    %cst_43 = arith.constant dense<0.000000e+00> : vector<16x16xf32>
    %107 = tpu.matmul %106, %105, %cst_43 {dimension_numbers = #tpu.dot_dimension_numbers<[1], [0], [0], [1], [0, 0, 1, 1], [], []>} : vector<16x16xbf16>, vector<16x16xbf16>, vector<16x16xf32> -> vector<16x16xf32>
    %108 = arith.addf %102, %107 : vector<16x16xf32>
    %109 = arith.maximumf %91, %108 : vector<16x16xf32>
    %110 = vector.broadcast %8 : vector<1x16xf32> to vector<16x16xf32>
    %111 = arith.addf %109, %110 : vector<16x16xf32>
    %cst_44 = arith.constant 0.000000e+00 : f32
    %112 = vector.broadcast %cst_44 : f32 to vector<16x16xf32>
    %113 = arith.maximumf %111, %112 : vector<16x16xf32>
    %114 = arith.truncf %113 : vector<16x16xf32> to vector<16x16xbf16>
    %cst_45 = arith.constant dense<0.000000e+00> : vector<16x128xf32>
    %115 = tpu.matmul %114, %9, %cst_45 {dimension_numbers = #tpu.dot_dimension_numbers<[1], [0], [0], [1], [0, 0, 1, 1], [], []>} : vector<16x16xbf16>, vector<16x128xbf16>, vector<16x128xf32> -> vector<16x128xf32>
    %116 = vector.broadcast %10 : vector<1x128xf32> to vector<16x128xf32>
    %117 = arith.addf %115, %116 : vector<16x128xf32>
    %c0_46 = arith.constant 0 : index
    %c0_47 = arith.constant 0 : index
    %118 = vector.load %arg11[%c0_46, %c0_47] : memref<96x128xbf16, #tpu.memory_space<vmem>>, vector<96x128xbf16>
    %c0_48 = arith.constant 0 : index
    %c0_49 = arith.constant 0 : index
    %119 = vector.load %arg12[%c0_48, %c0_49] : memref<64x128xbf16, #tpu.memory_space<vmem>>, vector<64x128xbf16>
    %c0_50 = arith.constant 0 : index
    %c0_51 = arith.constant 0 : index
    %120 = vector.load %arg13[%c0_50, %c0_51] : memref<1x128xf32, #tpu.memory_space<vmem>>, vector<1x128xf32>
    %c0_52 = arith.constant 0 : index
    %c0_53 = arith.constant 0 : index
    %121 = vector.load %arg14[%c0_52, %c0_53] : memref<32x128xbf16, #tpu.memory_space<vmem>>, vector<32x128xbf16>
    %c0_54 = arith.constant 0 : index
    %c0_55 = arith.constant 0 : index
    %122 = vector.load %arg15[%c0_54, %c0_55] : memref<1x128xf32, #tpu.memory_space<vmem>>, vector<1x128xf32>
    %cst_56 = arith.constant 0.000000e+00 : f32
    %123 = vector.broadcast %cst_56 : f32 to vector<2x32xf32>
    %cst_57 = arith.constant 1.000000e+00 : f32
    %124 = vector.broadcast %cst_57 : f32 to vector<2x16xf32>
    %cst_58 = arith.constant 0.000000e+00 : f32
    %125 = vector.broadcast %cst_58 : f32 to vector<2x48xf32>
    %126 = tpu.concatenate %124, %125 in 1 : vector<2x16xf32>, vector<2x48xf32> -> vector<2x64xf32>
    %127 = vector.extract_strided_slice %117 {offsets = [0, 0], sizes = [2, 128], strides = [1, 1]} : vector<16x128xf32> to vector<2x128xf32>
    %128 = tpu.concatenate %126, %123 in 1 : vector<2x64xf32>, vector<2x32xf32> -> vector<2x96xf32>
    %129 = arith.truncf %128 : vector<2x96xf32> to vector<2x96xbf16>
    %cst_59 = arith.constant dense<0.000000e+00> : vector<2x128xf32>
    %130 = tpu.matmul %129, %118, %cst_59 {dimension_numbers = #tpu.dot_dimension_numbers<[1], [0], [0], [1], [0, 0, 1, 1], [], []>} : vector<2x96xbf16>, vector<96x128xbf16>, vector<2x128xf32> -> vector<2x128xf32>
    %131 = arith.addf %127, %130 : vector<2x128xf32>
    %132 = arith.negf %131 : vector<2x128xf32>
    %133 = math.exp %132 : vector<2x128xf32>
    %cst_60 = arith.constant 1.000000e+00 : f32
    %134 = vector.broadcast %cst_60 : f32 to vector<2x128xf32>
    %135 = arith.addf %134, %133 : vector<2x128xf32>
    %136 = arith.divf %134, %135 : vector<2x128xf32>
    %137 = math.tanh %131 : vector<2x128xf32>
    %138 = vector.extract_strided_slice %136 {offsets = [0, 32], sizes = [2, 32], strides = [1, 1]} : vector<2x128xf32> to vector<2x32xf32>
    %139 = arith.mulf %138, %123 : vector<2x32xf32>
    %140 = vector.extract_strided_slice %136 {offsets = [0, 0], sizes = [2, 32], strides = [1, 1]} : vector<2x128xf32> to vector<2x32xf32>
    %141 = vector.extract_strided_slice %137 {offsets = [0, 64], sizes = [2, 32], strides = [1, 1]} : vector<2x128xf32> to vector<2x32xf32>
    %142 = arith.mulf %140, %141 : vector<2x32xf32>
    %143 = arith.addf %139, %142 : vector<2x32xf32>
    %144 = vector.extract_strided_slice %136 {offsets = [0, 96], sizes = [2, 32], strides = [1, 1]} : vector<2x128xf32> to vector<2x32xf32>
    %145 = math.tanh %143 : vector<2x32xf32>
    %146 = arith.mulf %144, %145 : vector<2x32xf32>
    %147 = tpu.concatenate %146, %123 in 1 : vector<2x32xf32>, vector<2x32xf32> -> vector<2x64xf32>
    %148 = arith.truncf %147 : vector<2x64xf32> to vector<2x64xbf16>
    %cst_61 = arith.constant dense<0.000000e+00> : vector<2x128xf32>
    %149 = tpu.matmul %148, %119, %cst_61 {dimension_numbers = #tpu.dot_dimension_numbers<[1], [0], [0], [1], [0, 0, 1, 1], [], []>} : vector<2x64xbf16>, vector<64x128xbf16>, vector<2x128xf32> -> vector<2x128xf32>
    %150 = vector.broadcast %120 : vector<1x128xf32> to vector<2x128xf32>
    %151 = arith.addf %149, %150 : vector<2x128xf32>
    %152 = arith.negf %151 : vector<2x128xf32>
    %153 = math.exp %152 : vector<2x128xf32>
    %cst_62 = arith.constant 1.000000e+00 : f32
    %154 = vector.broadcast %cst_62 : f32 to vector<2x128xf32>
    %155 = arith.addf %154, %153 : vector<2x128xf32>
    %156 = arith.divf %154, %155 : vector<2x128xf32>
    %157 = math.tanh %151 : vector<2x128xf32>
    %158 = vector.extract_strided_slice %156 {offsets = [0, 32], sizes = [2, 32], strides = [1, 1]} : vector<2x128xf32> to vector<2x32xf32>
    %159 = arith.mulf %158, %123 : vector<2x32xf32>
    %160 = vector.extract_strided_slice %156 {offsets = [0, 0], sizes = [2, 32], strides = [1, 1]} : vector<2x128xf32> to vector<2x32xf32>
    %161 = vector.extract_strided_slice %157 {offsets = [0, 64], sizes = [2, 32], strides = [1, 1]} : vector<2x128xf32> to vector<2x32xf32>
    %162 = arith.mulf %160, %161 : vector<2x32xf32>
    %163 = arith.addf %159, %162 : vector<2x32xf32>
    %164 = vector.extract_strided_slice %156 {offsets = [0, 96], sizes = [2, 32], strides = [1, 1]} : vector<2x128xf32> to vector<2x32xf32>
    %165 = math.tanh %163 : vector<2x32xf32>
    %166 = arith.mulf %164, %165 : vector<2x32xf32>
    %167 = arith.truncf %166 : vector<2x32xf32> to vector<2x32xbf16>
    %cst_63 = arith.constant dense<0.000000e+00> : vector<2x128xf32>
    %168 = tpu.matmul %167, %121, %cst_63 {dimension_numbers = #tpu.dot_dimension_numbers<[1], [0], [0], [1], [0, 0, 1, 1], [], []>} : vector<2x32xbf16>, vector<32x128xbf16>, vector<2x128xf32> -> vector<2x128xf32>
    %169 = vector.broadcast %122 : vector<1x128xf32> to vector<2x128xf32>
    %170 = arith.addf %168, %169 : vector<2x128xf32>
    %c0_64 = arith.constant 0 : index
    %c0_65 = arith.constant 0 : index
    %c0_66 = arith.constant 0 : index
    %171 = vector.load %arg16[%c0_64, %c0_65, %c0_66] : memref<8x2x128xf32, #tpu.memory_space<vmem>>, vector<1x2x128xf32>
    %172 = vector.shape_cast %171 : vector<1x2x128xf32> to vector<2x128xf32>
    %173 = vector.shape_cast %170 : vector<2x128xf32> to vector<1x2x128xf32>
    tpu.vector_store %arg16[%c0_64, %c0_65, %c0_66], %173 {strides = array<i32>} : memref<8x2x128xf32, #tpu.memory_space<vmem>>, vector<1x2x128xf32>,
    %174 = vector.extract_strided_slice %170 {offsets = [0, 0], sizes = [2, 64], strides = [1, 1]} : vector<2x128xf32> to vector<2x64xf32>
    %175 = vector.extract_strided_slice %174 {offsets = [0, 0], sizes = [2, 16], strides = [1, 1]} : vector<2x64xf32> to vector<2x16xf32>
    %c0_i32 = arith.constant 0 : i32
    %176 = vector.broadcast %c0_i32 : i32 to vector<2x16xi32>
    %177 = vector.extract_strided_slice %174 {offsets = [0, 16], sizes = [2, 16], strides = [1, 1]} : vector<2x64xf32> to vector<2x16xf32>
    %178 = arith.cmpf ogt, %177, %175 : vector<2x16xf32>
    %c1_i32 = arith.constant 1 : i32
    %179 = vector.broadcast %c1_i32 : i32 to vector<2x16xi32>
    %180 = arith.select %178, %179, %176 : vector<2x16xi1>, vector<2x16xi32>
    %181 = arith.select %178, %177, %175 : vector<2x16xi1>, vector<2x16xf32>
    %182 = vector.extract_strided_slice %174 {offsets = [0, 32], sizes = [2, 16], strides = [1, 1]} : vector<2x64xf32> to vector<2x16xf32>
    %183 = arith.cmpf ogt, %182, %181 : vector<2x16xf32>
    %c2_i32 = arith.constant 2 : i32
    %184 = vector.broadcast %c2_i32 : i32 to vector<2x16xi32>
    %185 = arith.select %183, %184, %180 : vector<2x16xi1>, vector<2x16xi32>
    %186 = arith.select %183, %182, %181 : vector<2x16xi1>, vector<2x16xf32>
    %187 = vector.extract_strided_slice %174 {offsets = [0, 48], sizes = [2, 16], strides = [1, 1]} : vector<2x64xf32> to vector<2x16xf32>
    %188 = arith.cmpf ogt, %187, %186 : vector<2x16xf32>
    %c3_i32 = arith.constant 3 : i32
    %189 = vector.broadcast %c3_i32 : i32 to vector<2x16xi32>
    %190 = arith.select %188, %189, %185 : vector<2x16xi1>, vector<2x16xi32>
    %c0_i32_67 = arith.constant 0 : i32
    %191 = vector.broadcast %c0_i32_67 : i32 to vector<2x16xi32>
    %192 = arith.cmpi eq, %190, %191 : vector<2x16xi32>
    %193 = arith.extui %192 : vector<2x16xi1> to vector<2x16xi32>
    %194 = arith.sitofp %193 : vector<2x16xi32> to vector<2x16xf32>
    %c1_i32_68 = arith.constant 1 : i32
    %195 = vector.broadcast %c1_i32_68 : i32 to vector<2x16xi32>
    %196 = arith.cmpi eq, %190, %195 : vector<2x16xi32>
    %197 = arith.extui %196 : vector<2x16xi1> to vector<2x16xi32>
    %198 = arith.sitofp %197 : vector<2x16xi32> to vector<2x16xf32>
    %c2_i32_69 = arith.constant 2 : i32
    %199 = vector.broadcast %c2_i32_69 : i32 to vector<2x16xi32>
    %200 = arith.cmpi eq, %190, %199 : vector<2x16xi32>
    %201 = arith.extui %200 : vector<2x16xi1> to vector<2x16xi32>
    %202 = arith.sitofp %201 : vector<2x16xi32> to vector<2x16xf32>
    %c3_i32_70 = arith.constant 3 : i32
    %203 = vector.broadcast %c3_i32_70 : i32 to vector<2x16xi32>
    %204 = arith.cmpi eq, %190, %203 : vector<2x16xi32>
    %205 = arith.extui %204 : vector<2x16xi1> to vector<2x16xi32>
    %206 = arith.sitofp %205 : vector<2x16xi32> to vector<2x16xf32>
    %207 = tpu.concatenate %194, %198, %202, %206 in 1 : vector<2x16xf32>, vector<2x16xf32>, vector<2x16xf32>, vector<2x16xf32> -> vector<2x64xf32>
    %208 = vector.extract_strided_slice %117 {offsets = [2, 0], sizes = [2, 128], strides = [1, 1]} : vector<16x128xf32> to vector<2x128xf32>
    %209 = tpu.concatenate %207, %146 in 1 : vector<2x64xf32>, vector<2x32xf32> -> vector<2x96xf32>
    %210 = arith.truncf %209 : vector<2x96xf32> to vector<2x96xbf16>
    %cst_71 = arith.constant dense<0.000000e+00> : vector<2x128xf32>
    %211 = tpu.matmul %210, %118, %cst_71 {dimension_numbers = #tpu.dot_dimension_numbers<[1], [0], [0], [1], [0, 0, 1, 1], [], []>} : vector<2x96xbf16>, vector<96x128xbf16>, vector<2x128xf32> -> vector<2x128xf32>
    %212 = arith.addf %208, %211 : vector<2x128xf32>
    %213 = arith.negf %212 : vector<2x128xf32>
    %214 = math.exp %213 : vector<2x128xf32>
    %cst_72 = arith.constant 1.000000e+00 : f32
    %215 = vector.broadcast %cst_72 : f32 to vector<2x128xf32>
    %216 = arith.addf %215, %214 : vector<2x128xf32>
    %217 = arith.divf %215, %216 : vector<2x128xf32>
    %218 = math.tanh %212 : vector<2x128xf32>
    %219 = vector.extract_strided_slice %217 {offsets = [0, 32], sizes = [2, 32], strides = [1, 1]} : vector<2x128xf32> to vector<2x32xf32>
    %220 = arith.mulf %219, %143 : vector<2x32xf32>
    %221 = vector.extract_strided_slice %217 {offsets = [0, 0], sizes = [2, 32], strides = [1, 1]} : vector<2x128xf32> to vector<2x32xf32>
    %222 = vector.extract_strided_slice %218 {offsets = [0, 64], sizes = [2, 32], strides = [1, 1]} : vector<2x128xf32> to vector<2x32xf32>
    %223 = arith.mulf %221, %222 : vector<2x32xf32>
    %224 = arith.addf %220, %223 : vector<2x32xf32>
    %225 = vector.extract_strided_slice %217 {offsets = [0, 96], sizes = [2, 32], strides = [1, 1]} : vector<2x128xf32> to vector<2x32xf32>
    %226 = math.tanh %224 : vector<2x32xf32>
    %227 = arith.mulf %225, %226 : vector<2x32xf32>
    %228 = tpu.concatenate %227, %166 in 1 : vector<2x32xf32>, vector<2x32xf32> -> vector<2x64xf32>
    %229 = arith.truncf %228 : vector<2x64xf32> to vector<2x64xbf16>
    %cst_73 = arith.constant dense<0.000000e+00> : vector<2x128xf32>
    %230 = tpu.matmul %229, %119, %cst_73 {dimension_numbers = #tpu.dot_dimension_numbers<[1], [0], [0], [1], [0, 0, 1, 1], [], []>} : vector<2x64xbf16>, vector<64x128xbf16>, vector<2x128xf32> -> vector<2x128xf32>
    %231 = vector.broadcast %120 : vector<1x128xf32> to vector<2x128xf32>
    %232 = arith.addf %230, %231 : vector<2x128xf32>
    %233 = arith.negf %232 : vector<2x128xf32>
    %234 = math.exp %233 : vector<2x128xf32>
    %cst_74 = arith.constant 1.000000e+00 : f32
    %235 = vector.broadcast %cst_74 : f32 to vector<2x128xf32>
    %236 = arith.addf %235, %234 : vector<2x128xf32>
    %237 = arith.divf %235, %236 : vector<2x128xf32>
    %238 = math.tanh %232 : vector<2x128xf32>
    %239 = vector.extract_strided_slice %237 {offsets = [0, 32], sizes = [2, 32], strides = [1, 1]} : vector<2x128xf32> to vector<2x32xf32>
    %240 = arith.mulf %239, %163 : vector<2x32xf32>
    %241 = vector.extract_strided_slice %237 {offsets = [0, 0], sizes = [2, 32], strides = [1, 1]} : vector<2x128xf32> to vector<2x32xf32>
    %242 = vector.extract_strided_slice %238 {offsets = [0, 64], sizes = [2, 32], strides = [1, 1]} : vector<2x128xf32> to vector<2x32xf32>
    %243 = arith.mulf %241, %242 : vector<2x32xf32>
    %244 = arith.addf %240, %243 : vector<2x32xf32>
    %245 = vector.extract_strided_slice %237 {offsets = [0, 96], sizes = [2, 32], strides = [1, 1]} : vector<2x128xf32> to vector<2x32xf32>
    %246 = math.tanh %244 : vector<2x32xf32>
    %247 = arith.mulf %245, %246 : vector<2x32xf32>
    %248 = arith.truncf %247 : vector<2x32xf32> to vector<2x32xbf16>
    %cst_75 = arith.constant dense<0.000000e+00> : vector<2x128xf32>
    %249 = tpu.matmul %248, %121, %cst_75 {dimension_numbers = #tpu.dot_dimension_numbers<[1], [0], [0], [1], [0, 0, 1, 1], [], []>} : vector<2x32xbf16>, vector<32x128xbf16>, vector<2x128xf32> -> vector<2x128xf32>
    %250 = vector.broadcast %122 : vector<1x128xf32> to vector<2x128xf32>
    %251 = arith.addf %249, %250 : vector<2x128xf32>
    %c1 = arith.constant 1 : index
    %c0_76 = arith.constant 0 : index
    %c0_77 = arith.constant 0 : index
    %252 = vector.load %arg16[%c1, %c0_76, %c0_77] : memref<8x2x128xf32, #tpu.memory_space<vmem>>, vector<1x2x128xf32>
    %253 = vector.shape_cast %252 : vector<1x2x128xf32> to vector<2x128xf32>
    %254 = vector.shape_cast %251 : vector<2x128xf32> to vector<1x2x128xf32>
    tpu.vector_store %arg16[%c1, %c0_76, %c0_77], %254 {strides = array<i32>} : memref<8x2x128xf32, #tpu.memory_space<vmem>>, vector<1x2x128xf32>,
    %255 = vector.extract_strided_slice %251 {offsets = [0, 0], sizes = [2, 64], strides = [1, 1]} : vector<2x128xf32> to vector<2x64xf32>
    %256 = vector.extract_strided_slice %255 {offsets = [0, 0], sizes = [2, 16], strides = [1, 1]} : vector<2x64xf32> to vector<2x16xf32>
    %c0_i32_78 = arith.constant 0 : i32
    %257 = vector.broadcast %c0_i32_78 : i32 to vector<2x16xi32>
    %258 = vector.extract_strided_slice %255 {offsets = [0, 16], sizes = [2, 16], strides = [1, 1]} : vector<2x64xf32> to vector<2x16xf32>
    %259 = arith.cmpf ogt, %258, %256 : vector<2x16xf32>
    %c1_i32_79 = arith.constant 1 : i32
    %260 = vector.broadcast %c1_i32_79 : i32 to vector<2x16xi32>
    %261 = arith.select %259, %260, %257 : vector<2x16xi1>, vector<2x16xi32>
    %262 = arith.select %259, %258, %256 : vector<2x16xi1>, vector<2x16xf32>
    %263 = vector.extract_strided_slice %255 {offsets = [0, 32], sizes = [2, 16], strides = [1, 1]} : vector<2x64xf32> to vector<2x16xf32>
    %264 = arith.cmpf ogt, %263, %262 : vector<2x16xf32>
    %c2_i32_80 = arith.constant 2 : i32
    %265 = vector.broadcast %c2_i32_80 : i32 to vector<2x16xi32>
    %266 = arith.select %264, %265, %261 : vector<2x16xi1>, vector<2x16xi32>
    %267 = arith.select %264, %263, %262 : vector<2x16xi1>, vector<2x16xf32>
    %268 = vector.extract_strided_slice %255 {offsets = [0, 48], sizes = [2, 16], strides = [1, 1]} : vector<2x64xf32> to vector<2x16xf32>
    %269 = arith.cmpf ogt, %268, %267 : vector<2x16xf32>
    %c3_i32_81 = arith.constant 3 : i32
    %270 = vector.broadcast %c3_i32_81 : i32 to vector<2x16xi32>
    %271 = arith.select %269, %270, %266 : vector<2x16xi1>, vector<2x16xi32>
    %c0_i32_82 = arith.constant 0 : i32
    %272 = vector.broadcast %c0_i32_82 : i32 to vector<2x16xi32>
    %273 = arith.cmpi eq, %271, %272 : vector<2x16xi32>
    %274 = arith.extui %273 : vector<2x16xi1> to vector<2x16xi32>
    %275 = arith.sitofp %274 : vector<2x16xi32> to vector<2x16xf32>
    %c1_i32_83 = arith.constant 1 : i32
    %276 = vector.broadcast %c1_i32_83 : i32 to vector<2x16xi32>
    %277 = arith.cmpi eq, %271, %276 : vector<2x16xi32>
    %278 = arith.extui %277 : vector<2x16xi1> to vector<2x16xi32>
    %279 = arith.sitofp %278 : vector<2x16xi32> to vector<2x16xf32>
    %c2_i32_84 = arith.constant 2 : i32
    %280 = vector.broadcast %c2_i32_84 : i32 to vector<2x16xi32>
    %281 = arith.cmpi eq, %271, %280 : vector<2x16xi32>
    %282 = arith.extui %281 : vector<2x16xi1> to vector<2x16xi32>
    %283 = arith.sitofp %282 : vector<2x16xi32> to vector<2x16xf32>
    %c3_i32_85 = arith.constant 3 : i32
    %284 = vector.broadcast %c3_i32_85 : i32 to vector<2x16xi32>
    %285 = arith.cmpi eq, %271, %284 : vector<2x16xi32>
    %286 = arith.extui %285 : vector<2x16xi1> to vector<2x16xi32>
    %287 = arith.sitofp %286 : vector<2x16xi32> to vector<2x16xf32>
    %288 = tpu.concatenate %275, %279, %283, %287 in 1 : vector<2x16xf32>, vector<2x16xf32>, vector<2x16xf32>, vector<2x16xf32> -> vector<2x64xf32>
    %289 = vector.extract_strided_slice %117 {offsets = [4, 0], sizes = [2, 128], strides = [1, 1]} : vector<16x128xf32> to vector<2x128xf32>
    %290 = tpu.concatenate %288, %227 in 1 : vector<2x64xf32>, vector<2x32xf32> -> vector<2x96xf32>
    %291 = arith.truncf %290 : vector<2x96xf32> to vector<2x96xbf16>
    %cst_86 = arith.constant dense<0.000000e+00> : vector<2x128xf32>
    %292 = tpu.matmul %291, %118, %cst_86 {dimension_numbers = #tpu.dot_dimension_numbers<[1], [0], [0], [1], [0, 0, 1, 1], [], []>} : vector<2x96xbf16>, vector<96x128xbf16>, vector<2x128xf32> -> vector<2x128xf32>
    %293 = arith.addf %289, %292 : vector<2x128xf32>
    %294 = arith.negf %293 : vector<2x128xf32>
    %295 = math.exp %294 : vector<2x128xf32>
    %cst_87 = arith.constant 1.000000e+00 : f32
    %296 = vector.broadcast %cst_87 : f32 to vector<2x128xf32>
    %297 = arith.addf %296, %295 : vector<2x128xf32>
    %298 = arith.divf %296, %297 : vector<2x128xf32>
    %299 = math.tanh %293 : vector<2x128xf32>
    %300 = vector.extract_strided_slice %298 {offsets = [0, 32], sizes = [2, 32], strides = [1, 1]} : vector<2x128xf32> to vector<2x32xf32>
    %301 = arith.mulf %300, %224 : vector<2x32xf32>
    %302 = vector.extract_strided_slice %298 {offsets = [0, 0], sizes = [2, 32], strides = [1, 1]} : vector<2x128xf32> to vector<2x32xf32>
    %303 = vector.extract_strided_slice %299 {offsets = [0, 64], sizes = [2, 32], strides = [1, 1]} : vector<2x128xf32> to vector<2x32xf32>
    %304 = arith.mulf %302, %303 : vector<2x32xf32>
    %305 = arith.addf %301, %304 : vector<2x32xf32>
    %306 = vector.extract_strided_slice %298 {offsets = [0, 96], sizes = [2, 32], strides = [1, 1]} : vector<2x128xf32> to vector<2x32xf32>
    %307 = math.tanh %305 : vector<2x32xf32>
    %308 = arith.mulf %306, %307 : vector<2x32xf32>
    %309 = tpu.concatenate %308, %247 in 1 : vector<2x32xf32>, vector<2x32xf32> -> vector<2x64xf32>
    %310 = arith.truncf %309 : vector<2x64xf32> to vector<2x64xbf16>
    %cst_88 = arith.constant dense<0.000000e+00> : vector<2x128xf32>
    %311 = tpu.matmul %310, %119, %cst_88 {dimension_numbers = #tpu.dot_dimension_numbers<[1], [0], [0], [1], [0, 0, 1, 1], [], []>} : vector<2x64xbf16>, vector<64x128xbf16>, vector<2x128xf32> -> vector<2x128xf32>
    %312 = vector.broadcast %120 : vector<1x128xf32> to vector<2x128xf32>
    %313 = arith.addf %311, %312 : vector<2x128xf32>
    %314 = arith.negf %313 : vector<2x128xf32>
    %315 = math.exp %314 : vector<2x128xf32>
    %cst_89 = arith.constant 1.000000e+00 : f32
    %316 = vector.broadcast %cst_89 : f32 to vector<2x128xf32>
    %317 = arith.addf %316, %315 : vector<2x128xf32>
    %318 = arith.divf %316, %317 : vector<2x128xf32>
    %319 = math.tanh %313 : vector<2x128xf32>
    %320 = vector.extract_strided_slice %318 {offsets = [0, 32], sizes = [2, 32], strides = [1, 1]} : vector<2x128xf32> to vector<2x32xf32>
    %321 = arith.mulf %320, %244 : vector<2x32xf32>
    %322 = vector.extract_strided_slice %318 {offsets = [0, 0], sizes = [2, 32], strides = [1, 1]} : vector<2x128xf32> to vector<2x32xf32>
    %323 = vector.extract_strided_slice %319 {offsets = [0, 64], sizes = [2, 32], strides = [1, 1]} : vector<2x128xf32> to vector<2x32xf32>
    %324 = arith.mulf %322, %323 : vector<2x32xf32>
    %325 = arith.addf %321, %324 : vector<2x32xf32>
    %326 = vector.extract_strided_slice %318 {offsets = [0, 96], sizes = [2, 32], strides = [1, 1]} : vector<2x128xf32> to vector<2x32xf32>
    %327 = math.tanh %325 : vector<2x32xf32>
    %328 = arith.mulf %326, %327 : vector<2x32xf32>
    %329 = arith.truncf %328 : vector<2x32xf32> to vector<2x32xbf16>
    %cst_90 = arith.constant dense<0.000000e+00> : vector<2x128xf32>
    %330 = tpu.matmul %329, %121, %cst_90 {dimension_numbers = #tpu.dot_dimension_numbers<[1], [0], [0], [1], [0, 0, 1, 1], [], []>} : vector<2x32xbf16>, vector<32x128xbf16>, vector<2x128xf32> -> vector<2x128xf32>
    %331 = vector.broadcast %122 : vector<1x128xf32> to vector<2x128xf32>
    %332 = arith.addf %330, %331 : vector<2x128xf32>
    %c2 = arith.constant 2 : index
    %c0_91 = arith.constant 0 : index
    %c0_92 = arith.constant 0 : index
    %333 = vector.load %arg16[%c2, %c0_91, %c0_92] : memref<8x2x128xf32, #tpu.memory_space<vmem>>, vector<1x2x128xf32>
    %334 = vector.shape_cast %333 : vector<1x2x128xf32> to vector<2x128xf32>
    %335 = vector.shape_cast %332 : vector<2x128xf32> to vector<1x2x128xf32>
    tpu.vector_store %arg16[%c2, %c0_91, %c0_92], %335 {strides = array<i32>} : memref<8x2x128xf32, #tpu.memory_space<vmem>>, vector<1x2x128xf32>,
    %336 = vector.extract_strided_slice %332 {offsets = [0, 0], sizes = [2, 64], strides = [1, 1]} : vector<2x128xf32> to vector<2x64xf32>
    %337 = vector.extract_strided_slice %336 {offsets = [0, 0], sizes = [2, 16], strides = [1, 1]} : vector<2x64xf32> to vector<2x16xf32>
    %c0_i32_93 = arith.constant 0 : i32
    %338 = vector.broadcast %c0_i32_93 : i32 to vector<2x16xi32>
    %339 = vector.extract_strided_slice %336 {offsets = [0, 16], sizes = [2, 16], strides = [1, 1]} : vector<2x64xf32> to vector<2x16xf32>
    %340 = arith.cmpf ogt, %339, %337 : vector<2x16xf32>
    %c1_i32_94 = arith.constant 1 : i32
    %341 = vector.broadcast %c1_i32_94 : i32 to vector<2x16xi32>
    %342 = arith.select %340, %341, %338 : vector<2x16xi1>, vector<2x16xi32>
    %343 = arith.select %340, %339, %337 : vector<2x16xi1>, vector<2x16xf32>
    %344 = vector.extract_strided_slice %336 {offsets = [0, 32], sizes = [2, 16], strides = [1, 1]} : vector<2x64xf32> to vector<2x16xf32>
    %345 = arith.cmpf ogt, %344, %343 : vector<2x16xf32>
    %c2_i32_95 = arith.constant 2 : i32
    %346 = vector.broadcast %c2_i32_95 : i32 to vector<2x16xi32>
    %347 = arith.select %345, %346, %342 : vector<2x16xi1>, vector<2x16xi32>
    %348 = arith.select %345, %344, %343 : vector<2x16xi1>, vector<2x16xf32>
    %349 = vector.extract_strided_slice %336 {offsets = [0, 48], sizes = [2, 16], strides = [1, 1]} : vector<2x64xf32> to vector<2x16xf32>
    %350 = arith.cmpf ogt, %349, %348 : vector<2x16xf32>
    %c3_i32_96 = arith.constant 3 : i32
    %351 = vector.broadcast %c3_i32_96 : i32 to vector<2x16xi32>
    %352 = arith.select %350, %351, %347 : vector<2x16xi1>, vector<2x16xi32>
    %c0_i32_97 = arith.constant 0 : i32
    %353 = vector.broadcast %c0_i32_97 : i32 to vector<2x16xi32>
    %354 = arith.cmpi eq, %352, %353 : vector<2x16xi32>
    %355 = arith.extui %354 : vector<2x16xi1> to vector<2x16xi32>
    %356 = arith.sitofp %355 : vector<2x16xi32> to vector<2x16xf32>
    %c1_i32_98 = arith.constant 1 : i32
    %357 = vector.broadcast %c1_i32_98 : i32 to vector<2x16xi32>
    %358 = arith.cmpi eq, %352, %357 : vector<2x16xi32>
    %359 = arith.extui %358 : vector<2x16xi1> to vector<2x16xi32>
    %360 = arith.sitofp %359 : vector<2x16xi32> to vector<2x16xf32>
    %c2_i32_99 = arith.constant 2 : i32
    %361 = vector.broadcast %c2_i32_99 : i32 to vector<2x16xi32>
    %362 = arith.cmpi eq, %352, %361 : vector<2x16xi32>
    %363 = arith.extui %362 : vector<2x16xi1> to vector<2x16xi32>
    %364 = arith.sitofp %363 : vector<2x16xi32> to vector<2x16xf32>
    %c3_i32_100 = arith.constant 3 : i32
    %365 = vector.broadcast %c3_i32_100 : i32 to vector<2x16xi32>
    %366 = arith.cmpi eq, %352, %365 : vector<2x16xi32>
    %367 = arith.extui %366 : vector<2x16xi1> to vector<2x16xi32>
    %368 = arith.sitofp %367 : vector<2x16xi32> to vector<2x16xf32>
    %369 = tpu.concatenate %356, %360, %364, %368 in 1 : vector<2x16xf32>, vector<2x16xf32>, vector<2x16xf32>, vector<2x16xf32> -> vector<2x64xf32>
    %370 = vector.extract_strided_slice %117 {offsets = [6, 0], sizes = [2, 128], strides = [1, 1]} : vector<16x128xf32> to vector<2x128xf32>
    %371 = tpu.concatenate %369, %308 in 1 : vector<2x64xf32>, vector<2x32xf32> -> vector<2x96xf32>
    %372 = arith.truncf %371 : vector<2x96xf32> to vector<2x96xbf16>
    %cst_101 = arith.constant dense<0.000000e+00> : vector<2x128xf32>
    %373 = tpu.matmul %372, %118, %cst_101 {dimension_numbers = #tpu.dot_dimension_numbers<[1], [0], [0], [1], [0, 0, 1, 1], [], []>} : vector<2x96xbf16>, vector<96x128xbf16>, vector<2x128xf32> -> vector<2x128xf32>
    %374 = arith.addf %370, %373 : vector<2x128xf32>
    %375 = arith.negf %374 : vector<2x128xf32>
    %376 = math.exp %375 : vector<2x128xf32>
    %cst_102 = arith.constant 1.000000e+00 : f32
    %377 = vector.broadcast %cst_102 : f32 to vector<2x128xf32>
    %378 = arith.addf %377, %376 : vector<2x128xf32>
    %379 = arith.divf %377, %378 : vector<2x128xf32>
    %380 = math.tanh %374 : vector<2x128xf32>
    %381 = vector.extract_strided_slice %379 {offsets = [0, 32], sizes = [2, 32], strides = [1, 1]} : vector<2x128xf32> to vector<2x32xf32>
    %382 = arith.mulf %381, %305 : vector<2x32xf32>
    %383 = vector.extract_strided_slice %379 {offsets = [0, 0], sizes = [2, 32], strides = [1, 1]} : vector<2x128xf32> to vector<2x32xf32>
    %384 = vector.extract_strided_slice %380 {offsets = [0, 64], sizes = [2, 32], strides = [1, 1]} : vector<2x128xf32> to vector<2x32xf32>
    %385 = arith.mulf %383, %384 : vector<2x32xf32>
    %386 = arith.addf %382, %385 : vector<2x32xf32>
    %387 = vector.extract_strided_slice %379 {offsets = [0, 96], sizes = [2, 32], strides = [1, 1]} : vector<2x128xf32> to vector<2x32xf32>
    %388 = math.tanh %386 : vector<2x32xf32>
    %389 = arith.mulf %387, %388 : vector<2x32xf32>
    %390 = tpu.concatenate %389, %328 in 1 : vector<2x32xf32>, vector<2x32xf32> -> vector<2x64xf32>
    %391 = arith.truncf %390 : vector<2x64xf32> to vector<2x64xbf16>
    %cst_103 = arith.constant dense<0.000000e+00> : vector<2x128xf32>
    %392 = tpu.matmul %391, %119, %cst_103 {dimension_numbers = #tpu.dot_dimension_numbers<[1], [0], [0], [1], [0, 0, 1, 1], [], []>} : vector<2x64xbf16>, vector<64x128xbf16>, vector<2x128xf32> -> vector<2x128xf32>
    %393 = vector.broadcast %120 : vector<1x128xf32> to vector<2x128xf32>
    %394 = arith.addf %392, %393 : vector<2x128xf32>
    %395 = arith.negf %394 : vector<2x128xf32>
    %396 = math.exp %395 : vector<2x128xf32>
    %cst_104 = arith.constant 1.000000e+00 : f32
    %397 = vector.broadcast %cst_104 : f32 to vector<2x128xf32>
    %398 = arith.addf %397, %396 : vector<2x128xf32>
    %399 = arith.divf %397, %398 : vector<2x128xf32>
    %400 = math.tanh %394 : vector<2x128xf32>
    %401 = vector.extract_strided_slice %399 {offsets = [0, 32], sizes = [2, 32], strides = [1, 1]} : vector<2x128xf32> to vector<2x32xf32>
    %402 = arith.mulf %401, %325 : vector<2x32xf32>
    %403 = vector.extract_strided_slice %399 {offsets = [0, 0], sizes = [2, 32], strides = [1, 1]} : vector<2x128xf32> to vector<2x32xf32>
    %404 = vector.extract_strided_slice %400 {offsets = [0, 64], sizes = [2, 32], strides = [1, 1]} : vector<2x128xf32> to vector<2x32xf32>
    %405 = arith.mulf %403, %404 : vector<2x32xf32>
    %406 = arith.addf %402, %405 : vector<2x32xf32>
    %407 = vector.extract_strided_slice %399 {offsets = [0, 96], sizes = [2, 32], strides = [1, 1]} : vector<2x128xf32> to vector<2x32xf32>
    %408 = math.tanh %406 : vector<2x32xf32>
    %409 = arith.mulf %407, %408 : vector<2x32xf32>
    %410 = arith.truncf %409 : vector<2x32xf32> to vector<2x32xbf16>
    %cst_105 = arith.constant dense<0.000000e+00> : vector<2x128xf32>
    %411 = tpu.matmul %410, %121, %cst_105 {dimension_numbers = #tpu.dot_dimension_numbers<[1], [0], [0], [1], [0, 0, 1, 1], [], []>} : vector<2x32xbf16>, vector<32x128xbf16>, vector<2x128xf32> -> vector<2x128xf32>
    %412 = vector.broadcast %122 : vector<1x128xf32> to vector<2x128xf32>
    %413 = arith.addf %411, %412 : vector<2x128xf32>
    %c3 = arith.constant 3 : index
    %c0_106 = arith.constant 0 : index
    %c0_107 = arith.constant 0 : index
    %414 = vector.load %arg16[%c3, %c0_106, %c0_107] : memref<8x2x128xf32, #tpu.memory_space<vmem>>, vector<1x2x128xf32>
    %415 = vector.shape_cast %414 : vector<1x2x128xf32> to vector<2x128xf32>
    %416 = vector.shape_cast %413 : vector<2x128xf32> to vector<1x2x128xf32>
    tpu.vector_store %arg16[%c3, %c0_106, %c0_107], %416 {strides = array<i32>} : memref<8x2x128xf32, #tpu.memory_space<vmem>>, vector<1x2x128xf32>,
    %417 = vector.extract_strided_slice %413 {offsets = [0, 0], sizes = [2, 64], strides = [1, 1]} : vector<2x128xf32> to vector<2x64xf32>
    %418 = vector.extract_strided_slice %417 {offsets = [0, 0], sizes = [2, 16], strides = [1, 1]} : vector<2x64xf32> to vector<2x16xf32>
    %c0_i32_108 = arith.constant 0 : i32
    %419 = vector.broadcast %c0_i32_108 : i32 to vector<2x16xi32>
    %420 = vector.extract_strided_slice %417 {offsets = [0, 16], sizes = [2, 16], strides = [1, 1]} : vector<2x64xf32> to vector<2x16xf32>
    %421 = arith.cmpf ogt, %420, %418 : vector<2x16xf32>
    %c1_i32_109 = arith.constant 1 : i32
    %422 = vector.broadcast %c1_i32_109 : i32 to vector<2x16xi32>
    %423 = arith.select %421, %422, %419 : vector<2x16xi1>, vector<2x16xi32>
    %424 = arith.select %421, %420, %418 : vector<2x16xi1>, vector<2x16xf32>
    %425 = vector.extract_strided_slice %417 {offsets = [0, 32], sizes = [2, 16], strides = [1, 1]} : vector<2x64xf32> to vector<2x16xf32>
    %426 = arith.cmpf ogt, %425, %424 : vector<2x16xf32>
    %c2_i32_110 = arith.constant 2 : i32
    %427 = vector.broadcast %c2_i32_110 : i32 to vector<2x16xi32>
    %428 = arith.select %426, %427, %423 : vector<2x16xi1>, vector<2x16xi32>
    %429 = arith.select %426, %425, %424 : vector<2x16xi1>, vector<2x16xf32>
    %430 = vector.extract_strided_slice %417 {offsets = [0, 48], sizes = [2, 16], strides = [1, 1]} : vector<2x64xf32> to vector<2x16xf32>
    %431 = arith.cmpf ogt, %430, %429 : vector<2x16xf32>
    %c3_i32_111 = arith.constant 3 : i32
    %432 = vector.broadcast %c3_i32_111 : i32 to vector<2x16xi32>
    %433 = arith.select %431, %432, %428 : vector<2x16xi1>, vector<2x16xi32>
    %c0_i32_112 = arith.constant 0 : i32
    %434 = vector.broadcast %c0_i32_112 : i32 to vector<2x16xi32>
    %435 = arith.cmpi eq, %433, %434 : vector<2x16xi32>
    %436 = arith.extui %435 : vector<2x16xi1> to vector<2x16xi32>
    %437 = arith.sitofp %436 : vector<2x16xi32> to vector<2x16xf32>
    %c1_i32_113 = arith.constant 1 : i32
    %438 = vector.broadcast %c1_i32_113 : i32 to vector<2x16xi32>
    %439 = arith.cmpi eq, %433, %438 : vector<2x16xi32>
    %440 = arith.extui %439 : vector<2x16xi1> to vector<2x16xi32>
    %441 = arith.sitofp %440 : vector<2x16xi32> to vector<2x16xf32>
    %c2_i32_114 = arith.constant 2 : i32
    %442 = vector.broadcast %c2_i32_114 : i32 to vector<2x16xi32>
    %443 = arith.cmpi eq, %433, %442 : vector<2x16xi32>
    %444 = arith.extui %443 : vector<2x16xi1> to vector<2x16xi32>
    %445 = arith.sitofp %444 : vector<2x16xi32> to vector<2x16xf32>
    %c3_i32_115 = arith.constant 3 : i32
    %446 = vector.broadcast %c3_i32_115 : i32 to vector<2x16xi32>
    %447 = arith.cmpi eq, %433, %446 : vector<2x16xi32>
    %448 = arith.extui %447 : vector<2x16xi1> to vector<2x16xi32>
    %449 = arith.sitofp %448 : vector<2x16xi32> to vector<2x16xf32>
    %450 = tpu.concatenate %437, %441, %445, %449 in 1 : vector<2x16xf32>, vector<2x16xf32>, vector<2x16xf32>, vector<2x16xf32> -> vector<2x64xf32>
    %451 = vector.extract_strided_slice %117 {offsets = [8, 0], sizes = [2, 128], strides = [1, 1]} : vector<16x128xf32> to vector<2x128xf32>
    %452 = tpu.concatenate %450, %389 in 1 : vector<2x64xf32>, vector<2x32xf32> -> vector<2x96xf32>
    %453 = arith.truncf %452 : vector<2x96xf32> to vector<2x96xbf16>
    %cst_116 = arith.constant dense<0.000000e+00> : vector<2x128xf32>
    %454 = tpu.matmul %453, %118, %cst_116 {dimension_numbers = #tpu.dot_dimension_numbers<[1], [0], [0], [1], [0, 0, 1, 1], [], []>} : vector<2x96xbf16>, vector<96x128xbf16>, vector<2x128xf32> -> vector<2x128xf32>
    %455 = arith.addf %451, %454 : vector<2x128xf32>
    %456 = arith.negf %455 : vector<2x128xf32>
    %457 = math.exp %456 : vector<2x128xf32>
    %cst_117 = arith.constant 1.000000e+00 : f32
    %458 = vector.broadcast %cst_117 : f32 to vector<2x128xf32>
    %459 = arith.addf %458, %457 : vector<2x128xf32>
    %460 = arith.divf %458, %459 : vector<2x128xf32>
    %461 = math.tanh %455 : vector<2x128xf32>
    %462 = vector.extract_strided_slice %460 {offsets = [0, 32], sizes = [2, 32], strides = [1, 1]} : vector<2x128xf32> to vector<2x32xf32>
    %463 = arith.mulf %462, %386 : vector<2x32xf32>
    %464 = vector.extract_strided_slice %460 {offsets = [0, 0], sizes = [2, 32], strides = [1, 1]} : vector<2x128xf32> to vector<2x32xf32>
    %465 = vector.extract_strided_slice %461 {offsets = [0, 64], sizes = [2, 32], strides = [1, 1]} : vector<2x128xf32> to vector<2x32xf32>
    %466 = arith.mulf %464, %465 : vector<2x32xf32>
    %467 = arith.addf %463, %466 : vector<2x32xf32>
    %468 = vector.extract_strided_slice %460 {offsets = [0, 96], sizes = [2, 32], strides = [1, 1]} : vector<2x128xf32> to vector<2x32xf32>
    %469 = math.tanh %467 : vector<2x32xf32>
    %470 = arith.mulf %468, %469 : vector<2x32xf32>
    %471 = tpu.concatenate %470, %409 in 1 : vector<2x32xf32>, vector<2x32xf32> -> vector<2x64xf32>
    %472 = arith.truncf %471 : vector<2x64xf32> to vector<2x64xbf16>
    %cst_118 = arith.constant dense<0.000000e+00> : vector<2x128xf32>
    %473 = tpu.matmul %472, %119, %cst_118 {dimension_numbers = #tpu.dot_dimension_numbers<[1], [0], [0], [1], [0, 0, 1, 1], [], []>} : vector<2x64xbf16>, vector<64x128xbf16>, vector<2x128xf32> -> vector<2x128xf32>
    %474 = vector.broadcast %120 : vector<1x128xf32> to vector<2x128xf32>
    %475 = arith.addf %473, %474 : vector<2x128xf32>
    %476 = arith.negf %475 : vector<2x128xf32>
    %477 = math.exp %476 : vector<2x128xf32>
    %cst_119 = arith.constant 1.000000e+00 : f32
    %478 = vector.broadcast %cst_119 : f32 to vector<2x128xf32>
    %479 = arith.addf %478, %477 : vector<2x128xf32>
    %480 = arith.divf %478, %479 : vector<2x128xf32>
    %481 = math.tanh %475 : vector<2x128xf32>
    %482 = vector.extract_strided_slice %480 {offsets = [0, 32], sizes = [2, 32], strides = [1, 1]} : vector<2x128xf32> to vector<2x32xf32>
    %483 = arith.mulf %482, %406 : vector<2x32xf32>
    %484 = vector.extract_strided_slice %480 {offsets = [0, 0], sizes = [2, 32], strides = [1, 1]} : vector<2x128xf32> to vector<2x32xf32>
    %485 = vector.extract_strided_slice %481 {offsets = [0, 64], sizes = [2, 32], strides = [1, 1]} : vector<2x128xf32> to vector<2x32xf32>
    %486 = arith.mulf %484, %485 : vector<2x32xf32>
    %487 = arith.addf %483, %486 : vector<2x32xf32>
    %488 = vector.extract_strided_slice %480 {offsets = [0, 96], sizes = [2, 32], strides = [1, 1]} : vector<2x128xf32> to vector<2x32xf32>
    %489 = math.tanh %487 : vector<2x32xf32>
    %490 = arith.mulf %488, %489 : vector<2x32xf32>
    %491 = arith.truncf %490 : vector<2x32xf32> to vector<2x32xbf16>
    %cst_120 = arith.constant dense<0.000000e+00> : vector<2x128xf32>
    %492 = tpu.matmul %491, %121, %cst_120 {dimension_numbers = #tpu.dot_dimension_numbers<[1], [0], [0], [1], [0, 0, 1, 1], [], []>} : vector<2x32xbf16>, vector<32x128xbf16>, vector<2x128xf32> -> vector<2x128xf32>
    %493 = vector.broadcast %122 : vector<1x128xf32> to vector<2x128xf32>
    %494 = arith.addf %492, %493 : vector<2x128xf32>
    %c4 = arith.constant 4 : index
    %c0_121 = arith.constant 0 : index
    %c0_122 = arith.constant 0 : index
    %495 = vector.load %arg16[%c4, %c0_121, %c0_122] : memref<8x2x128xf32, #tpu.memory_space<vmem>>, vector<1x2x128xf32>
    %496 = vector.shape_cast %495 : vector<1x2x128xf32> to vector<2x128xf32>
    %497 = vector.shape_cast %494 : vector<2x128xf32> to vector<1x2x128xf32>
    tpu.vector_store %arg16[%c4, %c0_121, %c0_122], %497 {strides = array<i32>} : memref<8x2x128xf32, #tpu.memory_space<vmem>>, vector<1x2x128xf32>,
    %498 = vector.extract_strided_slice %494 {offsets = [0, 0], sizes = [2, 64], strides = [1, 1]} : vector<2x128xf32> to vector<2x64xf32>
    %499 = vector.extract_strided_slice %498 {offsets = [0, 0], sizes = [2, 16], strides = [1, 1]} : vector<2x64xf32> to vector<2x16xf32>
    %c0_i32_123 = arith.constant 0 : i32
    %500 = vector.broadcast %c0_i32_123 : i32 to vector<2x16xi32>
    %501 = vector.extract_strided_slice %498 {offsets = [0, 16], sizes = [2, 16], strides = [1, 1]} : vector<2x64xf32> to vector<2x16xf32>
    %502 = arith.cmpf ogt, %501, %499 : vector<2x16xf32>
    %c1_i32_124 = arith.constant 1 : i32
    %503 = vector.broadcast %c1_i32_124 : i32 to vector<2x16xi32>
    %504 = arith.select %502, %503, %500 : vector<2x16xi1>, vector<2x16xi32>
    %505 = arith.select %502, %501, %499 : vector<2x16xi1>, vector<2x16xf32>
    %506 = vector.extract_strided_slice %498 {offsets = [0, 32], sizes = [2, 16], strides = [1, 1]} : vector<2x64xf32> to vector<2x16xf32>
    %507 = arith.cmpf ogt, %506, %505 : vector<2x16xf32>
    %c2_i32_125 = arith.constant 2 : i32
    %508 = vector.broadcast %c2_i32_125 : i32 to vector<2x16xi32>
    %509 = arith.select %507, %508, %504 : vector<2x16xi1>, vector<2x16xi32>
    %510 = arith.select %507, %506, %505 : vector<2x16xi1>, vector<2x16xf32>
    %511 = vector.extract_strided_slice %498 {offsets = [0, 48], sizes = [2, 16], strides = [1, 1]} : vector<2x64xf32> to vector<2x16xf32>
    %512 = arith.cmpf ogt, %511, %510 : vector<2x16xf32>
    %c3_i32_126 = arith.constant 3 : i32
    %513 = vector.broadcast %c3_i32_126 : i32 to vector<2x16xi32>
    %514 = arith.select %512, %513, %509 : vector<2x16xi1>, vector<2x16xi32>
    %c0_i32_127 = arith.constant 0 : i32
    %515 = vector.broadcast %c0_i32_127 : i32 to vector<2x16xi32>
    %516 = arith.cmpi eq, %514, %515 : vector<2x16xi32>
    %517 = arith.extui %516 : vector<2x16xi1> to vector<2x16xi32>
    %518 = arith.sitofp %517 : vector<2x16xi32> to vector<2x16xf32>
    %c1_i32_128 = arith.constant 1 : i32
    %519 = vector.broadcast %c1_i32_128 : i32 to vector<2x16xi32>
    %520 = arith.cmpi eq, %514, %519 : vector<2x16xi32>
    %521 = arith.extui %520 : vector<2x16xi1> to vector<2x16xi32>
    %522 = arith.sitofp %521 : vector<2x16xi32> to vector<2x16xf32>
    %c2_i32_129 = arith.constant 2 : i32
    %523 = vector.broadcast %c2_i32_129 : i32 to vector<2x16xi32>
    %524 = arith.cmpi eq, %514, %523 : vector<2x16xi32>
    %525 = arith.extui %524 : vector<2x16xi1> to vector<2x16xi32>
    %526 = arith.sitofp %525 : vector<2x16xi32> to vector<2x16xf32>
    %c3_i32_130 = arith.constant 3 : i32
    %527 = vector.broadcast %c3_i32_130 : i32 to vector<2x16xi32>
    %528 = arith.cmpi eq, %514, %527 : vector<2x16xi32>
    %529 = arith.extui %528 : vector<2x16xi1> to vector<2x16xi32>
    %530 = arith.sitofp %529 : vector<2x16xi32> to vector<2x16xf32>
    %531 = tpu.concatenate %518, %522, %526, %530 in 1 : vector<2x16xf32>, vector<2x16xf32>, vector<2x16xf32>, vector<2x16xf32> -> vector<2x64xf32>
    %532 = vector.extract_strided_slice %117 {offsets = [10, 0], sizes = [2, 128], strides = [1, 1]} : vector<16x128xf32> to vector<2x128xf32>
    %533 = tpu.concatenate %531, %470 in 1 : vector<2x64xf32>, vector<2x32xf32> -> vector<2x96xf32>
    %534 = arith.truncf %533 : vector<2x96xf32> to vector<2x96xbf16>
    %cst_131 = arith.constant dense<0.000000e+00> : vector<2x128xf32>
    %535 = tpu.matmul %534, %118, %cst_131 {dimension_numbers = #tpu.dot_dimension_numbers<[1], [0], [0], [1], [0, 0, 1, 1], [], []>} : vector<2x96xbf16>, vector<96x128xbf16>, vector<2x128xf32> -> vector<2x128xf32>
    %536 = arith.addf %532, %535 : vector<2x128xf32>
    %537 = arith.negf %536 : vector<2x128xf32>
    %538 = math.exp %537 : vector<2x128xf32>
    %cst_132 = arith.constant 1.000000e+00 : f32
    %539 = vector.broadcast %cst_132 : f32 to vector<2x128xf32>
    %540 = arith.addf %539, %538 : vector<2x128xf32>
    %541 = arith.divf %539, %540 : vector<2x128xf32>
    %542 = math.tanh %536 : vector<2x128xf32>
    %543 = vector.extract_strided_slice %541 {offsets = [0, 32], sizes = [2, 32], strides = [1, 1]} : vector<2x128xf32> to vector<2x32xf32>
    %544 = arith.mulf %543, %467 : vector<2x32xf32>
    %545 = vector.extract_strided_slice %541 {offsets = [0, 0], sizes = [2, 32], strides = [1, 1]} : vector<2x128xf32> to vector<2x32xf32>
    %546 = vector.extract_strided_slice %542 {offsets = [0, 64], sizes = [2, 32], strides = [1, 1]} : vector<2x128xf32> to vector<2x32xf32>
    %547 = arith.mulf %545, %546 : vector<2x32xf32>
    %548 = arith.addf %544, %547 : vector<2x32xf32>
    %549 = vector.extract_strided_slice %541 {offsets = [0, 96], sizes = [2, 32], strides = [1, 1]} : vector<2x128xf32> to vector<2x32xf32>
    %550 = math.tanh %548 : vector<2x32xf32>
    %551 = arith.mulf %549, %550 : vector<2x32xf32>
    %552 = tpu.concatenate %551, %490 in 1 : vector<2x32xf32>, vector<2x32xf32> -> vector<2x64xf32>
    %553 = arith.truncf %552 : vector<2x64xf32> to vector<2x64xbf16>
    %cst_133 = arith.constant dense<0.000000e+00> : vector<2x128xf32>
    %554 = tpu.matmul %553, %119, %cst_133 {dimension_numbers = #tpu.dot_dimension_numbers<[1], [0], [0], [1], [0, 0, 1, 1], [], []>} : vector<2x64xbf16>, vector<64x128xbf16>, vector<2x128xf32> -> vector<2x128xf32>
    %555 = vector.broadcast %120 : vector<1x128xf32> to vector<2x128xf32>
    %556 = arith.addf %554, %555 : vector<2x128xf32>
    %557 = arith.negf %556 : vector<2x128xf32>
    %558 = math.exp %557 : vector<2x128xf32>
    %cst_134 = arith.constant 1.000000e+00 : f32
    %559 = vector.broadcast %cst_134 : f32 to vector<2x128xf32>
    %560 = arith.addf %559, %558 : vector<2x128xf32>
    %561 = arith.divf %559, %560 : vector<2x128xf32>
    %562 = math.tanh %556 : vector<2x128xf32>
    %563 = vector.extract_strided_slice %561 {offsets = [0, 32], sizes = [2, 32], strides = [1, 1]} : vector<2x128xf32> to vector<2x32xf32>
    %564 = arith.mulf %563, %487 : vector<2x32xf32>
    %565 = vector.extract_strided_slice %561 {offsets = [0, 0], sizes = [2, 32], strides = [1, 1]} : vector<2x128xf32> to vector<2x32xf32>
    %566 = vector.extract_strided_slice %562 {offsets = [0, 64], sizes = [2, 32], strides = [1, 1]} : vector<2x128xf32> to vector<2x32xf32>
    %567 = arith.mulf %565, %566 : vector<2x32xf32>
    %568 = arith.addf %564, %567 : vector<2x32xf32>
    %569 = vector.extract_strided_slice %561 {offsets = [0, 96], sizes = [2, 32], strides = [1, 1]} : vector<2x128xf32> to vector<2x32xf32>
    %570 = math.tanh %568 : vector<2x32xf32>
    %571 = arith.mulf %569, %570 : vector<2x32xf32>
    %572 = arith.truncf %571 : vector<2x32xf32> to vector<2x32xbf16>
    %cst_135 = arith.constant dense<0.000000e+00> : vector<2x128xf32>
    %573 = tpu.matmul %572, %121, %cst_135 {dimension_numbers = #tpu.dot_dimension_numbers<[1], [0], [0], [1], [0, 0, 1, 1], [], []>} : vector<2x32xbf16>, vector<32x128xbf16>, vector<2x128xf32> -> vector<2x128xf32>
    %574 = vector.broadcast %122 : vector<1x128xf32> to vector<2x128xf32>
    %575 = arith.addf %573, %574 : vector<2x128xf32>
    %c5 = arith.constant 5 : index
    %c0_136 = arith.constant 0 : index
    %c0_137 = arith.constant 0 : index
    %576 = vector.load %arg16[%c5, %c0_136, %c0_137] : memref<8x2x128xf32, #tpu.memory_space<vmem>>, vector<1x2x128xf32>
    %577 = vector.shape_cast %576 : vector<1x2x128xf32> to vector<2x128xf32>
    %578 = vector.shape_cast %575 : vector<2x128xf32> to vector<1x2x128xf32>
    tpu.vector_store %arg16[%c5, %c0_136, %c0_137], %578 {strides = array<i32>} : memref<8x2x128xf32, #tpu.memory_space<vmem>>, vector<1x2x128xf32>,
    %579 = vector.extract_strided_slice %575 {offsets = [0, 0], sizes = [2, 64], strides = [1, 1]} : vector<2x128xf32> to vector<2x64xf32>
    %580 = vector.extract_strided_slice %579 {offsets = [0, 0], sizes = [2, 16], strides = [1, 1]} : vector<2x64xf32> to vector<2x16xf32>
    %c0_i32_138 = arith.constant 0 : i32
    %581 = vector.broadcast %c0_i32_138 : i32 to vector<2x16xi32>
    %582 = vector.extract_strided_slice %579 {offsets = [0, 16], sizes = [2, 16], strides = [1, 1]} : vector<2x64xf32> to vector<2x16xf32>
    %583 = arith.cmpf ogt, %582, %580 : vector<2x16xf32>
    %c1_i32_139 = arith.constant 1 : i32
    %584 = vector.broadcast %c1_i32_139 : i32 to vector<2x16xi32>
    %585 = arith.select %583, %584, %581 : vector<2x16xi1>, vector<2x16xi32>
    %586 = arith.select %583, %582, %580 : vector<2x16xi1>, vector<2x16xf32>
    %587 = vector.extract_strided_slice %579 {offsets = [0, 32], sizes = [2, 16], strides = [1, 1]} : vector<2x64xf32> to vector<2x16xf32>
    %588 = arith.cmpf ogt, %587, %586 : vector<2x16xf32>
    %c2_i32_140 = arith.constant 2 : i32
    %589 = vector.broadcast %c2_i32_140 : i32 to vector<2x16xi32>
    %590 = arith.select %588, %589, %585 : vector<2x16xi1>, vector<2x16xi32>
    %591 = arith.select %588, %587, %586 : vector<2x16xi1>, vector<2x16xf32>
    %592 = vector.extract_strided_slice %579 {offsets = [0, 48], sizes = [2, 16], strides = [1, 1]} : vector<2x64xf32> to vector<2x16xf32>
    %593 = arith.cmpf ogt, %592, %591 : vector<2x16xf32>
    %c3_i32_141 = arith.constant 3 : i32
    %594 = vector.broadcast %c3_i32_141 : i32 to vector<2x16xi32>
    %595 = arith.select %593, %594, %590 : vector<2x16xi1>, vector<2x16xi32>
    %c0_i32_142 = arith.constant 0 : i32
    %596 = vector.broadcast %c0_i32_142 : i32 to vector<2x16xi32>
    %597 = arith.cmpi eq, %595, %596 : vector<2x16xi32>
    %598 = arith.extui %597 : vector<2x16xi1> to vector<2x16xi32>
    %599 = arith.sitofp %598 : vector<2x16xi32> to vector<2x16xf32>
    %c1_i32_143 = arith.constant 1 : i32
    %600 = vector.broadcast %c1_i32_143 : i32 to vector<2x16xi32>
    %601 = arith.cmpi eq, %595, %600 : vector<2x16xi32>
    %602 = arith.extui %601 : vector<2x16xi1> to vector<2x16xi32>
    %603 = arith.sitofp %602 : vector<2x16xi32> to vector<2x16xf32>
    %c2_i32_144 = arith.constant 2 : i32
    %604 = vector.broadcast %c2_i32_144 : i32 to vector<2x16xi32>
    %605 = arith.cmpi eq, %595, %604 : vector<2x16xi32>
    %606 = arith.extui %605 : vector<2x16xi1> to vector<2x16xi32>
    %607 = arith.sitofp %606 : vector<2x16xi32> to vector<2x16xf32>
    %c3_i32_145 = arith.constant 3 : i32
    %608 = vector.broadcast %c3_i32_145 : i32 to vector<2x16xi32>
    %609 = arith.cmpi eq, %595, %608 : vector<2x16xi32>
    %610 = arith.extui %609 : vector<2x16xi1> to vector<2x16xi32>
    %611 = arith.sitofp %610 : vector<2x16xi32> to vector<2x16xf32>
    %612 = tpu.concatenate %599, %603, %607, %611 in 1 : vector<2x16xf32>, vector<2x16xf32>, vector<2x16xf32>, vector<2x16xf32> -> vector<2x64xf32>
    %613 = vector.extract_strided_slice %117 {offsets = [12, 0], sizes = [2, 128], strides = [1, 1]} : vector<16x128xf32> to vector<2x128xf32>
    %614 = tpu.concatenate %612, %551 in 1 : vector<2x64xf32>, vector<2x32xf32> -> vector<2x96xf32>
    %615 = arith.truncf %614 : vector<2x96xf32> to vector<2x96xbf16>
    %cst_146 = arith.constant dense<0.000000e+00> : vector<2x128xf32>
    %616 = tpu.matmul %615, %118, %cst_146 {dimension_numbers = #tpu.dot_dimension_numbers<[1], [0], [0], [1], [0, 0, 1, 1], [], []>} : vector<2x96xbf16>, vector<96x128xbf16>, vector<2x128xf32> -> vector<2x128xf32>
    %617 = arith.addf %613, %616 : vector<2x128xf32>
    %618 = arith.negf %617 : vector<2x128xf32>
    %619 = math.exp %618 : vector<2x128xf32>
    %cst_147 = arith.constant 1.000000e+00 : f32
    %620 = vector.broadcast %cst_147 : f32 to vector<2x128xf32>
    %621 = arith.addf %620, %619 : vector<2x128xf32>
    %622 = arith.divf %620, %621 : vector<2x128xf32>
    %623 = math.tanh %617 : vector<2x128xf32>
    %624 = vector.extract_strided_slice %622 {offsets = [0, 32], sizes = [2, 32], strides = [1, 1]} : vector<2x128xf32> to vector<2x32xf32>
    %625 = arith.mulf %624, %548 : vector<2x32xf32>
    %626 = vector.extract_strided_slice %622 {offsets = [0, 0], sizes = [2, 32], strides = [1, 1]} : vector<2x128xf32> to vector<2x32xf32>
    %627 = vector.extract_strided_slice %623 {offsets = [0, 64], sizes = [2, 32], strides = [1, 1]} : vector<2x128xf32> to vector<2x32xf32>
    %628 = arith.mulf %626, %627 : vector<2x32xf32>
    %629 = arith.addf %625, %628 : vector<2x32xf32>
    %630 = vector.extract_strided_slice %622 {offsets = [0, 96], sizes = [2, 32], strides = [1, 1]} : vector<2x128xf32> to vector<2x32xf32>
    %631 = math.tanh %629 : vector<2x32xf32>
    %632 = arith.mulf %630, %631 : vector<2x32xf32>
    %633 = tpu.concatenate %632, %571 in 1 : vector<2x32xf32>, vector<2x32xf32> -> vector<2x64xf32>
    %634 = arith.truncf %633 : vector<2x64xf32> to vector<2x64xbf16>
    %cst_148 = arith.constant dense<0.000000e+00> : vector<2x128xf32>
    %635 = tpu.matmul %634, %119, %cst_148 {dimension_numbers = #tpu.dot_dimension_numbers<[1], [0], [0], [1], [0, 0, 1, 1], [], []>} : vector<2x64xbf16>, vector<64x128xbf16>, vector<2x128xf32> -> vector<2x128xf32>
    %636 = vector.broadcast %120 : vector<1x128xf32> to vector<2x128xf32>
    %637 = arith.addf %635, %636 : vector<2x128xf32>
    %638 = arith.negf %637 : vector<2x128xf32>
    %639 = math.exp %638 : vector<2x128xf32>
    %cst_149 = arith.constant 1.000000e+00 : f32
    %640 = vector.broadcast %cst_149 : f32 to vector<2x128xf32>
    %641 = arith.addf %640, %639 : vector<2x128xf32>
    %642 = arith.divf %640, %641 : vector<2x128xf32>
    %643 = math.tanh %637 : vector<2x128xf32>
    %644 = vector.extract_strided_slice %642 {offsets = [0, 32], sizes = [2, 32], strides = [1, 1]} : vector<2x128xf32> to vector<2x32xf32>
    %645 = arith.mulf %644, %568 : vector<2x32xf32>
    %646 = vector.extract_strided_slice %642 {offsets = [0, 0], sizes = [2, 32], strides = [1, 1]} : vector<2x128xf32> to vector<2x32xf32>
    %647 = vector.extract_strided_slice %643 {offsets = [0, 64], sizes = [2, 32], strides = [1, 1]} : vector<2x128xf32> to vector<2x32xf32>
    %648 = arith.mulf %646, %647 : vector<2x32xf32>
    %649 = arith.addf %645, %648 : vector<2x32xf32>
    %650 = vector.extract_strided_slice %642 {offsets = [0, 96], sizes = [2, 32], strides = [1, 1]} : vector<2x128xf32> to vector<2x32xf32>
    %651 = math.tanh %649 : vector<2x32xf32>
    %652 = arith.mulf %650, %651 : vector<2x32xf32>
    %653 = arith.truncf %652 : vector<2x32xf32> to vector<2x32xbf16>
    %cst_150 = arith.constant dense<0.000000e+00> : vector<2x128xf32>
    %654 = tpu.matmul %653, %121, %cst_150 {dimension_numbers = #tpu.dot_dimension_numbers<[1], [0], [0], [1], [0, 0, 1, 1], [], []>} : vector<2x32xbf16>, vector<32x128xbf16>, vector<2x128xf32> -> vector<2x128xf32>
    %655 = vector.broadcast %122 : vector<1x128xf32> to vector<2x128xf32>
    %656 = arith.addf %654, %655 : vector<2x128xf32>
    %c6 = arith.constant 6 : index
    %c0_151 = arith.constant 0 : index
    %c0_152 = arith.constant 0 : index
    %657 = vector.load %arg16[%c6, %c0_151, %c0_152] : memref<8x2x128xf32, #tpu.memory_space<vmem>>, vector<1x2x128xf32>
    %658 = vector.shape_cast %657 : vector<1x2x128xf32> to vector<2x128xf32>
    %659 = vector.shape_cast %656 : vector<2x128xf32> to vector<1x2x128xf32>
    tpu.vector_store %arg16[%c6, %c0_151, %c0_152], %659 {strides = array<i32>} : memref<8x2x128xf32, #tpu.memory_space<vmem>>, vector<1x2x128xf32>,
    %660 = vector.extract_strided_slice %656 {offsets = [0, 0], sizes = [2, 64], strides = [1, 1]} : vector<2x128xf32> to vector<2x64xf32>
    %661 = vector.extract_strided_slice %660 {offsets = [0, 0], sizes = [2, 16], strides = [1, 1]} : vector<2x64xf32> to vector<2x16xf32>
    %c0_i32_153 = arith.constant 0 : i32
    %662 = vector.broadcast %c0_i32_153 : i32 to vector<2x16xi32>
    %663 = vector.extract_strided_slice %660 {offsets = [0, 16], sizes = [2, 16], strides = [1, 1]} : vector<2x64xf32> to vector<2x16xf32>
    %664 = arith.cmpf ogt, %663, %661 : vector<2x16xf32>
    %c1_i32_154 = arith.constant 1 : i32
    %665 = vector.broadcast %c1_i32_154 : i32 to vector<2x16xi32>
    %666 = arith.select %664, %665, %662 : vector<2x16xi1>, vector<2x16xi32>
    %667 = arith.select %664, %663, %661 : vector<2x16xi1>, vector<2x16xf32>
    %668 = vector.extract_strided_slice %660 {offsets = [0, 32], sizes = [2, 16], strides = [1, 1]} : vector<2x64xf32> to vector<2x16xf32>
    %669 = arith.cmpf ogt, %668, %667 : vector<2x16xf32>
    %c2_i32_155 = arith.constant 2 : i32
    %670 = vector.broadcast %c2_i32_155 : i32 to vector<2x16xi32>
    %671 = arith.select %669, %670, %666 : vector<2x16xi1>, vector<2x16xi32>
    %672 = arith.select %669, %668, %667 : vector<2x16xi1>, vector<2x16xf32>
    %673 = vector.extract_strided_slice %660 {offsets = [0, 48], sizes = [2, 16], strides = [1, 1]} : vector<2x64xf32> to vector<2x16xf32>
    %674 = arith.cmpf ogt, %673, %672 : vector<2x16xf32>
    %c3_i32_156 = arith.constant 3 : i32
    %675 = vector.broadcast %c3_i32_156 : i32 to vector<2x16xi32>
    %676 = arith.select %674, %675, %671 : vector<2x16xi1>, vector<2x16xi32>
    %c0_i32_157 = arith.constant 0 : i32
    %677 = vector.broadcast %c0_i32_157 : i32 to vector<2x16xi32>
    %678 = arith.cmpi eq, %676, %677 : vector<2x16xi32>
    %679 = arith.extui %678 : vector<2x16xi1> to vector<2x16xi32>
    %680 = arith.sitofp %679 : vector<2x16xi32> to vector<2x16xf32>
    %c1_i32_158 = arith.constant 1 : i32
    %681 = vector.broadcast %c1_i32_158 : i32 to vector<2x16xi32>
    %682 = arith.cmpi eq, %676, %681 : vector<2x16xi32>
    %683 = arith.extui %682 : vector<2x16xi1> to vector<2x16xi32>
    %684 = arith.sitofp %683 : vector<2x16xi32> to vector<2x16xf32>
    %c2_i32_159 = arith.constant 2 : i32
    %685 = vector.broadcast %c2_i32_159 : i32 to vector<2x16xi32>
    %686 = arith.cmpi eq, %676, %685 : vector<2x16xi32>
    %687 = arith.extui %686 : vector<2x16xi1> to vector<2x16xi32>
    %688 = arith.sitofp %687 : vector<2x16xi32> to vector<2x16xf32>
    %c3_i32_160 = arith.constant 3 : i32
    %689 = vector.broadcast %c3_i32_160 : i32 to vector<2x16xi32>
    %690 = arith.cmpi eq, %676, %689 : vector<2x16xi32>
    %691 = arith.extui %690 : vector<2x16xi1> to vector<2x16xi32>
    %692 = arith.sitofp %691 : vector<2x16xi32> to vector<2x16xf32>
    %693 = tpu.concatenate %680, %684, %688, %692 in 1 : vector<2x16xf32>, vector<2x16xf32>, vector<2x16xf32>, vector<2x16xf32> -> vector<2x64xf32>
    %694 = vector.extract_strided_slice %117 {offsets = [14, 0], sizes = [2, 128], strides = [1, 1]} : vector<16x128xf32> to vector<2x128xf32>
    %695 = tpu.concatenate %693, %632 in 1 : vector<2x64xf32>, vector<2x32xf32> -> vector<2x96xf32>
    %696 = arith.truncf %695 : vector<2x96xf32> to vector<2x96xbf16>
    %cst_161 = arith.constant dense<0.000000e+00> : vector<2x128xf32>
    %697 = tpu.matmul %696, %118, %cst_161 {dimension_numbers = #tpu.dot_dimension_numbers<[1], [0], [0], [1], [0, 0, 1, 1], [], []>} : vector<2x96xbf16>, vector<96x128xbf16>, vector<2x128xf32> -> vector<2x128xf32>
    %698 = arith.addf %694, %697 : vector<2x128xf32>
    %699 = arith.negf %698 : vector<2x128xf32>
    %700 = math.exp %699 : vector<2x128xf32>
    %cst_162 = arith.constant 1.000000e+00 : f32
    %701 = vector.broadcast %cst_162 : f32 to vector<2x128xf32>
    %702 = arith.addf %701, %700 : vector<2x128xf32>
    %703 = arith.divf %701, %702 : vector<2x128xf32>
    %704 = math.tanh %698 : vector<2x128xf32>
    %705 = vector.extract_strided_slice %703 {offsets = [0, 32], sizes = [2, 32], strides = [1, 1]} : vector<2x128xf32> to vector<2x32xf32>
    %706 = arith.mulf %705, %629 : vector<2x32xf32>
    %707 = vector.extract_strided_slice %703 {offsets = [0, 0], sizes = [2, 32], strides = [1, 1]} : vector<2x128xf32> to vector<2x32xf32>
    %708 = vector.extract_strided_slice %704 {offsets = [0, 64], sizes = [2, 32], strides = [1, 1]} : vector<2x128xf32> to vector<2x32xf32>
    %709 = arith.mulf %707, %708 : vector<2x32xf32>
    %710 = arith.addf %706, %709 : vector<2x32xf32>
    %711 = vector.extract_strided_slice %703 {offsets = [0, 96], sizes = [2, 32], strides = [1, 1]} : vector<2x128xf32> to vector<2x32xf32>
    %712 = math.tanh %710 : vector<2x32xf32>
    %713 = arith.mulf %711, %712 : vector<2x32xf32>
    %714 = tpu.concatenate %713, %652 in 1 : vector<2x32xf32>, vector<2x32xf32> -> vector<2x64xf32>
    %715 = arith.truncf %714 : vector<2x64xf32> to vector<2x64xbf16>
    %cst_163 = arith.constant dense<0.000000e+00> : vector<2x128xf32>
    %716 = tpu.matmul %715, %119, %cst_163 {dimension_numbers = #tpu.dot_dimension_numbers<[1], [0], [0], [1], [0, 0, 1, 1], [], []>} : vector<2x64xbf16>, vector<64x128xbf16>, vector<2x128xf32> -> vector<2x128xf32>
    %717 = vector.broadcast %120 : vector<1x128xf32> to vector<2x128xf32>
    %718 = arith.addf %716, %717 : vector<2x128xf32>
    %719 = arith.negf %718 : vector<2x128xf32>
    %720 = math.exp %719 : vector<2x128xf32>
    %cst_164 = arith.constant 1.000000e+00 : f32
    %721 = vector.broadcast %cst_164 : f32 to vector<2x128xf32>
    %722 = arith.addf %721, %720 : vector<2x128xf32>
    %723 = arith.divf %721, %722 : vector<2x128xf32>
    %724 = math.tanh %718 : vector<2x128xf32>
    %725 = vector.extract_strided_slice %723 {offsets = [0, 32], sizes = [2, 32], strides = [1, 1]} : vector<2x128xf32> to vector<2x32xf32>
    %726 = arith.mulf %725, %649 : vector<2x32xf32>
    %727 = vector.extract_strided_slice %723 {offsets = [0, 0], sizes = [2, 32], strides = [1, 1]} : vector<2x128xf32> to vector<2x32xf32>
    %728 = vector.extract_strided_slice %724 {offsets = [0, 64], sizes = [2, 32], strides = [1, 1]} : vector<2x128xf32> to vector<2x32xf32>
    %729 = arith.mulf %727, %728 : vector<2x32xf32>
    %730 = arith.addf %726, %729 : vector<2x32xf32>
    %731 = vector.extract_strided_slice %723 {offsets = [0, 96], sizes = [2, 32], strides = [1, 1]} : vector<2x128xf32> to vector<2x32xf32>
    %732 = math.tanh %730 : vector<2x32xf32>
    %733 = arith.mulf %731, %732 : vector<2x32xf32>
    %734 = arith.truncf %733 : vector<2x32xf32> to vector<2x32xbf16>
    %cst_165 = arith.constant dense<0.000000e+00> : vector<2x128xf32>
    %735 = tpu.matmul %734, %121, %cst_165 {dimension_numbers = #tpu.dot_dimension_numbers<[1], [0], [0], [1], [0, 0, 1, 1], [], []>} : vector<2x32xbf16>, vector<32x128xbf16>, vector<2x128xf32> -> vector<2x128xf32>
    %736 = vector.broadcast %122 : vector<1x128xf32> to vector<2x128xf32>
    %737 = arith.addf %735, %736 : vector<2x128xf32>
    %c7 = arith.constant 7 : index
    %c0_166 = arith.constant 0 : index
    %c0_167 = arith.constant 0 : index
    %738 = vector.load %arg16[%c7, %c0_166, %c0_167] : memref<8x2x128xf32, #tpu.memory_space<vmem>>, vector<1x2x128xf32>
    %739 = vector.shape_cast %738 : vector<1x2x128xf32> to vector<2x128xf32>
    %740 = vector.shape_cast %737 : vector<2x128xf32> to vector<1x2x128xf32>
    tpu.vector_store %arg16[%c7, %c0_166, %c0_167], %740 {strides = array<i32>} : memref<8x2x128xf32, #tpu.memory_space<vmem>>, vector<1x2x128xf32>,
    return
  }
}

</mosaic_0001>

<bundles_post_ra>
// kernel: tile.19
= control target key start
LH: loop header
LB: loop body
LE: loop exit
PB: predicated region body
PF: predicated region fallthrough
CT: control target
= control target key end

     0   :  { %s133_s10 = smov 30   ;;  %s134_s11 = smov 26   ;;  %vm3_vm0 = vcmask 15360   ;;  %vm9_vm1 = vcmask 261360   ;;  %vm15_vm2 = vcmask 244960   ;;  %vm21_vm3 = vcmask 228560   ;;  %s209_s0 = inlined_call_operand.vmem [shape: f32[16,2], index: 0, kind: input, shape index: {}]   ;;  %s210_s1 = inlined_call_operand.vmem [shape: f32[1,32], index: 1, kind: output, shape index: {}]  }
   0x1   :  { %v103_v0 = vld [vmem:[%s209_s0 + $0xf] sm:$0x1]   ;;  %v105_v1 = vld [vmem:[%s209_s0 + $0xd] sm:$0x1]   ;;  %v104_v2 = vld [vmem:[%s209_s0 + $0xe] sm:$0x1]  }
   0x2   :  { %7 = vrot.lane.b32.xlu0 %v103_v0, %s133_s10  ;;  %19 = vrot.lane.b32.xlu1 %v105_v1, %s134_s11  ;;  %v106_v3 = vld [vmem:[%s209_s0 + $0xc] sm:$0x1]   ;;  %s135_s16 = smov 28   ;;  %s136_s17 = smov 24   ;;  %v107_v4 = vld [vmem:[%s209_s0 + $0xb] sm:$0x1]  }
   0x3   :  { %v108_v5 = vld [vmem:[%s209_s0 + $0xa] sm:$0x1]   ;;  %v2_v6 = vld [vmem:[%s209_s0] sm:$0x1]   ;;  %s137_s24 = smov 22   ;;  %s138_s25 = smov 20  }
   0x4   :  { %4 = vst.msk [vmem:[#allocation0] sm:$0x1] %vm3_vm0, %v2_v6   ;;  %v109_v7 = vld [vmem:[%s209_s0 + $0x9] sm:$0x1]   ;;  %v110_v8 = vld [vmem:[%s209_s0 + $0x8] sm:$0x1]  }
   0x5   :  { %s139_s30 = smov 18   ;;  %s140_s2 = smov 16   ;;  %v111_v9 = vld [vmem:[%s209_s0 + $0x7] sm:$0x1]   ;;  %v112_v10 = vld [vmem:[%s209_s0 + $0x6] sm:$0x1]  }
   0x6   :  { %13 = vrot.lane.b32.xlu0 %v104_v2, %s135_s16  ;;  %25 = vrot.lane.b32.xlu1 %v106_v3, %s136_s17  ;;  %s141_s7 = smov 14   ;;  %s142_s8 = smov 12   ;;  %v113_v11 = vld [vmem:[%s209_s0 + $0x5] sm:$0x1]   ;;  %v114_v12 = vld [vmem:[%s209_s0 + $0x4] sm:$0x1]  }
   0x7   :  { %s143_s13 = smov 10   ;;  %s144_s14 = smov 8   ;;  %v115_v13 = vld [vmem:[%s209_s0 + $0x3] sm:$0x1]   ;;  %v116_v14 = vld [vmem:[%s209_s0 + $0x2] sm:$0x1]  }
   0x8   :  { %s145_s19 = smov 6   ;;  %s146_s20 = smov 4   ;;  %v117_v15 = vld [vmem:[%s209_s0 + $0x1] sm:$0x1]   ;;  %vm27_vm4 = vcmask 212160   ;;  %vm33_vm5 = vcmask 195760  }
   0x9   :  { %s147_s0 = smov 2   ;;  %vm39_vm6 = vcmask 179360   ;;  %vm45_vm7 = vcmask 162960   ;;  %vm51_vm8 = vcmask 146560   ;;  %vm57_vm9 = vcmask 130160  }
   0xa   :  { %31 = vrot.lane.b32.xlu0 %v107_v4, %s137_s24  ;;  %37 = vrot.lane.b32.xlu1 %v108_v5, %s138_s25  ;;  %vm63_vm10 = vcmask 113760   ;;  %vm69_vm11 = vcmask 97360   ;;  %vm75_vm12 = vcmask 80960   ;;  %vm81_vm13 = vcmask 64560  }
   0xb   :  { %vm87_vm14 = vcmask 48160   ;;  %vm93_vm15 = vcmask 31760  }
   0xe   :  { %43 = vrot.lane.b32.xlu0 %v109_v7, %s139_s30  ;;  %49 = vrot.lane.b32.xlu1 %v110_v8, %s140_s2 }
  0x12   :  { %55 = vrot.lane.b32.xlu0 %v111_v9, %s141_s7  ;;  %61 = vrot.lane.b32.xlu1 %v112_v10, %s142_s8 }
  0x16   :  { %67 = vrot.lane.b32.xlu0 %v113_v11, %s143_s13  ;;  %73 = vrot.lane.b32.xlu1 %v114_v12, %s144_s14 }
  0x1a   :  { %79 = vrot.lane.b32.xlu0 %v115_v13, %s145_s19  ;;  %85 = vrot.lane.b32.xlu1 %v116_v14, %s146_s20 }
  0x1e   :  { %91 = vrot.lane.b32.xlu0 %v117_v15, %s147_s0 }
  0x74   :  { %v8_v16 = vpop.permute.xlu0 %7   ;;  %v20_v17 = vpop.permute.xlu1 %19  }
  0x75   :  { %10 = vst.msk [vmem:[#allocation0] sm:$0x1] %vm9_vm1, %v8_v16  }
  0x78   :  { %v14_v18 = vpop.permute.xlu0 %13   ;;  %v26_v19 = vpop.permute.xlu1 %25  }
  0x79   :  { %16 = vst.msk [vmem:[#allocation0] sm:$0x1] %vm15_vm2, %v14_v18  }
  0x7a   :  { %22 = vst.msk [vmem:[#allocation0] sm:$0x1] %vm21_vm3, %v20_v17  }
  0x7b   :  { %28 = vst.msk [vmem:[#allocation0] sm:$0x1] %vm27_vm4, %v26_v19  }
  0x7c   :  { %v32_v20 = vpop.permute.xlu0 %31   ;;  %v38_v21 = vpop.permute.xlu1 %37  }
  0x7d   :  { %34 = vst.msk [vmem:[#allocation0] sm:$0x1] %vm33_vm5, %v32_v20  }
  0x7e   :  { %40 = vst.msk [vmem:[#allocation0] sm:$0x1] %vm39_vm6, %v38_v21  }
  0x80   :  { %v44_v22 = vpop.permute.xlu0 %43   ;;  %v50_v23 = vpop.permute.xlu1 %49  }
  0x81   :  { %46 = vst.msk [vmem:[#allocation0] sm:$0x1] %vm45_vm7, %v44_v22  }
  0x82   :  { %52 = vst.msk [vmem:[#allocation0] sm:$0x1] %vm51_vm8, %v50_v23  }
  0x84   :  { %v56_v24 = vpop.permute.xlu0 %55   ;;  %v62_v25 = vpop.permute.xlu1 %61  }
  0x85   :  { %58 = vst.msk [vmem:[#allocation0] sm:$0x1] %vm57_vm9, %v56_v24  }
  0x86   :  { %64 = vst.msk [vmem:[#allocation0] sm:$0x1] %vm63_vm10, %v62_v25  }
  0x88   :  { %v68_v26 = vpop.permute.xlu0 %67   ;;  %v74_v27 = vpop.permute.xlu1 %73  }
  0x89   :  { %70 = vst.msk [vmem:[#allocation0] sm:$0x1] %vm69_vm11, %v68_v26  }
  0x8a   :  { %76 = vst.msk [vmem:[#allocation0] sm:$0x1] %vm75_vm12, %v74_v27  }
  0x8c   :  { %v80_v28 = vpop.permute.xlu0 %79   ;;  %v86_v29 = vpop.permute.xlu1 %85  }
  0x8d   :  { %82 = vst.msk [vmem:[#allocation0] sm:$0x1] %vm81_vm13, %v80_v28  }
  0x8e   :  { %88 = vst.msk [vmem:[#allocation0] sm:$0x1] %vm87_vm14, %v86_v29  }
  0x90   :  { %v92_v30 = vpop.permute.xlu0 %91  }
  0x91   :  { %94 = vst.msk [vmem:[#allocation0] sm:$0x1] %vm93_vm15, %v92_v30  }
  0x98   :  { %v99_v31 = vld [vmem:[#allocation0] sm:$0x1] }
  0x99   :  { %102 = vst [vmem:[%s210_s1] sm:$0x1] %v99_v31 }

// kernel: tile.23
= control target key start
LH: loop header
LB: loop body
LE: loop exit
PB: predicated region body
PF: predicated region fallthrough
CT: control target
= control target key end

     0   :  { %s22_s0 = inlined_call_operand.vmem [shape: f32[2], index: 0, kind: input, shape index: {}]   ;;  %s23_s1 = inlined_call_operand.vmem [shape: f32[8,2], index: 1, kind: output, shape index: {}]  }
   0x1   :  { %v4_v0 = vld [vmem:[%s22_s0] ss:$0 sm:$0xff] }
   0x2   :  { %5 = vst [vmem:[%s23_s1] sm:$0xff] %v4_v0 }

// kernel: tile.24
= control target key start
LH: loop header
LB: loop body
LE: loop exit
PB: predicated region body
PF: predicated region fallthrough
CT: control target
= control target key end

     0   :  { %s69_s10 = smov 14   ;;  %s70_s11 = smov 10   ;;  %vm3_vm0 = vcmask 15360   ;;  %vm9_vm1 = vcmask 130160   ;;  %vm15_vm2 = vcmask 113760   ;;  %vm21_vm3 = vcmask 97360   ;;  %s113_s0 = inlined_call_operand.vmem [shape: f32[8,2], index: 0, kind: input, shape index: {}]   ;;  %s114_s1 = inlined_call_operand.vmem [shape: f32[1,16], index: 1, kind: output, shape index: {}]  }
   0x1   :  { %v55_v0 = vld [vmem:[%s113_s0 + $0x7] sm:$0x1]   ;;  %v57_v1 = vld [vmem:[%s113_s0 + $0x5] sm:$0x1]   ;;  %v56_v2 = vld [vmem:[%s113_s0 + $0x6] sm:$0x1]  }
   0x2   :  { %7 = vrot.lane.b32.xlu0 %v55_v0, %s69_s10  ;;  %19 = vrot.lane.b32.xlu1 %v57_v1, %s70_s11  ;;  %v58_v3 = vld [vmem:[%s113_s0 + $0x4] sm:$0x1]   ;;  %v2_v4 = vld [vmem:[%s113_s0] sm:$0x1]   ;;  %s71_s18 = smov 12   ;;  %s72_s19 = smov 8  }
   0x3   :  { %4 = vst.msk [vmem:[#allocation0] sm:$0x1] %vm3_vm0, %v2_v4   ;;  %v59_v5 = vld [vmem:[%s113_s0 + $0x3] sm:$0x1]   ;;  %v60_v6 = vld [vmem:[%s113_s0 + $0x2] sm:$0x1]  }
   0x4   :  { %s73_s24 = smov 6   ;;  %s74_s25 = smov 4   ;;  %v61_v7 = vld [vmem:[%s113_s0 + $0x1] sm:$0x1]   ;;  %vm27_vm4 = vcmask 80960   ;;  %vm33_vm5 = vcmask 64560  }
   0x5   :  { %s75_s0 = smov 2   ;;  %vm39_vm6 = vcmask 48160   ;;  %vm45_vm7 = vcmask 31760  }
   0x6   :  { %13 = vrot.lane.b32.xlu0 %v56_v2, %s71_s18  ;;  %25 = vrot.lane.b32.xlu1 %v58_v3, %s72_s19 }
   0xa   :  { %31 = vrot.lane.b32.xlu0 %v59_v5, %s73_s24  ;;  %37 = vrot.lane.b32.xlu1 %v60_v6, %s74_s25 }
   0xe   :  { %43 = vrot.lane.b32.xlu0 %v61_v7, %s75_s0 }
  0x74   :  { %v8_v8 = vpop.permute.xlu0 %7   ;;  %v20_v9 = vpop.permute.xlu1 %19  }
  0x75   :  { %10 = vst.msk [vmem:[#allocation0] sm:$0x1] %vm9_vm1, %v8_v8  }
  0x78   :  { %v14_v10 = vpop.permute.xlu0 %13   ;;  %v26_v11 = vpop.permute.xlu1 %25  }
  0x79   :  { %16 = vst.msk [vmem:[#allocation0] sm:$0x1] %vm15_vm2, %v14_v10  }
  0x7a   :  { %22 = vst.msk [vmem:[#allocation0] sm:$0x1] %vm21_vm3, %v20_v9  }
  0x7b   :  { %28 = vst.msk [vmem:[#allocation0] sm:$0x1] %vm27_vm4, %v26_v11  }
  0x7c   :  { %v32_v12 = vpop.permute.xlu0 %31   ;;  %v38_v13 = vpop.permute.xlu1 %37  }
  0x7d   :  { %34 = vst.msk [vmem:[#allocation0] sm:$0x1] %vm33_vm5, %v32_v12  }
  0x7e   :  { %40 = vst.msk [vmem:[#allocation0] sm:$0x1] %vm39_vm6, %v38_v13  }
  0x80   :  { %v44_v14 = vpop.permute.xlu0 %43  }
  0x81   :  { %46 = vst.msk [vmem:[#allocation0] sm:$0x1] %vm45_vm7, %v44_v14  }
  0x88   :  { %v51_v15 = vld [vmem:[#allocation0] sm:$0x1] }
  0x89   :  { %54 = vst [vmem:[%s114_s1] sm:$0x1] %v51_v15 }

// kernel: tile.28
= control target key start
LH: loop header
LB: loop body
LE: loop exit
PB: predicated region body
PF: predicated region fallthrough
CT: control target
= control target key end

     0   :  { %s22_s0 = inlined_call_operand.vmem [shape: f32[4], index: 0, kind: input, shape index: {}]   ;;  %s23_s1 = inlined_call_operand.vmem [shape: f32[4,4], index: 1, kind: output, shape index: {}]  }
   0x1   :  { %v4_v0 = vld [vmem:[%s22_s0] ss:$0 sm:$0xff] }
   0x2   :  { %5 = vst [vmem:[%s23_s1] sm:$0xf] %v4_v0 }

// kernel: tile.29
= control target key start
LH: loop header
LB: loop body
LE: loop exit
PB: predicated region body
PF: predicated region fallthrough
CT: control target
= control target key end

     0   :  { %vm8_vm0 = vcmask 31744   ;;  %s40_s8 = smov 4   ;;  %s41_s9 = smov 8   ;;  %vm14_vm1 = vcmask 130144   ;;  %vm20_vm2 = vcmask 97344   ;;  %vm26_vm3 = vcmask 64544   ;;  %s58_s0 = inlined_call_operand.vmem [shape: f32[4,4], index: 0, kind: input, shape index: {}]   ;;  %s59_s1 = inlined_call_operand.vmem [shape: f32[1,16], index: 1, kind: output, shape index: {}]  }
   0x1   :  { %v5_v0 = vld [vmem:[%s58_s0] sm:$0xf]  ;;  %s39_s0 = smov 12  }
   0x2   :  { %6 = vst [vmem:[#allocation1] sm:$0xf] %v5_v0 }
   0x9   :  { %v11_v1 = vld [vmem:[#allocation1 + $0x3] sm:$0x1]   ;;  %v23_v2 = vld [vmem:[#allocation1 + $0x1] sm:$0x1]   ;;  %v7_v3 = vld [vmem:[#allocation1] sm:$0x1]  }
   0xa   :  { %12 = vrot.lane.b32.xlu0 %v11_v1, %s39_s0  ;;  %24 = vrot.lane.b32.xlu1 %v23_v2, %s40_s8  ;;  %v17_v4 = vld [vmem:[#allocation1 + $0x2] sm:$0x1]   ;;  %9 = vst.msk [vmem:[#allocation0] sm:$0x1] %vm8_vm0, %v7_v3  }
   0xe   :  { %18 = vrot.lane.b32.xlu0 %v17_v4, %s41_s9 }
  0x7c   :  { %v13_v5 = vpop.permute.xlu0 %12   ;;  %v25_v6 = vpop.permute.xlu1 %24  }
  0x7d   :  { %15 = vst.msk [vmem:[#allocation0] sm:$0x1] %vm14_vm1, %v13_v5  }
  0x80   :  { %v19_v7 = vpop.permute.xlu0 %18  }
  0x81   :  { %21 = vst.msk [vmem:[#allocation0] sm:$0x1] %vm20_vm2, %v19_v7  }
  0x82   :  { %27 = vst.msk [vmem:[#allocation0] sm:$0x1] %vm26_vm3, %v25_v6  }
  0x89   :  { %v32_v8 = vld [vmem:[#allocation0] sm:$0x1] }
  0x8a   :  { %35 = vst [vmem:[%s59_s1] sm:$0x1] %v32_v8 }

// kernel: ar_transcriber_forward.1
= control target key start
LH: loop header
LB: loop body
LE: loop exit
PB: predicated region body
PF: predicated region fallthrough
CT: control target
= control target key end

     0   :  { %v4018_v0 = vmov 0.0   ;;  %vm4019_vm0 = vmmov 0   ;;  %vm119_vm1 = vcmask 130048   ;;  %vm109_vm2 = vcmask 1046528   ;;  %s4026_s30 = smov 112   ;;  %s5062_s1 = inlined_call_operand.vmem [shape: bf16[3,16,32], index: 1, kind: input, shape index: {}]   ;;  %s5063_s0 = inlined_call_operand.vmem [shape: f32[20,16], index: 0, kind: input, shape index: {}]   ;;  %s5064_s3 = inlined_call_operand.vmem [shape: bf16[3,32,16], index: 3, kind: input, shape index: {}]   ;;  %s5065_s4 = inlined_call_operand.vmem [shape: bf16[3,32,16], index: 4, kind: input, shape index: {}]   ;;  %s5066_s2 = inlined_call_operand.vmem [shape: f32[1,32], index: 2, kind: input, shape index: {}]   ;;  %s5067_s6 = inlined_call_operand.vmem [shape: bf16[3,16,16], index: 6, kind: input, shape index: {}]   ;;  %s5068_s7 = inlined_call_operand.vmem [shape: bf16[3,16,16], index: 7, kind: input, shape index: {}]   ;;  %s5069_s5 = inlined_call_operand.vmem [shape: f32[1,16], index: 5, kind: input, shape index: {}]   ;;  %s5070_s11 = inlined_call_operand.vmem [shape: bf16[96,128], index: 11, kind: input, shape index: {}]   ;;  %s5071_s9 = inlined_call_operand.vmem [shape: bf16[16,128], index: 9, kind: input, shape index: {}]   ;;  %s5072_s8 = inlined_call_operand.vmem [shape: f32[1,16], index: 8, kind: input, shape index: {}]   ;;  %s5073_s10 = inlined_call_operand.vmem [shape: f32[1,128], index: 10, kind: input, shape index: {}]   ;;  %s5074_s12 = inlined_call_operand.vmem [shape: bf16[64,128], index: 12, kind: input, shape index: {}]   ;;  %s5075_s13 = inlined_call_operand.vmem [shape: f32[1,128], index: 13, kind: input, shape index: {}]   ;;  %s5076_s14 = inlined_call_operand.vmem [shape: bf16[32,128], index: 14, kind: input, shape index: {}]   ;;  %s5077_s15 = inlined_call_operand.vmem [shape: f32[1,128], index: 15, kind: input, shape index: {}]   ;;  %s5078_s16 = inlined_call_operand.vmem [shape: f32[8,2,128], index: 16, kind: output, shape index: {}]  }
   0x1   :  { %5080 = sst [smem:[#allocation2_spill]] %s5062_s1  ;;  %3437 = vmatprep.subr.bf16.mxu0 %v4018_v0  ;;  %3443 = vmatprep.subr.bf16.mxu1 %v4018_v0  ;;  %v54_v3 = vld [vmem:[%s5063_s0] sm:$0xff]  ;;  %v55_v4 = vld [vmem:[%s5063_s0 + $0x8] sm:$0xff]  ;;  %v56_v5 = vld [vmem:[%s5063_s0 + $0x10] sm:$0xf]  ;;  %vm214_vm3 = vcmask 1045504  }
   0x2   :  { %s5081_s23 = sld [smem:[#allocation2_spill]]  ;;  %3439 = vmatprep.mubr.msk.bf16.mxu0 %vm4019_vm0, %v4018_v0  ;;  %3445 = vmatprep.mubr.msk.bf16.mxu1 %vm4019_vm0, %v4018_v0  ;;  %v105_v6 = vpack.c.bf16 %v55_v4, %v54_v3  ;;  %v106_v7 = vpack.c.bf16 %v56_v5, %v56_v5  ;;  %v3845_v15 = vld [vmem:[%s5064_s3 + $0x8] sm:$0xff]   ;;  %v3846_v16 = vld [vmem:[%s5064_s3 + $0x18] sm:$0xff]   ;;  %v3847_v17 = vld [vmem:[%s5064_s3] sm:$0xff]   ;;  %vm282_vm4 = vcmask 1043456   ;;  %vm309_vm5 = vcmask 261120  }
   0x3   :  { %v3848_v18 = vld [vmem:[%s5064_s3 + $0x10] sm:$0xff]   ;;  %v3154_v28 = vld [vmem:[%s5066_s2] ss:$0 sm:$0xff]  ;;  %v3849_v45 = vld [vmem:[%s5065_s4 + $0x18] sm:$0xff]   ;;  %vm1054_vm6 = vcmask 523264   ;;  %vm1093_vm7 = vcmask 785408  }
   0x4   :  { %v110_v8 = vrot.slane %v105_v6, 1  ;;  %v111_v9 = vrot.slane %v106_v7, 1  ;;  %v215_v12 = vrot.slane %v105_v6, 2  ;;  %v216_v13 = vrot.slane %v106_v7, 2  ;;  %v3850_v49 = vld [vmem:[%s5064_s3 + $0x28] sm:$0xff]   ;;  %v3851_v50 = vld [vmem:[%s5065_s4 + $0x10] sm:$0xff]  }
   0x5   :  { %v3852_v52 = vld [vmem:[%s5064_s3 + $0x20] sm:$0xff]   ;;  %v3853_v53 = vld [vmem:[%s5065_s4 + $0x28] sm:$0xff]   ;;  %s4020_s1 = smov 64   ;;  %s4022_s2 = smov 16   ;;  %vm1381_vm15 = vcmask 392192  }
   0x6   :  { %v112_v11 = vsel %vm109_vm2, %v110_v8, %v111_v9  ;;  %v217_v14 = vsel %vm214_vm3, %v215_v12, %v216_v13  ;;  %v3854_v56 = vld [vmem:[%s5065_s4 + $0x8] sm:$0xff]   ;;  %v3855_v57 = vld [vmem:[%s5065_s4 + $0x20] sm:$0xff]  }
   0x7   :  { %v3856_v59 = vld [vmem:[%s5065_s4] sm:$0xff]   ;;  %v3857_v61 = vld [vmem:[%s5067_s6 + $0x8] sm:$0xff]  }
   0x8   :  { %v3842_v1 = vld [vmem:[%s5081_s23 + $0x8] sm:$0xff]   ;;  %v3843_v2 = vld [vmem:[%s5081_s23] sm:$0xff]   ;;  %v3844_v10 = vld [vmem:[%s5081_s23 + $0x10] sm:$0xff]  }
   0x9   :  { %3438 = vmatpush3.bf16.msra.mxu0 %v3842_v1  ;;  %3444 = vmatpush3.bf16.msra.mxu1 %v3843_v2  ;;  %v3858_v60 = vld [vmem:[%s5067_s6] sm:$0xff]  }
   0xa   :  { %3449 = vmatprep.subr.bf16.mxu0 %v4018_v0  ;;  %3455 = vmatprep.subr.bf16.mxu1 %v4018_v0 }
   0xc   :  { %3446 = vmatmul.mubr.msk.bf16.vlgmr.msra.gmra.mxu1 %vm119_vm1, %v105_v6  ;;  %3440 = vmatmul.mubr.msk.bf16.vlgmr.msra.gmra.mxu0 %vm119_vm1, %v112_v11 }
   0xd   :  { %3459 = vmatprep.mubr.msk.bf16.mxu1 %vm4019_vm0, %v4018_v0  ;;  %3450 = vmatpush3.bf16.msra.mxu0 %v3844_v10 }
   0xe   :  { %3451 = vmatprep.mubr.msk.bf16.mxu0 %vm4019_vm0, %v4018_v0  ;;  %3463 = vmatprep.subr.bf16.mxu0 %v4018_v0 }
   0xf   :  { %3456 = vmatpush3.bf16.msra.mxu1 %v3846_v16 }
  0x10   :  { %3457 = vmatprep.subr.bf16.mxu1 %v4018_v0 }
  0x13   :  { %3458 = vmatpush3.bf16.msra.mxu1 %v3848_v18 }
  0x14   :  { %3452 = vmatmul.mubr.msk.bf16.vlgmr.msra.gmra.mxu0 %vm119_vm1, %v217_v14  ;;  %3471 = vmatprep.subr.bf16.mxu1 %v4018_v0 }
  0x15   :  { %3467 = vmatprep.mubr.msk.bf16.mxu0 %vm4019_vm0, %v4018_v0  ;;  %3464 = vmatpush3.bf16.msra.mxu0 %v3845_v15 }
  0x16   :  { %3465 = vmatprep.subr.bf16.mxu0 %v4018_v0 }
  0x19   :  { %3466 = vmatpush3.bf16.msra.mxu0 %v3847_v17 }
  0x1a   :  { %3479 = vmatprep.subr.bf16.mxu0 %v4018_v0 }
  0xcc   :  { %v207_v19 = vpop.f32.mrf.mxu1  ;;  %v157_v20 = vpop.f32.mrf.mxu0 }
  0xcd   :  { %v208_v27 = vadd.f32 %v207_v19, %v157_v20 }
  0xce   :  { %v3447_v21 = vpop.f32.mrf.mxu1  ;;  %v3441_v22 = vpop.f32.mrf.mxu0 }
  0xd0   :  { %v210_v23 = vpop.f32.mrf.mxu1  ;;  %v160_v24 = vpop.f32.mrf.mxu0 }
  0xd1   :  { %v211_v32 = vadd.f32 %v210_v23, %v160_v24 }
  0xd2   :  { %v3448_v25 = vpop.f32.mrf.mxu1  ;;  %v3442_v26 = vpop.f32.mrf.mxu0 }
  0xd3   :  { %v3173_v25 = vld [vmem:[%s5069_s5] ss:$0 sm:$0xff]  ;;  %s4025_s5 = smov 80  }
  0xd4   :  { %v261_v29 = vpop.f32.mrf.mxu0 }
  0xd5   :  { %v268_v30 = vadd.f32 %v261_v29, %v208_v27 }
  0xd6   :  { %v3453_v31 = vpop.f32.mrf.mxu0 }
  0xd7   :  { %v276_v33 = vadd.f32 %v3154_v28, %v268_v30 }
  0xd8   :  { %v264_v34 = vpop.f32.mrf.mxu0 }
  0xd9   :  { %v278_v35 = vmax.f32 %v276_v33, 0.0  ;;  %v269_v36 = vadd.f32 %v264_v34, %v211_v32 }
  0xda   :  { %v3454_v37 = vpop.f32.mrf.mxu0 }
  0xdb   :  { %v277_v38 = vadd.f32 %v3154_v28, %v269_v36  ;;  %v283_v39 = vrot.slane %v278_v35, 4 }
  0xdd   :  { %v279_v40 = vmax.f32 %v277_v38, 0.0  ;;  %v289_v42 = vsel %vm282_vm4, 0.0, %v283_v39 }
  0xdf   :  { %v284_v41 = vrot.slane %v279_v40, 4 }
  0xe1   :  { %v285_v43 = vsel %vm282_vm4, %v283_v39, %v284_v41  ;;  %v291_v44 = vpack.c.bf16 %v284_v41, %v284_v41 }
  0xe2   :  { %v290_v46 = vpack.c.bf16 %v285_v43, %v289_v42  ;;  %v3860_v43 = vld [vmem:[%s5068_s7 + $0x8] sm:$0xff]  }
  0xe3   :  { %v295_v47 = vrot.slane %v291_v44, 1  ;;  %v411_v54 = vrot.slane %v291_v44, 2 }
  0xe4   :  { %3468 = vmatmul.mubr.msk.bf16.vlgmr.msra.gmra.mxu0 %vm309_vm5, %v290_v46  ;;  %v294_v48 = vrot.slane %v290_v46, 1  ;;  %v410_v55 = vrot.slane %v290_v46, 2 }
  0xe5   :  { %3480 = vmatpush3.bf16.msra.mxu0 %v3849_v45  ;;  %3483 = vmatprep.mubr.msk.bf16.mxu0 %vm4019_vm0, %v4018_v0 }
  0xe6   :  { %v296_v51 = vsel %vm109_vm2, %v294_v48, %v295_v47  ;;  %3481 = vmatprep.subr.bf16.mxu0 %v4018_v0  ;;  %v412_v58 = vsel %vm214_vm3, %v410_v55, %v411_v54  ;;  %v3859_v47 = vld [vmem:[%s5067_s6 + $0x10] sm:$0xff]   ;;  %v4275_v54 = vld [vmem:[%s5070_s11 + $0x28] sm:$0xff]   ;;  %v4282_v55 = vld [vmem:[%s5070_s11 + $0x20] sm:$0xff]  }
  0xe7   :  { %3460 = vmatmul.mubr.msk.bf16.vlgmr.msra.gmra.mxu1 %vm309_vm5, %v296_v51 }
  0xe8   :  { %3472 = vmatpush3.bf16.msra.mxu1 %v3850_v49  ;;  %3475 = vmatprep.mubr.msk.bf16.mxu1 %vm4019_vm0, %v4018_v0  ;;  %v3862_v49 = vld [vmem:[%s5068_s7 + $0x10] sm:$0xff]  }
  0xe9   :  { %3482 = vmatpush3.bf16.msra.mxu0 %v3851_v50  ;;  %3473 = vmatprep.subr.bf16.mxu1 %v4018_v0 }
  0xea   :  { %3495 = vmatprep.subr.bf16.mxu0 %v4018_v0 }
  0xec   :  { %3474 = vmatpush3.bf16.msra.mxu1 %v3852_v52  ;;  %3484 = vmatmul.mubr.msk.bf16.vlgmr.msra.gmra.mxu0 %vm309_vm5, %v296_v51  ;;  %v3861_v52 = vld [vmem:[%s5068_s7] sm:$0xff]  }
  0xed   :  { %3496 = vmatpush3.bf16.msra.mxu0 %v3853_v53  ;;  %3487 = vmatprep.subr.bf16.mxu1 %v4018_v0 }
  0xee   :  { %3497 = vmatprep.subr.bf16.mxu0 %v4018_v0  ;;  %3499 = vmatprep.mubr.msk.bf16.mxu0 %vm4019_vm0, %v4018_v0 }
  0xef   :  { %3476 = vmatmul.mubr.msk.bf16.vlgmr.msra.gmra.mxu1 %vm309_vm5, %v412_v58 }
  0xf0   :  { %3488 = vmatpush3.bf16.msra.mxu1 %v3854_v56  ;;  %3491 = vmatprep.mubr.msk.bf16.mxu1 %vm4019_vm0, %v4018_v0  ;;  %v4289_v56 = vld [vmem:[%s5070_s11 + $0x18] sm:$0xff]  }
  0xf1   :  { %3498 = vmatpush3.bf16.msra.mxu0 %v3855_v57  ;;  %3489 = vmatprep.subr.bf16.mxu1 %v4018_v0  ;;  %v4296_v57 = vld [vmem:[%s5070_s11 + $0x10] sm:$0xff]  }
  0xf2   :  { %3509 = vmatprep.subr.bf16.mxu0 %v4018_v0 }
  0xf4   :  { %3490 = vmatpush3.bf16.msra.mxu1 %v3856_v59  ;;  %3500 = vmatmul.mubr.msk.bf16.vlgmr.msra.gmra.mxu0 %vm309_vm5, %v412_v58  ;;  %v4303_v58 = vld [vmem:[%s5070_s11 + $0x8] sm:$0xff]   ;;  %v4310_v59 = vld [vmem:[%s5070_s11] sm:$0xff]  }
  0xf5   :  { %3503 = vmatprep.subr.bf16.mxu1 %v4018_v0  ;;  %3511 = vmatprep.mubr.msk.bf16.mxu0 %vm4019_vm0, %v4018_v0 }
  0xf6   :  { %3510 = vmatpush3.bf16.msra.mxu0 %v3858_v60  ;;  %v1053_v60 = vsel %vm119_vm1, 1.0, %v4018_v0 }
  0xf7   :  { %3492 = vmatmul.mubr.msk.bf16.vlgmr.msra.gmra.mxu1 %vm309_vm5, %v290_v46  ;;  %3521 = vmatprep.subr.bf16.mxu0 %v4018_v0 }
  0xf8   :  { %3505 = vmatprep.mubr.msk.bf16.mxu1 %vm4019_vm0, %v4018_v0  ;;  %3504 = vmatpush3.bf16.msra.mxu1 %v3857_v61  ;;  %v1055_v61 = vsel %vm1054_vm6, %v1053_v60, 0.0 }
  0xf9   :  { %3515 = vmatprep.subr.bf16.mxu1 %v4018_v0 }
 0x1a4   :  { %v403_v62 = vpop.f32.mrf.mxu0 }
 0x1a6   :  { %v3469_v63 = vpop.f32.mrf.mxu0 }
 0x1a7   :  { %v347_v1 = vpop.f32.mrf.mxu1  ;;  %v3868_v63 = vld [vmem:[%s5071_s9] sm:$0xff]   ;;  %s4024_s9 = smov 96  }
 0x1a8   :  { %v406_v2 = vpop.f32.mrf.mxu0  ;;  %v404_v18 = vadd.f32 %v403_v62, %v347_v1  ;;  %v1056_v62 = vpack.c.bf16 %v1055_v61, %v1055_v61 }
 0x1a9   :  { %v3461_v3 = vpop.f32.mrf.mxu1 }
 0x1aa   :  { %v3470_v4 = vpop.f32.mrf.mxu0 }
 0x1ab   :  { %v350_v5 = vpop.f32.mrf.mxu1 }
 0x1ac   :  { %v517_v6 = vpop.f32.mrf.mxu0  ;;  %v407_v27 = vadd.f32 %v406_v2, %v350_v5 }
 0x1ad   :  { %v3462_v7 = vpop.f32.mrf.mxu1 }
 0x1ae   :  { %v3485_v8 = vpop.f32.mrf.mxu0 }
 0x1af   :  { %v462_v9 = vpop.f32.mrf.mxu1 }
 0x1b0   :  { %v520_v10 = vpop.f32.mrf.mxu0  ;;  %v469_v22 = vadd.f32 %v462_v9, %v404_v18 }
 0x1b1   :  { %v3477_v11 = vpop.f32.mrf.mxu1 }
 0x1b2   :  { %v3486_v12 = vpop.f32.mrf.mxu0 }
 0x1b3   :  { %v465_v13 = vpop.f32.mrf.mxu1 }
 0x1b4   :  { %v623_v14 = vpop.f32.mrf.mxu0  ;;  %v470_v31 = vadd.f32 %v465_v13, %v407_v27 }
 0x1b5   :  { %v3478_v15 = vpop.f32.mrf.mxu1 }
 0x1b6   :  { %v3501_v16 = vpop.f32.mrf.mxu0 }
 0x1b7   :  { %v570_v17 = vpop.f32.mrf.mxu1 }
 0x1b8   :  { %v571_v19 = vadd.f32 %v570_v17, %v517_v6  ;;  %v626_v20 = vpop.f32.mrf.mxu0 }
 0x1b9   :  { %v3493_v21 = vpop.f32.mrf.mxu1 }
 0x1ba   :  { %v630_v23 = vadd.f32 %v623_v14, %v571_v19  ;;  %v3502_v24 = vpop.f32.mrf.mxu0 }
 0x1bb   :  { %v573_v26 = vpop.f32.mrf.mxu1 }
 0x1bc   :  { %v632_v28 = vmax.f32 %v469_v22, %v630_v23  ;;  %v574_v29 = vadd.f32 %v573_v26, %v520_v10 }
 0x1bd   :  { %v3494_v30 = vpop.f32.mrf.mxu1 }
 0x1be   :  { %v640_v32 = vadd.f32 %v3173_v25, %v632_v28  ;;  %v631_v33 = vadd.f32 %v626_v20, %v574_v29 }
 0x1c0   :  { %v642_v34 = vmax.f32 %v640_v32, 0.0  ;;  %v633_v35 = vmax.f32 %v470_v31, %v631_v33  ;;  %v3186_v31 = vld [vmem:[%s5072_s8] ss:$0 sm:$0xff] }
 0x1c2   :  { %v641_v36 = vadd.f32 %v3173_v25, %v633_v35  ;;  %v646_v37 = vrot.slane %v642_v34, 4 }
 0x1c4   :  { %v643_v38 = vmax.f32 %v641_v36, 0.0  ;;  %v652_v40 = vsel %vm282_vm4, 0.0, %v646_v37 }
 0x1c6   :  { %v647_v39 = vrot.slane %v643_v38, 4 }
 0x1c8   :  { %v648_v41 = vsel %vm282_vm4, %v646_v37, %v647_v39  ;;  %v654_v42 = vpack.c.bf16 %v647_v39, %v647_v39 }
 0x1c9   :  { %v653_v44 = vpack.c.bf16 %v648_v41, %v652_v40 }
 0x1ca   :  { %v658_v45 = vrot.slane %v654_v42, 1  ;;  %v761_v51 = vrot.slane %v654_v42, 2 }
 0x1cb   :  { %3512 = vmatmul.mubr.msk.bf16.vlgmr.msra.gmra.mxu0 %vm119_vm1, %v653_v44  ;;  %v657_v46 = vrot.slane %v653_v44, 1  ;;  %v760_v50 = vrot.slane %v653_v44, 2 }
 0x1cc   :  { %3522 = vmatpush3.bf16.msra.mxu0 %v3860_v43  ;;  %3523 = vmatprep.mubr.msk.bf16.mxu0 %vm4019_vm0, %v4018_v0 }
 0x1cd   :  { %v659_v48 = vsel %vm109_vm2, %v657_v46, %v658_v45  ;;  %3533 = vmatprep.subr.bf16.mxu0 %v4018_v0  ;;  %v762_v53 = vsel %vm214_vm3, %v760_v50, %v761_v51  ;;  %v3187_v45 = vld [vmem:[%s5073_s10] ss:$0 sm:$0xff]  ;;  %s4021_s10 = smov 32  }
 0x1ce   :  { %3506 = vmatmul.mubr.msk.bf16.vlgmr.msra.gmra.mxu1 %vm119_vm1, %v659_v48 }
 0x1cf   :  { %3516 = vmatpush3.bf16.msra.mxu1 %v3859_v47  ;;  %3517 = vmatprep.mubr.msk.bf16.mxu1 %vm4019_vm0, %v4018_v0 }
 0x1d0   :  { %3527 = vmatprep.subr.bf16.mxu1 %v4018_v0 }
 0x1d3   :  { %3524 = vmatmul.mubr.msk.bf16.vlgmr.msra.gmra.mxu0 %vm119_vm1, %v659_v48 }
 0x1d4   :  { %3534 = vmatpush3.bf16.msra.mxu0 %v3862_v49  ;;  %3535 = vmatprep.mubr.msk.bf16.mxu0 %vm4019_vm0, %v4018_v0 }
 0x1d5   :  { %3545 = vmatprep.subr.bf16.mxu0 %v4018_v0 }
 0x1d6   :  { %3518 = vmatmul.mubr.msk.bf16.vlgmr.msra.gmra.mxu1 %vm119_vm1, %v762_v53 }
 0x1d7   :  { %3528 = vmatpush3.bf16.msra.mxu1 %v3861_v52  ;;  %3529 = vmatprep.mubr.msk.bf16.mxu1 %vm4019_vm0, %v4018_v0 }
 0x1d8   :  { %3539 = vmatprep.subr.bf16.mxu1 %v4018_v0 }
 0x1db   :  { %3536 = vmatmul.mubr.msk.bf16.vlgmr.msra.gmra.mxu0 %vm119_vm1, %v762_v53 }
 0x1dc   :  { %3557 = vmatprep.mubr.msk.bf16.mxu0 %vm4019_vm0, %v4018_v0  ;;  %3546 = vmatpush3.bf16.msra.mxu0 %v4275_v54 }
 0x1dd   :  { %3547 = vmatprep.subr.bf16.mxu0 %v4018_v0 }
 0x1de   :  { %3530 = vmatmul.mubr.msk.bf16.vlgmr.msra.gmra.mxu1 %vm119_vm1, %v653_v44 }
 0x1df   :  { %3541 = vmatprep.mubr.msk.bf16.mxu1 %vm4019_vm0, %v4018_v0  ;;  %3540 = vmatpush3.bf16.msra.mxu1 %v3868_v63 }
 0x1e0   :  { %3548 = vmatpush3.bf16.msra.mxu0 %v4282_v55  ;;  %3561 = vmatprep.subr.bf16.mxu1 %v4018_v0 }
 0x1e1   :  { %3549 = vmatprep.subr.bf16.mxu0 %v4018_v0 }
 0x1e4   :  { %3550 = vmatpush3.bf16.msra.mxu0 %v4289_v56 }
 0x1e5   :  { %3551 = vmatprep.subr.bf16.mxu0 %v4018_v0 }
 0x1e8   :  { %3552 = vmatpush3.bf16.msra.mxu0 %v4296_v57 }
 0x1e9   :  { %3553 = vmatprep.subr.bf16.mxu0 %v4018_v0 }
 0x1ec   :  { %3554 = vmatpush3.bf16.msra.mxu0 %v4303_v58 }
 0x1ed   :  { %3555 = vmatprep.subr.bf16.mxu0 %v4018_v0 }
 0x1f0   :  { %3556 = vmatpush3.bf16.msra.mxu0 %v4310_v59 }
 0x1f1   :  { %3581 = vmatprep.subr.bf16.mxu0 %v4018_v0 }
 0x1f3   :  { %3558 = vmatmul.mubr.msk.bf16.vlgmr.msra.gmra.mxu0 %vm1093_vm7, %v1056_v62 }
 0x1f4   :  { %3582 = vmatpush3.bf16.msra.mxu0 %v4275_v54  ;;  %3593 = vmatprep.mubr.msk.bf16.mxu0 %vm4019_vm0, %v4018_v0 }
 0x1f5   :  { %3583 = vmatprep.subr.bf16.mxu0 %v4018_v0 }
 0x1f8   :  { %3584 = vmatpush3.bf16.msra.mxu0 %v4282_v55 }
 0x1f9   :  { %3585 = vmatprep.subr.bf16.mxu0 %v4018_v0 }
 0x1fc   :  { %3586 = vmatpush3.bf16.msra.mxu0 %v4289_v56 }
 0x1fd   :  { %3587 = vmatprep.subr.bf16.mxu0 %v4018_v0 }
 0x200   :  { %3588 = vmatpush3.bf16.msra.mxu0 %v4296_v57 }
 0x201   :  { %3589 = vmatprep.subr.bf16.mxu0 %v4018_v0 }
 0x204   :  { %3590 = vmatpush3.bf16.msra.mxu0 %v4303_v58 }
 0x205   :  { %3591 = vmatprep.subr.bf16.mxu0 %v4018_v0 }
 0x208   :  { %3592 = vmatpush3.bf16.msra.mxu0 %v4310_v59 }
 0x209   :  { %3617 = vmatprep.subr.bf16.mxu0 %v4018_v0 }
 0x28b   :  { %v753_v1 = vpop.f32.mrf.mxu0 }
 0x28d   :  { %v3513_v2 = vpop.f32.mrf.mxu0 }
 0x28e   :  { %v703_v3 = vpop.f32.mrf.mxu1 }
 0x28f   :  { %v756_v4 = vpop.f32.mrf.mxu0  ;;  %v754_v20 = vadd.f32 %v753_v1, %v703_v3 }
 0x290   :  { %v3507_v5 = vpop.f32.mrf.mxu1 }
 0x291   :  { %v3514_v6 = vpop.f32.mrf.mxu0 }
 0x292   :  { %v706_v7 = vpop.f32.mrf.mxu1  ;;  %v4358_v6 = vld [vmem:[%s5074_s12 + $0x18] sm:$0xff]  }
 0x293   :  { %v855_v8 = vpop.f32.mrf.mxu0  ;;  %v757_v28 = vadd.f32 %v756_v4, %v706_v7  ;;  %v4364_v7 = vld [vmem:[%s5074_s12 + $0x10] sm:$0xff]  }
 0x294   :  { %v3508_v9 = vpop.f32.mrf.mxu1 }
 0x295   :  { %v3525_v10 = vpop.f32.mrf.mxu0 }
 0x296   :  { %v806_v11 = vpop.f32.mrf.mxu1  ;;  %v4380_v10 = vld [vmem:[%s5074_s12] sm:$0xff]  }
 0x297   :  { %v858_v12 = vpop.f32.mrf.mxu0  ;;  %v813_v24 = vadd.f32 %v806_v11, %v754_v20 }
 0x298   :  { %v3519_v13 = vpop.f32.mrf.mxu1 }
 0x299   :  { %v3526_v14 = vpop.f32.mrf.mxu0 }
 0x29a   :  { %v809_v15 = vpop.f32.mrf.mxu1 }
 0x29b   :  { %v949_v16 = vpop.f32.mrf.mxu0  ;;  %v814_v33 = vadd.f32 %v809_v15, %v757_v28 }
 0x29c   :  { %v3520_v17 = vpop.f32.mrf.mxu1 }
 0x29d   :  { %v3537_v18 = vpop.f32.mrf.mxu0 }
 0x29e   :  { %v902_v19 = vpop.f32.mrf.mxu1 }
 0x29f   :  { %v903_v21 = vadd.f32 %v902_v19, %v855_v8  ;;  %v952_v22 = vpop.f32.mrf.mxu0  ;;  %v4371_v8 = vld [vmem:[%s5074_s12 + $0x8] sm:$0xff]  }
 0x2a0   :  { %v3531_v23 = vpop.f32.mrf.mxu1 }
 0x2a1   :  { %v956_v25 = vadd.f32 %v949_v16, %v903_v21  ;;  %v3538_v26 = vpop.f32.mrf.mxu0  ;;  %v4395_v16 = vld [vmem:[%s5075_s13] ss:$0 sm:$0xff] }
 0x2a2   :  { %v905_v27 = vpop.f32.mrf.mxu1 }
 0x2a3   :  { %v958_v29 = vmax.f32 %v813_v24, %v956_v25  ;;  %v906_v30 = vadd.f32 %v905_v27, %v858_v12 }
 0x2a4   :  { %v3532_v32 = vpop.f32.mrf.mxu1 }
 0x2a5   :  { %v957_v34 = vadd.f32 %v952_v22, %v906_v30  ;;  %v966_v35 = vadd.f32 %v3186_v31, %v958_v29  ;;  %v4406_v32 = vld [vmem:[%s5076_s14 + $0x8] sm:$0xff]  }
 0x2a7   :  { %v959_v36 = vmax.f32 %v814_v33, %v957_v34  ;;  %v968_v38 = vmax.f32 %v966_v35, 0.0  ;;  %v4412_v33 = vld [vmem:[%s5076_s14] sm:$0xff]  }
 0x2a9   :  { %v967_v37 = vadd.f32 %v3186_v31, %v959_v36 }
 0x2ab   :  { %v969_v39 = vmax.f32 %v967_v37, 0.0 }
 0x2ad   :  { %v970_v40 = vpack.c.bf16 %v969_v39, %v968_v38  ;;  %v4437_v39 = vld [vmem:[%s5077_s15] ss:$0 sm:$0xff] }
 0x2af   :  { %3542 = vmatmul.mubr.msk.bf16.vlgmr.msra.gmra.mxu1 %vm119_vm1, %v970_v40 }
 0x2b0   :  { %3569 = vmatprep.mubr.msk.bf16.mxu1 %vm4019_vm0, %v4018_v0  ;;  %3562 = vmatpush3.bf16.msra.mxu1 %v4358_v6 }
 0x2b1   :  { %3563 = vmatprep.subr.bf16.mxu1 %v4018_v0 }
 0x2b3   :  { %v1131_v41 = vpop.f32.mrf.mxu0 }
 0x2b4   :  { %3564 = vmatpush3.bf16.msra.mxu1 %v4364_v7 }
 0x2b5   :  { %v3559_v42 = vpop.f32.mrf.mxu0  ;;  %3565 = vmatprep.subr.bf16.mxu1 %v4018_v0 }
 0x2b7   :  { %v1134_v43 = vpop.f32.mrf.mxu0 }
 0x2b8   :  { %3566 = vmatpush3.bf16.msra.mxu1 %v4371_v8 }
 0x2b9   :  { %v3560_v44 = vpop.f32.mrf.mxu0  ;;  %3567 = vmatprep.subr.bf16.mxu1 %v4018_v0 }
 0x2bc   :  { %3568 = vmatpush3.bf16.msra.mxu1 %v4380_v10 }
 0x2bd   :  { %3573 = vmatprep.subr.bf16.mxu1 %v4018_v0 }
 0x36f   :  { %v1020_v46 = vpop.f32.mrf.mxu1 }
 0x370   :  { %v4345_v47 = vadd.f32 %v3187_v45, %v1020_v46 }
 0x371   :  { %v3543_v48 = vpop.f32.mrf.mxu1 }
 0x372   :  { %v1137_v49 = vadd.f32 %v1131_v41, %v4345_v47  ;;  %v4023_v48 = vmov 0  }
 0x373   :  { %v1023_v50 = vpop.f32.mrf.mxu1 }
 0x374   :  { %3876 = vtanh.f32 %v1137_v49  ;;  %v4348_v51 = vadd.f32 %v3187_v45, %v1023_v50  ;;  %v3197_v60 = vmul.f32 -1.442695, %v1137_v49 }
 0x375   :  { %v3544_v52 = vpop.f32.mrf.mxu1 }
 0x376   :  { %3878 = vpow2.f32 %v3197_v60 }
 0x381   :  { %v3877_v53 = vpop.eup %3876 }
 0x382   :  { %1147 = vrot.lane.b32.xlu0 %v3877_v53, %s4020_s1 }
 0x383   :  { %v3879_v61 = vpop.eup %3878 }
 0x384   :  { %v1141_v62 = vadd.f32 1.0, %v3879_v61 }
 0x386   :  { %3880 = vrcp.f32 %v1141_v62 }
 0x393   :  { %v3881_v63 = vpop.eup %3880 }
 0x394   :  { %v1145_v3 = vmul.f32 0.0, %v3881_v63 }
 0x3f4   :  { %v1148_v1 = vpop.permute.xlu0 %1147 }
 0x3f5   :  { %v1150_v2 = vmul.f32 %v3881_v63, %v1148_v1 }
 0x3f7   :  { %1152 = vrot.lane.b32.xlu0 %v1150_v2, %s4021_s10 }
 0x469   :  { %v1153_v4 = vpop.permute.xlu0 %1152 }
 0x46a   :  { %v4352_v5 = vadd.f32 %v1153_v4, %v1145_v3 }
 0x46c   :  { %3882 = vtanh.f32 %v4352_v5 }
 0x479   :  { %v3883_v9 = vpop.eup %3882 }
 0x47a   :  { %1158 = vrot.lane.b32.xlu1 %v3883_v9, %s4020_s1 }
 0x4ec   :  { %v1159_v11 = vpop.permute.xlu1 %1158 }
 0x4ed   :  { %v4384_v12 = vmul.f32 %v3881_v63, %v1159_v11 }
 0x4ef   :  { %1163 = vrot.lane.b32.xlu1 %v4384_v12, %s4021_s10 }
 0x561   :  { %v1164_v13 = vpop.permute.xlu1 %1163 }
 0x562   :  { %v1166_v14 = vsel %vm309_vm5, %v1164_v13, 0.0 }
 0x563   :  { %v1167_v15 = vpack.c.bf16 %v1166_v14, %v1166_v14 }
 0x565   :  { %3570 = vmatmul.mubr.msk.bf16.vlgmr.msra.gmra.mxu1 %vm1054_vm6, %v1167_v15 }
 0x566   :  { %3577 = vmatprep.mubr.msk.bf16.mxu1 %vm4019_vm0, %v4018_v0  ;;  %3574 = vmatpush3.bf16.msra.mxu1 %v4406_v32 }
 0x567   :  { %3575 = vmatprep.subr.bf16.mxu1 %v4018_v0 }
 0x56a   :  { %3576 = vmatpush3.bf16.msra.mxu1 %v4412_v33 }
 0x56b   :  { %3597 = vmatprep.subr.bf16.mxu1 %v4018_v0 }
 0x625   :  { %v1235_v17 = vpop.f32.mrf.mxu1 }
 0x626   :  { %v1236_v18 = vadd.f32 %v4395_v16, %v1235_v17 }
 0x627   :  { %v3571_v19 = vpop.f32.mrf.mxu1 }
 0x628   :  { %3884 = vtanh.f32 %v1236_v18  ;;  %v3204_v23 = vmul.f32 -1.442695, %v1236_v18 }
 0x629   :  { %v1238_v20 = vpop.f32.mrf.mxu1 }
 0x62a   :  { %3886 = vpow2.f32 %v3204_v23 }
 0x62b   :  { %v3572_v21 = vpop.f32.mrf.mxu1 }
 0x635   :  { %v3885_v22 = vpop.eup %3884 }
 0x636   :  { %1250 = vrot.lane.b32.xlu0 %v3885_v22, %s4020_s1 }
 0x637   :  { %v3887_v24 = vpop.eup %3886 }
 0x638   :  { %v1244_v25 = vadd.f32 1.0, %v3887_v24 }
 0x63a   :  { %3888 = vrcp.f32 %v1244_v25 }
 0x647   :  { %v3889_v26 = vpop.eup %3888 }
 0x648   :  { %v1248_v29 = vmul.f32 0.0, %v3889_v26 }
 0x6a8   :  { %v1251_v27 = vpop.permute.xlu0 %1250 }
 0x6a9   :  { %v1253_v28 = vmul.f32 %v3889_v26, %v1251_v27 }
 0x6ab   :  { %1255 = vrot.lane.b32.xlu1 %v1253_v28, %s4021_s10 }
 0x71d   :  { %v1256_v30 = vpop.permute.xlu1 %1255 }
 0x71e   :  { %v4400_v31 = vadd.f32 %v1256_v30, %v1248_v29 }
 0x720   :  { %3890 = vtanh.f32 %v4400_v31 }
 0x72d   :  { %v3891_v34 = vpop.eup %3890 }
 0x72e   :  { %1261 = vrot.lane.b32.xlu0 %v3891_v34, %s4020_s1 }
 0x7a0   :  { %v1262_v35 = vpop.permute.xlu0 %1261 }
 0x7a1   :  { %v4418_v36 = vmul.f32 %v3889_v26, %v1262_v35 }
 0x7a3   :  { %v1265_v37 = vpack.c.bf16 %v4418_v36, %v4418_v36 }
 0x7a5   :  { %1273 = vrot.lane.b32.xlu1 %v1265_v37, %s4021_s10  ;;  %v1443_v37 = vrot.slane %v4352_v5, 6 }
 0x817   :  { %v1274_v38 = vpop.permute.xlu1 %1273 }
 0x818   :  { %3578 = vmatmul.mubr.msk.bf16.vlgmr.msra.gmra.mxu1 %vm309_vm5, %v1274_v38 }
 0x819   :  { %3598 = vmatpush3.bf16.msra.mxu1 %v4358_v6  ;;  %3605 = vmatprep.mubr.msk.bf16.mxu1 %vm4019_vm0, %v4018_v0 }
 0x81a   :  { %3599 = vmatprep.subr.bf16.mxu1 %v4018_v0 }
 0x81d   :  { %3600 = vmatpush3.bf16.msra.mxu1 %v4364_v7 }
 0x81e   :  { %3601 = vmatprep.subr.bf16.mxu1 %v4018_v0 }
 0x821   :  { %3602 = vmatpush3.bf16.msra.mxu1 %v4371_v8 }
 0x822   :  { %3603 = vmatprep.subr.bf16.mxu1 %v4018_v0 }
 0x825   :  { %3604 = vmatpush3.bf16.msra.mxu1 %v4380_v10 }
 0x826   :  { %3609 = vmatprep.subr.bf16.mxu1 %v4018_v0 }
 0x8d8   :  { %v1324_v40 = vpop.f32.mrf.mxu1 }
 0x8d9   :  { %v1325_v41 = vadd.f32 %v4437_v39, %v1324_v40 }
 0x8da   :  { %v3579_v42 = vpop.f32.mrf.mxu1 }
 0x8db   :  { %1332 = vrot.lane.b32.xlu0 %v1325_v41, %s4022_s2  ;;  %1330 = vst [vmem:[%s5078_s16] sm:$0x3] %v1325_v41 }
 0x8dc   :  { %v1327_v43 = vpop.f32.mrf.mxu1 }
 0x8dd   :  { %v1467_v43 = vrot.slane %v4418_v36, 6 }
 0x8de   :  { %v3580_v44 = vpop.f32.mrf.mxu1 }
 0x94d   :  { %v1333_v45 = vpop.permute.xlu0 %1332 }
 0x94e   :  { %vm1335_vm8 = vcmp.gt.f32.partialorder %v1325_v41, %v1333_v45 }
 0x94f   :  { %v1337_v46 = vsel %vm1335_vm8, %v1325_v41, %v1333_v45  ;;  %v1336_v49 = vsel %vm1335_vm8, 1, %v4023_v48 }
 0x950   :  { %1339 = vrot.lane.b32.xlu1 %v1337_v46, %s4022_s2  ;;  %1343 = vrot.lane.b32.xlu0 %v1336_v49, %s4022_s2 }
 0x9c2   :  { %v1340_v50 = vpop.permute.xlu1 %1339  ;;  %v1344_v52 = vpop.permute.xlu0 %1343 }
 0x9c3   :  { %vm1342_vm9 = vcmp.gt.f32.partialorder %v1325_v41, %v1340_v50 }
 0x9c4   :  { %v1346_v53 = vsel %vm1342_vm9, %v1325_v41, %v1340_v50  ;;  %v1345_v60 = vsel %vm1342_vm9, 2, %v1344_v52 }
 0x9c5   :  { %1348 = vrot.lane.b32.xlu1 %v1346_v53, %s4022_s2  ;;  %1352 = vrot.lane.b32.xlu0 %v1345_v60, %s4022_s2 }
 0xa37   :  { %v1349_v61 = vpop.permute.xlu1 %1348  ;;  %v1353_v62 = vpop.permute.xlu0 %1352 }
 0xa38   :  { %vm1351_vm10 = vcmp.gt.f32.partialorder %v1325_v41, %v1349_v61 }
 0xa39   :  { %v1354_v63 = vsel %vm1351_vm10, 3, %v1353_v62 }
 0xa3a   :  { %vm1358_vm11 = vcmp.eq.s32.totalorder %v1354_v63, 1  ;;  %vm1355_vm12 = vcmp.eq.s32.totalorder %v1354_v63, 0  ;;  %vm1361_vm13 = vcmp.eq.s32.totalorder %v1354_v63, 2  ;;  %vm1364_vm14 = vcmp.eq.s32.totalorder %v1354_v63, 3 }
 0xa3b   :  { %v3210_v1 = vsel %vm1358_vm11, 1.0, %v4018_v0  ;;  %v3209_v2 = vsel %vm1355_vm12, 1.0, %v4018_v0  ;;  %v3211_v3 = vsel %vm1361_vm13, 1.0, %v4018_v0  ;;  %v3212_v14 = vsel %vm1364_vm14, 1.0, %v4018_v0 }
 0xa3c   :  { %1372 = vrot.lane.b32.xlu0 %v3210_v1, %s4024_s9  ;;  %1368 = vrot.lane.b32.xlu1 %v3209_v2, %s4025_s5 }
 0xa40   :  { %1383 = vrot.lane.b32.xlu0 %v4384_v12, %s4024_s9  ;;  %1376 = vrot.lane.b32.xlu1 %v3211_v3, %s4026_s30 }
 0xaae   :  { %v1373_v4 = vpop.permute.xlu0 %1372  ;;  %v1369_v9 = vpop.permute.xlu1 %1368 }
 0xaaf   :  { %v1379_v11 = vsel %vm119_vm1, %v1369_v9, %v1373_v4 }
 0xab2   :  { %v1377_v13 = vpop.permute.xlu1 %1376  ;;  %v1384_v17 = vpop.permute.xlu0 %1383 }
 0xab3   :  { %v1380_v15 = vsel %vm309_vm5, %v1379_v11, %v1377_v13 }
 0xab4   :  { %v1382_v18 = vsel %vm1381_vm15, %v1380_v15, %v3212_v14 }
 0xab5   :  { %v1386_v19 = vsel %vm1054_vm6, %v1382_v18, %v1384_v17 }
 0xab6   :  { %v1387_v12 = vpack.c.bf16 %v1386_v19, %v1386_v19 }
 0xab8   :  { %3594 = vmatmul.mubr.msk.bf16.vlgmr.msra.gmra.mxu0 %vm1093_vm7, %v1387_v12 }
 0xab9   :  { %3618 = vmatpush3.bf16.msra.mxu0 %v4275_v54  ;;  %3629 = vmatprep.mubr.msk.bf16.mxu0 %vm4019_vm0, %v4018_v0 }
 0xaba   :  { %3619 = vmatprep.subr.bf16.mxu0 %v4018_v0 }
 0xabd   :  { %3620 = vmatpush3.bf16.msra.mxu0 %v4282_v55 }
 0xabe   :  { %3621 = vmatprep.subr.bf16.mxu0 %v4018_v0 }
 0xac1   :  { %3622 = vmatpush3.bf16.msra.mxu0 %v4289_v56 }
 0xac2   :  { %3623 = vmatprep.subr.bf16.mxu0 %v4018_v0 }
 0xac5   :  { %3624 = vmatpush3.bf16.msra.mxu0 %v4296_v57 }
 0xac6   :  { %3625 = vmatprep.subr.bf16.mxu0 %v4018_v0 }
 0xac9   :  { %3626 = vmatpush3.bf16.msra.mxu0 %v4303_v58 }
 0xaca   :  { %3627 = vmatprep.subr.bf16.mxu0 %v4018_v0 }
 0xacd   :  { %3628 = vmatpush3.bf16.msra.mxu0 %v4310_v59 }
 0xace   :  { %3653 = vmatprep.subr.bf16.mxu0 %v4018_v0 }
 0xb78   :  { %v1425_v20 = vpop.f32.mrf.mxu0 }
 0xb79   :  { %v1432_v21 = vrot.slane %v1425_v20, 6 }
 0xb7a   :  { %v3595_v22 = vpop.f32.mrf.mxu0 }
 0xb7b   :  { %v1434_v23 = vadd.f32 %v1432_v21, %v4345_v47 }
 0xb7c   :  { %v1428_v24 = vpop.f32.mrf.mxu0 }
 0xb7d   :  { %3892 = vtanh.f32 %v1434_v23  ;;  %v3214_v27 = vmul.f32 -1.442695, %v1434_v23 }
 0xb7e   :  { %v3596_v25 = vpop.f32.mrf.mxu0 }
 0xb7f   :  { %3894 = vpow2.f32 %v3214_v27 }
 0xb8a   :  { %v3893_v26 = vpop.eup %3892 }
 0xb8b   :  { %1447 = vrot.lane.b32.xlu1 %v3893_v26, %s4020_s1 }
 0xb8c   :  { %v3895_v28 = vpop.eup %3894 }
 0xb8d   :  { %v1438_v29 = vadd.f32 1.0, %v3895_v28 }
 0xb8f   :  { %3896 = vrcp.f32 %v1438_v29 }
 0xb9c   :  { %v3897_v30 = vpop.eup %3896 }
 0xb9d   :  { %v1445_v38 = vmul.f32 %v3897_v30, %v1443_v37 }
 0xbfd   :  { %v1448_v34 = vpop.permute.xlu1 %1447 }
 0xbfe   :  { %v1450_v35 = vmul.f32 %v3897_v30, %v1448_v34 }
 0xc00   :  { %1452 = vrot.lane.b32.xlu0 %v1450_v35, %s4021_s10 }
 0xc72   :  { %v1453_v40 = vpop.permute.xlu0 %1452 }
 0xc73   :  { %v4481_v41 = vadd.f32 %v1453_v40, %v1445_v38 }
 0xc75   :  { %3898 = vtanh.f32 %v4481_v41 }
 0xc82   :  { %v3899_v42 = vpop.eup %3898 }
 0xc83   :  { %1458 = vrot.lane.b32.xlu1 %v3899_v42, %s4020_s1 }
 0xc87   :  { %1468 = vrot.lane.b32.xlu1 %v1467_v43, %s4020_s1 }
 0xcf5   :  { %v1459_v44 = vpop.permute.xlu1 %1458 }
 0xcf6   :  { %v4487_v45 = vmul.f32 %v3897_v30, %v1459_v44 }
 0xcf8   :  { %1463 = vrot.lane.b32.xlu0 %v4487_v45, %s4021_s10  ;;  %v1642_v43 = vrot.slane %v4487_v45, 2 }
 0xcf9   :  { %v1469_v5 = vpop.permute.xlu1 %1468 }
 0xd6a   :  { %v1464_v46 = vpop.permute.xlu0 %1463 }
 0xd6b   :  { %v1471_v49 = vsel %vm309_vm5, %v1464_v46, %v1469_v5 }
 0xd6c   :  { %v1472_v50 = vpack.c.bf16 %v1471_v49, %v1471_v49 }
 0xd6e   :  { %v1474_v52 = vrot.slane %v1472_v50, 1 }
 0xd70   :  { %3606 = vmatmul.mubr.msk.bf16.vlgmr.msra.gmra.mxu1 %vm1054_vm6, %v1474_v52 }
 0xd71   :  { %3610 = vmatpush3.bf16.msra.mxu1 %v4406_v32  ;;  %3613 = vmatprep.mubr.msk.bf16.mxu1 %vm4019_vm0, %v4018_v0 }
 0xd72   :  { %3611 = vmatprep.subr.bf16.mxu1 %v4018_v0 }
 0xd75   :  { %3612 = vmatpush3.bf16.msra.mxu1 %v4412_v33 }
 0xd76   :  { %3633 = vmatprep.subr.bf16.mxu1 %v4018_v0 }
 0xe30   :  { %v1512_v36 = vpop.f32.mrf.mxu1 }
 0xe31   :  { %v1513_v53 = vadd.f32 %v4395_v16, %v1512_v36 }
 0xe32   :  { %v3607_v60 = vpop.f32.mrf.mxu1 }
 0xe33   :  { %3900 = vtanh.f32 %v1513_v53  ;;  %v3216_v1 = vmul.f32 -1.442695, %v1513_v53 }
 0xe34   :  { %v1515_v61 = vpop.f32.mrf.mxu1 }
 0xe35   :  { %3902 = vpow2.f32 %v3216_v1 }
 0xe36   :  { %v3608_v62 = vpop.f32.mrf.mxu1 }
 0xe40   :  { %v3901_v63 = vpop.eup %3900 }
 0xe41   :  { %1527 = vrot.lane.b32.xlu0 %v3901_v63, %s4020_s1 }
 0xe42   :  { %v3903_v2 = vpop.eup %3902 }
 0xe43   :  { %v1521_v3 = vadd.f32 1.0, %v3903_v2 }
 0xe45   :  { %3904 = vrcp.f32 %v1521_v3 }
 0xe52   :  { %v3905_v4 = vpop.eup %3904 }
 0xe53   :  { %v1525_v13 = vmul.f32 %v3905_v4, %v4400_v31 }
 0xeb3   :  { %v1528_v9 = vpop.permute.xlu0 %1527 }
 0xeb4   :  { %v1530_v11 = vmul.f32 %v3905_v4, %v1528_v9 }
 0xeb6   :  { %1532 = vrot.lane.b32.xlu1 %v1530_v11, %s4021_s10  ;;  %v1703_v11 = vrot.slane %v4481_v41, 6 }
 0xf28   :  { %v1533_v14 = vpop.permute.xlu1 %1532 }
 0xf29   :  { %v4503_v15 = vadd.f32 %v1533_v14, %v1525_v13 }
 0xf2b   :  { %3906 = vtanh.f32 %v4503_v15 }
 0xf38   :  { %v3907_v17 = vpop.eup %3906 }
 0xf39   :  { %1538 = vrot.lane.b32.xlu0 %v3907_v17, %s4020_s1 }
 0xfab   :  { %v1539_v18 = vpop.permute.xlu0 %1538 }
 0xfac   :  { %v4507_v19 = vmul.f32 %v3905_v4, %v1539_v18 }
 0xfae   :  { %v1542_v12 = vpack.c.bf16 %v4507_v19, %v4507_v19 }
 0xfb0   :  { %1544 = vrot.lane.b32.xlu1 %v1542_v12, %s4021_s10  ;;  %v1727_v12 = vrot.slane %v4507_v19, 4 }
0x1022   :  { %v1545_v20 = vpop.permute.xlu1 %1544 }
0x1023   :  { %3614 = vmatmul.mubr.msk.bf16.vlgmr.msra.gmra.mxu1 %vm309_vm5, %v1545_v20 }
0x1024   :  { %3634 = vmatpush3.bf16.msra.mxu1 %v4358_v6  ;;  %3641 = vmatprep.mubr.msk.bf16.mxu1 %vm4019_vm0, %v4018_v0 }
0x1025   :  { %3635 = vmatprep.subr.bf16.mxu1 %v4018_v0 }
0x1028   :  { %3636 = vmatpush3.bf16.msra.mxu1 %v4364_v7 }
0x1029   :  { %3637 = vmatprep.subr.bf16.mxu1 %v4018_v0 }
0x102c   :  { %3638 = vmatpush3.bf16.msra.mxu1 %v4371_v8 }
0x102d   :  { %3639 = vmatprep.subr.bf16.mxu1 %v4018_v0 }
0x1030   :  { %3640 = vmatpush3.bf16.msra.mxu1 %v4380_v10 }
0x1031   :  { %3645 = vmatprep.subr.bf16.mxu1 %v4018_v0 }
0x10e3   :  { %v1583_v31 = vpop.f32.mrf.mxu1 }
0x10e4   :  { %v1584_v21 = vadd.f32 %v4437_v39, %v1583_v31 }
0x10e5   :  { %v3615_v22 = vpop.f32.mrf.mxu1 }
0x10e6   :  { %1592 = vrot.lane.b32.xlu0 %v1584_v21, %s4022_s2  ;;  %3218 = vst [vmem:[%s5078_s16 + $0x2] sm:$0x3] %v1584_v21 }
0x10e7   :  { %v1586_v23 = vpop.f32.mrf.mxu1 }
0x10e9   :  { %v3616_v24 = vpop.f32.mrf.mxu1 }
0x1158   :  { %v1593_v25 = vpop.permute.xlu0 %1592 }
0x1159   :  { %vm1595_vm2 = vcmp.gt.f32.partialorder %v1584_v21, %v1593_v25 }
0x115a   :  { %v1597_v26 = vsel %vm1595_vm2, %v1584_v21, %v1593_v25  ;;  %v1596_v27 = vsel %vm1595_vm2, 1, %v4023_v48 }
0x115b   :  { %1599 = vrot.lane.b32.xlu1 %v1597_v26, %s4022_s2  ;;  %1603 = vrot.lane.b32.xlu0 %v1596_v27, %s4022_s2 }
0x11cd   :  { %v1600_v28 = vpop.permute.xlu1 %1599  ;;  %v1604_v29 = vpop.permute.xlu0 %1603 }
0x11ce   :  { %vm1602_vm3 = vcmp.gt.f32.partialorder %v1584_v21, %v1600_v28 }
0x11cf   :  { %v1606_v30 = vsel %vm1602_vm3, %v1584_v21, %v1600_v28  ;;  %v1605_v34 = vsel %vm1602_vm3, 2, %v1604_v29 }
0x11d0   :  { %1608 = vrot.lane.b32.xlu1 %v1606_v30, %s4022_s2  ;;  %1612 = vrot.lane.b32.xlu0 %v1605_v34, %s4022_s2 }
0x1242   :  { %v1609_v35 = vpop.permute.xlu1 %1608  ;;  %v1613_v37 = vpop.permute.xlu0 %1612 }
0x1243   :  { %vm1611_vm4 = vcmp.gt.f32.partialorder %v1584_v21, %v1609_v35 }
0x1244   :  { %v1614_v38 = vsel %vm1611_vm4, 3, %v1613_v37 }
0x1245   :  { %vm1618_vm8 = vcmp.eq.s32.totalorder %v1614_v38, 1  ;;  %vm1615_vm9 = vcmp.eq.s32.totalorder %v1614_v38, 0  ;;  %vm1621_vm10 = vcmp.eq.s32.totalorder %v1614_v38, 2  ;;  %vm1624_vm11 = vcmp.eq.s32.totalorder %v1614_v38, 3 }
0x1246   :  { %v3220_v40 = vsel %vm1618_vm8, 1.0, %v4018_v0  ;;  %v3219_v42 = vsel %vm1615_vm9, 1.0, %v4018_v0  ;;  %v3221_v44 = vsel %vm1621_vm10, 1.0, %v4018_v0  ;;  %v3222_v52 = vsel %vm1624_vm11, 1.0, %v4018_v0 }
0x1247   :  { %1632 = vrot.lane.b32.xlu0 %v3220_v40, %s4024_s9  ;;  %1628 = vrot.lane.b32.xlu1 %v3219_v42, %s4025_s5 }
0x124b   :  { %1643 = vrot.lane.b32.xlu0 %v1642_v43, %s4024_s9  ;;  %1636 = vrot.lane.b32.xlu1 %v3221_v44, %s4026_s30 }
0x12b9   :  { %v1633_v5 = vpop.permute.xlu0 %1632  ;;  %v1629_v46 = vpop.permute.xlu1 %1628 }
0x12ba   :  { %v1639_v49 = vsel %vm119_vm1, %v1629_v46, %v1633_v5 }
0x12bd   :  { %v1637_v50 = vpop.permute.xlu1 %1636  ;;  %v1644_v53 = vpop.permute.xlu0 %1643 }
0x12be   :  { %v1640_v36 = vsel %vm309_vm5, %v1639_v49, %v1637_v50 }
0x12bf   :  { %v1641_v60 = vsel %vm1381_vm15, %v1640_v36, %v3222_v52 }
0x12c0   :  { %v1646_v45 = vsel %vm1054_vm6, %v1641_v60, %v1644_v53 }
0x12c1   :  { %v1647_v61 = vpack.c.bf16 %v1646_v45, %v1646_v45 }
0x12c3   :  { %3630 = vmatmul.mubr.msk.bf16.vlgmr.msra.gmra.mxu0 %vm1093_vm7, %v1647_v61 }
0x12c4   :  { %3654 = vmatpush3.bf16.msra.mxu0 %v4275_v54  ;;  %3665 = vmatprep.mubr.msk.bf16.mxu0 %vm4019_vm0, %v4018_v0 }
0x12c5   :  { %3655 = vmatprep.subr.bf16.mxu0 %v4018_v0 }
0x12c8   :  { %3656 = vmatpush3.bf16.msra.mxu0 %v4282_v55 }
0x12c9   :  { %3657 = vmatprep.subr.bf16.mxu0 %v4018_v0 }
0x12cc   :  { %3658 = vmatpush3.bf16.msra.mxu0 %v4289_v56 }
0x12cd   :  { %3659 = vmatprep.subr.bf16.mxu0 %v4018_v0 }
0x12d0   :  { %3660 = vmatpush3.bf16.msra.mxu0 %v4296_v57 }
0x12d1   :  { %3661 = vmatprep.subr.bf16.mxu0 %v4018_v0 }
0x12d4   :  { %3662 = vmatpush3.bf16.msra.mxu0 %v4303_v58 }
0x12d5   :  { %3663 = vmatprep.subr.bf16.mxu0 %v4018_v0 }
0x12d8   :  { %3664 = vmatpush3.bf16.msra.mxu0 %v4310_v59 }
0x12d9   :  { %3689 = vmatprep.subr.bf16.mxu0 %v4018_v0 }
0x1383   :  { %v1685_v54 = vpop.f32.mrf.mxu0 }
0x1384   :  { %v1692_v55 = vrot.slane %v1685_v54, 4 }
0x1385   :  { %v3631_v62 = vpop.f32.mrf.mxu0 }
0x1386   :  { %v1694_v63 = vadd.f32 %v1692_v55, %v4345_v47 }
0x1387   :  { %v1688_v56 = vpop.f32.mrf.mxu0 }
0x1388   :  { %3908 = vtanh.f32 %v1694_v63  ;;  %v3224_v57 = vmul.f32 -1.442695, %v1694_v63 }
0x1389   :  { %v3632_v1 = vpop.f32.mrf.mxu0 }
0x138a   :  { %3910 = vpow2.f32 %v3224_v57 }
0x1395   :  { %v3909_v2 = vpop.eup %3908 }
0x1396   :  { %1707 = vrot.lane.b32.xlu1 %v3909_v2, %s4020_s1 }
0x1397   :  { %v3911_v58 = vpop.eup %3910 }
0x1398   :  { %v1698_v3 = vadd.f32 1.0, %v3911_v58 }
0x139a   :  { %3912 = vrcp.f32 %v1698_v3 }
0x13a7   :  { %v3913_v4 = vpop.eup %3912 }
0x13a8   :  { %v1705_v13 = vmul.f32 %v3913_v4, %v1703_v11 }
0x1408   :  { %v1708_v59 = vpop.permute.xlu1 %1707 }
0x1409   :  { %v1710_v9 = vmul.f32 %v3913_v4, %v1708_v59 }
0x140b   :  { %1712 = vrot.lane.b32.xlu0 %v1710_v9, %s4021_s10 }
0x147d   :  { %v1713_v14 = vpop.permute.xlu0 %1712 }
0x147e   :  { %v4565_v17 = vadd.f32 %v1713_v14, %v1705_v13 }
0x1480   :  { %3914 = vtanh.f32 %v4565_v17 }
0x148d   :  { %v3915_v18 = vpop.eup %3914 }
0x148e   :  { %1718 = vrot.lane.b32.xlu1 %v3915_v18, %s4020_s1 }
0x1492   :  { %1728 = vrot.lane.b32.xlu1 %v1727_v12, %s4020_s1 }
0x1500   :  { %v1719_v20 = vpop.permute.xlu1 %1718 }
0x1501   :  { %v4571_v31 = vmul.f32 %v3913_v4, %v1719_v20 }
0x1503   :  { %1723 = vrot.lane.b32.xlu0 %v4571_v31, %s4021_s10  ;;  %v1902_v59 = vrot.slane %v4571_v31, 4 }
0x1504   :  { %v1729_v41 = vpop.permute.xlu1 %1728 }
0x1575   :  { %v1724_v21 = vpop.permute.xlu0 %1723 }
0x1576   :  { %v1731_v22 = vsel %vm309_vm5, %v1724_v21, %v1729_v41 }
0x1577   :  { %v1732_v23 = vpack.c.bf16 %v1731_v22, %v1731_v22 }
0x1579   :  { %v1734_v24 = vrot.slane %v1732_v23, 2  ;;  %v4634_v23 = vld [vmem:[%s5070_s11 + $0x28] sm:$0xff]  }
0x157b   :  { %3642 = vmatmul.mubr.msk.bf16.vlgmr.msra.gmra.mxu1 %vm1054_vm6, %v1734_v24  ;;  %v4643_v24 = vld [vmem:[%s5070_s11 + $0x20] sm:$0xff]  }
0x157c   :  { %3646 = vmatpush3.bf16.msra.mxu1 %v4406_v32  ;;  %3649 = vmatprep.mubr.msk.bf16.mxu1 %vm4019_vm0, %v4018_v0 }
0x157d   :  { %3647 = vmatprep.subr.bf16.mxu1 %v4018_v0 }
0x1580   :  { %3648 = vmatpush3.bf16.msra.mxu1 %v4412_v33 }
0x1581   :  { %3669 = vmatprep.subr.bf16.mxu1 %v4018_v0 }
0x163b   :  { %v1772_v19 = vpop.f32.mrf.mxu1 }
0x163c   :  { %v1773_v25 = vadd.f32 %v4395_v16, %v1772_v19  ;;  %v4650_v19 = vld [vmem:[%s5070_s11 + $0x18] sm:$0xff]  }
0x163d   :  { %v3643_v26 = vpop.f32.mrf.mxu1 }
0x163e   :  { %3916 = vtanh.f32 %v1773_v25  ;;  %v3226_v30 = vmul.f32 -1.442695, %v1773_v25  ;;  %v4657_v25 = vld [vmem:[%s5070_s11 + $0x10] sm:$0xff]   ;;  %v4664_v26 = vld [vmem:[%s5070_s11 + $0x8] sm:$0xff]  }
0x163f   :  { %v1775_v27 = vpop.f32.mrf.mxu1 }
0x1640   :  { %3918 = vpow2.f32 %v3226_v30  ;;  %v4671_v27 = vld [vmem:[%s5070_s11] sm:$0xff]  }
0x1641   :  { %v3644_v28 = vpop.f32.mrf.mxu1 }
0x164b   :  { %v3917_v29 = vpop.eup %3916 }
0x164c   :  { %1787 = vrot.lane.b32.xlu0 %v3917_v29, %s4020_s1 }
0x164d   :  { %v3919_v34 = vpop.eup %3918 }
0x164e   :  { %v1781_v35 = vadd.f32 1.0, %v3919_v34 }
0x1650   :  { %3920 = vrcp.f32 %v1781_v35 }
0x165d   :  { %v3921_v37 = vpop.eup %3920 }
0x165e   :  { %v1785_v42 = vmul.f32 %v3921_v37, %v4503_v15 }
0x16be   :  { %v1788_v38 = vpop.permute.xlu0 %1787 }
0x16bf   :  { %v1790_v40 = vmul.f32 %v3921_v37, %v1788_v38 }
0x16c1   :  { %1792 = vrot.lane.b32.xlu1 %v1790_v40, %s4021_s10 }
0x1733   :  { %v1793_v43 = vpop.permute.xlu1 %1792 }
0x1734   :  { %v4587_v44 = vadd.f32 %v1793_v43, %v1785_v42 }
0x1736   :  { %3922 = vtanh.f32 %v4587_v44 }
0x1743   :  { %v3923_v5 = vpop.eup %3922 }
0x1744   :  { %1798 = vrot.lane.b32.xlu0 %v3923_v5, %s4020_s1 }
0x17b6   :  { %v1799_v46 = vpop.permute.xlu0 %1798 }
0x17b7   :  { %v4591_v49 = vmul.f32 %v3921_v37, %v1799_v46 }
0x17b9   :  { %v1802_v50 = vpack.c.bf16 %v4591_v49, %v4591_v49 }
0x17bb   :  { %1804 = vrot.lane.b32.xlu1 %v1802_v50, %s4021_s10 }
0x182d   :  { %v1805_v52 = vpop.permute.xlu1 %1804 }
0x182e   :  { %3650 = vmatmul.mubr.msk.bf16.vlgmr.msra.gmra.mxu1 %vm309_vm5, %v1805_v52  ;;  %v1963_v52 = vrot.slane %v4565_v17, 6 }
0x182f   :  { %3670 = vmatpush3.bf16.msra.mxu1 %v4358_v6  ;;  %3677 = vmatprep.mubr.msk.bf16.mxu1 %vm4019_vm0, %v4018_v0 }
0x1830   :  { %3671 = vmatprep.subr.bf16.mxu1 %v4018_v0 }
0x1833   :  { %3672 = vmatpush3.bf16.msra.mxu1 %v4364_v7 }
0x1834   :  { %3673 = vmatprep.subr.bf16.mxu1 %v4018_v0 }
0x1837   :  { %3674 = vmatpush3.bf16.msra.mxu1 %v4371_v8 }
0x1838   :  { %3675 = vmatprep.subr.bf16.mxu1 %v4018_v0 }
0x183b   :  { %3676 = vmatpush3.bf16.msra.mxu1 %v4380_v10 }
0x183c   :  { %3681 = vmatprep.subr.bf16.mxu1 %v4018_v0 }
0x18ee   :  { %v1843_v15 = vpop.f32.mrf.mxu1 }
0x18ef   :  { %v1844_v36 = vadd.f32 %v4437_v39, %v1843_v15 }
0x18f0   :  { %v3651_v53 = vpop.f32.mrf.mxu1 }
0x18f1   :  { %1852 = vrot.lane.b32.xlu0 %v1844_v36, %s4022_s2  ;;  %3228 = vst [vmem:[%s5078_s16 + $0x4] sm:$0x3] %v1844_v36 }
0x18f2   :  { %v1846_v60 = vpop.f32.mrf.mxu1 }
0x18f3   :  { %v1987_v60 = vrot.slane %v4591_v49, 2 }
0x18f4   :  { %v3652_v45 = vpop.f32.mrf.mxu1 }
0x1963   :  { %v1853_v61 = vpop.permute.xlu0 %1852 }
0x1964   :  { %vm1855_vm12 = vcmp.gt.f32.partialorder %v1844_v36, %v1853_v61 }
0x1965   :  { %v1857_v54 = vsel %vm1855_vm12, %v1844_v36, %v1853_v61  ;;  %v1856_v55 = vsel %vm1855_vm12, 1, %v4023_v48 }
0x1966   :  { %1859 = vrot.lane.b32.xlu1 %v1857_v54, %s4022_s2  ;;  %1863 = vrot.lane.b32.xlu0 %v1856_v55, %s4022_s2 }
0x19d8   :  { %v1860_v62 = vpop.permute.xlu1 %1859  ;;  %v1864_v63 = vpop.permute.xlu0 %1863 }
0x19d9   :  { %vm1862_vm13 = vcmp.gt.f32.partialorder %v1844_v36, %v1860_v62 }
0x19da   :  { %v1865_v56 = vsel %vm1862_vm13, 2, %v1864_v63  ;;  %v1866_v1 = vsel %vm1862_vm13, %v1844_v36, %v1860_v62 }
0x19db   :  { %1868 = vrot.lane.b32.xlu1 %v1866_v1, %s4022_s2  ;;  %1872 = vrot.lane.b32.xlu0 %v1865_v56, %s4022_s2 }
0x1a4d   :  { %v1869_v2 = vpop.permute.xlu1 %1868  ;;  %v1873_v57 = vpop.permute.xlu0 %1872 }
0x1a4e   :  { %vm1871_vm14 = vcmp.gt.f32.partialorder %v1844_v36, %v1869_v2 }
0x1a4f   :  { %v1874_v58 = vsel %vm1871_vm14, 3, %v1873_v57 }
0x1a50   :  { %vm1878_vm2 = vcmp.eq.s32.totalorder %v1874_v58, 1  ;;  %vm1875_vm3 = vcmp.eq.s32.totalorder %v1874_v58, 0  ;;  %vm1881_vm4 = vcmp.eq.s32.totalorder %v1874_v58, 2  ;;  %vm1884_vm8 = vcmp.eq.s32.totalorder %v1874_v58, 3 }
0x1a51   :  { %v3230_v3 = vsel %vm1878_vm2, 1.0, %v4018_v0  ;;  %v3229_v4 = vsel %vm1875_vm3, 1.0, %v4018_v0  ;;  %v3231_v9 = vsel %vm1881_vm4, 1.0, %v4018_v0  ;;  %v3232_v12 = vsel %vm1884_vm8, 1.0, %v4018_v0 }
0x1a52   :  { %1892 = vrot.lane.b32.xlu0 %v3230_v3, %s4024_s9  ;;  %1888 = vrot.lane.b32.xlu1 %v3229_v4, %s4025_s5 }
0x1a56   :  { %1903 = vrot.lane.b32.xlu0 %v1902_v59, %s4024_s9  ;;  %1896 = vrot.lane.b32.xlu1 %v3231_v9, %s4026_s30 }
0x1ac4   :  { %v1893_v11 = vpop.permute.xlu0 %1892  ;;  %v1889_v13 = vpop.permute.xlu1 %1888 }
0x1ac5   :  { %v1899_v14 = vsel %vm119_vm1, %v1889_v13, %v1893_v11 }
0x1ac8   :  { %v1897_v18 = vpop.permute.xlu1 %1896  ;;  %v1904_v41 = vpop.permute.xlu0 %1903 }
0x1ac9   :  { %v1900_v20 = vsel %vm309_vm5, %v1899_v14, %v1897_v18 }
0x1aca   :  { %v1901_v21 = vsel %vm1381_vm15, %v1900_v20, %v3232_v12 }
0x1acb   :  { %v1906_v31 = vsel %vm1054_vm6, %v1901_v21, %v1904_v41 }
0x1acc   :  { %v1907_v22 = vpack.c.bf16 %v1906_v31, %v1906_v31 }
0x1ace   :  { %3666 = vmatmul.mubr.msk.bf16.vlgmr.msra.gmra.mxu0 %vm1093_vm7, %v1907_v22 }
0x1acf   :  { %3690 = vmatpush3.bf16.msra.mxu0 %v4634_v23  ;;  %3701 = vmatprep.mubr.msk.bf16.mxu0 %vm4019_vm0, %v4018_v0 }
0x1ad0   :  { %3691 = vmatprep.subr.bf16.mxu0 %v4018_v0 }
0x1ad3   :  { %3692 = vmatpush3.bf16.msra.mxu0 %v4643_v24 }
0x1ad4   :  { %3693 = vmatprep.subr.bf16.mxu0 %v4018_v0 }
0x1ad7   :  { %3694 = vmatpush3.bf16.msra.mxu0 %v4650_v19 }
0x1ad8   :  { %3695 = vmatprep.subr.bf16.mxu0 %v4018_v0 }
0x1adb   :  { %3696 = vmatpush3.bf16.msra.mxu0 %v4657_v25 }
0x1adc   :  { %3697 = vmatprep.subr.bf16.mxu0 %v4018_v0 }
0x1adf   :  { %3698 = vmatpush3.bf16.msra.mxu0 %v4664_v26 }
0x1ae0   :  { %3699 = vmatprep.subr.bf16.mxu0 %v4018_v0 }
0x1ae3   :  { %3700 = vmatpush3.bf16.msra.mxu0 %v4671_v27 }
0x1ae4   :  { %3725 = vmatprep.subr.bf16.mxu0 %v4018_v0 }
0x1b8e   :  { %v1945_v28 = vpop.f32.mrf.mxu0 }
0x1b8f   :  { %v1952_v29 = vrot.slane %v1945_v28, 2 }
0x1b90   :  { %v3667_v30 = vpop.f32.mrf.mxu0 }
0x1b91   :  { %v1954_v34 = vadd.f32 %v1952_v29, %v4345_v47 }
0x1b92   :  { %v1948_v35 = vpop.f32.mrf.mxu0 }
0x1b93   :  { %3924 = vtanh.f32 %v1954_v34  ;;  %v3234_v40 = vmul.f32 -1.442695, %v1954_v34 }
0x1b94   :  { %v3668_v37 = vpop.f32.mrf.mxu0 }
0x1b95   :  { %3926 = vpow2.f32 %v3234_v40 }
0x1ba0   :  { %v3925_v38 = vpop.eup %3924 }
0x1ba1   :  { %1967 = vrot.lane.b32.xlu1 %v3925_v38, %s4020_s1 }
0x1ba2   :  { %v3927_v42 = vpop.eup %3926 }
0x1ba3   :  { %v1958_v43 = vadd.f32 1.0, %v3927_v42 }
0x1ba5   :  { %3928 = vrcp.f32 %v1958_v43 }
0x1bb2   :  { %v3929_v5 = vpop.eup %3928 }
0x1bb3   :  { %v1965_v15 = vmul.f32 %v3929_v5, %v1963_v52 }
0x1c13   :  { %v1968_v46 = vpop.permute.xlu1 %1967 }
0x1c14   :  { %v1970_v50 = vmul.f32 %v3929_v5, %v1968_v46 }
0x1c16   :  { %1972 = vrot.lane.b32.xlu0 %v1970_v50, %s4021_s10 }
0x1c88   :  { %v1973_v47 = vpop.permute.xlu0 %1972 }
0x1c89   :  { %v4679_v36 = vadd.f32 %v1973_v47, %v1965_v15 }
0x1c8b   :  { %3930 = vtanh.f32 %v4679_v36 }
0x1c98   :  { %v3931_v53 = vpop.eup %3930 }
0x1c99   :  { %1978 = vrot.lane.b32.xlu1 %v3931_v53, %s4020_s1 }
0x1c9d   :  { %1988 = vrot.lane.b32.xlu1 %v1987_v60, %s4020_s1 }
0x1d0b   :  { %v1979_v45 = vpop.permute.xlu1 %1978 }
0x1d0c   :  { %v4685_v61 = vmul.f32 %v3929_v5, %v1979_v45 }
0x1d0e   :  { %1983 = vrot.lane.b32.xlu0 %v4685_v61, %s4021_s10  ;;  %v2162_v42 = vrot.slane %v4685_v61, 6 }
0x1d0f   :  { %v1989_v17 = vpop.permute.xlu1 %1988 }
0x1d80   :  { %v1984_v54 = vpop.permute.xlu0 %1983 }
0x1d81   :  { %v1991_v55 = vsel %vm309_vm5, %v1984_v54, %v1989_v17 }
0x1d82   :  { %v1992_v62 = vpack.c.bf16 %v1991_v55, %v1991_v55 }
0x1d84   :  { %v1994_v63 = vrot.slane %v1992_v62, 3 }
0x1d86   :  { %3678 = vmatmul.mubr.msk.bf16.vlgmr.msra.gmra.mxu1 %vm1054_vm6, %v1994_v63 }
0x1d87   :  { %3682 = vmatpush3.bf16.msra.mxu1 %v4406_v32  ;;  %3685 = vmatprep.mubr.msk.bf16.mxu1 %vm4019_vm0, %v4018_v0 }
0x1d88   :  { %3683 = vmatprep.subr.bf16.mxu1 %v4018_v0 }
0x1d8b   :  { %3684 = vmatpush3.bf16.msra.mxu1 %v4412_v33 }
0x1d8c   :  { %3705 = vmatprep.subr.bf16.mxu1 %v4018_v0 }
0x1e46   :  { %v2032_v49 = vpop.f32.mrf.mxu1 }
0x1e47   :  { %v2033_v56 = vadd.f32 %v4395_v16, %v2032_v49 }
0x1e48   :  { %v3679_v1 = vpop.f32.mrf.mxu1 }
0x1e49   :  { %3932 = vtanh.f32 %v2033_v56  ;;  %v3236_v32 = vmul.f32 -1.442695, %v2033_v56 }
0x1e4a   :  { %v2035_v2 = vpop.f32.mrf.mxu1 }
0x1e4b   :  { %3934 = vpow2.f32 %v3236_v32 }
0x1e4c   :  { %v3680_v57 = vpop.f32.mrf.mxu1 }
0x1e56   :  { %v3933_v58 = vpop.eup %3932 }
0x1e57   :  { %2047 = vrot.lane.b32.xlu0 %v3933_v58, %s4020_s1 }
0x1e58   :  { %v3935_v3 = vpop.eup %3934 }
0x1e59   :  { %v2041_v4 = vadd.f32 1.0, %v3935_v3  ;;  %v2220_v3 = vrot.slane %v4679_v36, 6 }
0x1e5b   :  { %3936 = vrcp.f32 %v2041_v4 }
0x1e68   :  { %v3937_v59 = vpop.eup %3936 }
0x1e69   :  { %v2045_v11 = vmul.f32 %v3937_v59, %v4587_v44 }
0x1ec9   :  { %v2048_v9 = vpop.permute.xlu0 %2047 }
0x1eca   :  { %v2050_v33 = vmul.f32 %v3937_v59, %v2048_v9 }
0x1ecc   :  { %2052 = vrot.lane.b32.xlu1 %v2050_v33, %s4021_s10 }
0x1f3e   :  { %v2053_v16 = vpop.permute.xlu1 %2052 }
0x1f3f   :  { %v4701_v13 = vadd.f32 %v2053_v16, %v2045_v11 }
0x1f41   :  { %3938 = vtanh.f32 %v4701_v13 }
0x1f4e   :  { %v3939_v14 = vpop.eup %3938 }
0x1f4f   :  { %2058 = vrot.lane.b32.xlu0 %v3939_v14, %s4020_s1 }
0x1fc1   :  { %v2059_v18 = vpop.permute.xlu0 %2058 }
0x1fc2   :  { %v4705_v12 = vmul.f32 %v3937_v59, %v2059_v18 }
0x1fc4   :  { %v2062_v20 = vpack.c.bf16 %v4705_v12, %v4705_v12 }
0x1fc6   :  { %2064 = vrot.lane.b32.xlu1 %v2062_v20, %s4021_s10 }
0x2038   :  { %v2065_v41 = vpop.permute.xlu1 %2064 }
0x2039   :  { %3686 = vmatmul.mubr.msk.bf16.vlgmr.msra.gmra.mxu1 %vm309_vm5, %v2065_v41  ;;  %v4778_v41 = vld [vmem:[%s5076_s14 + $0x8] sm:$0xff]  }
0x203a   :  { %3706 = vmatpush3.bf16.msra.mxu1 %v4358_v6  ;;  %3713 = vmatprep.mubr.msk.bf16.mxu1 %vm4019_vm0, %v4018_v0 }
0x203b   :  { %3707 = vmatprep.subr.bf16.mxu1 %v4018_v0 }
0x203e   :  { %3708 = vmatpush3.bf16.msra.mxu1 %v4364_v7 }
0x203f   :  { %3709 = vmatprep.subr.bf16.mxu1 %v4018_v0 }
0x2042   :  { %3710 = vmatpush3.bf16.msra.mxu1 %v4371_v8 }
0x2043   :  { %3711 = vmatprep.subr.bf16.mxu1 %v4018_v0 }
0x2046   :  { %3712 = vmatpush3.bf16.msra.mxu1 %v4380_v10 }
0x2047   :  { %3717 = vmatprep.subr.bf16.mxu1 %v4018_v0 }
0x20f9   :  { %v2103_v44 = vpop.f32.mrf.mxu1 }
0x20fa   :  { %v2104_v6 = vadd.f32 %v4437_v39, %v2103_v44 }
0x20fb   :  { %v3687_v21 = vpop.f32.mrf.mxu1 }
0x20fc   :  { %2112 = vrot.lane.b32.xlu0 %v2104_v6, %s4022_s2  ;;  %3238 = vst [vmem:[%s5078_s16 + $0x6] sm:$0x3] %v2104_v6 }
0x20fd   :  { %v2106_v7 = vpop.f32.mrf.mxu1 }
0x20ff   :  { %v3688_v31 = vpop.f32.mrf.mxu1 }
0x216e   :  { %v2113_v22 = vpop.permute.xlu0 %2112 }
0x216f   :  { %vm2115_vm9 = vcmp.gt.f32.partialorder %v2104_v6, %v2113_v22 }
0x2170   :  { %v2117_v8 = vsel %vm2115_vm9, %v2104_v6, %v2113_v22  ;;  %v2116_v28 = vsel %vm2115_vm9, 1, %v4023_v48 }
0x2171   :  { %2119 = vrot.lane.b32.xlu1 %v2117_v8, %s4022_s2  ;;  %2123 = vrot.lane.b32.xlu0 %v2116_v28, %s4022_s2 }
0x21e3   :  { %v2120_v10 = vpop.permute.xlu1 %2119  ;;  %v2124_v39 = vpop.permute.xlu0 %2123 }
0x21e4   :  { %vm2122_vm10 = vcmp.gt.f32.partialorder %v2104_v6, %v2120_v10 }
0x21e5   :  { %v2125_v29 = vsel %vm2122_vm10, 2, %v2124_v39  ;;  %v2126_v30 = vsel %vm2122_vm10, %v2104_v6, %v2120_v10 }
0x21e6   :  { %2128 = vrot.lane.b32.xlu1 %v2126_v30, %s4022_s2  ;;  %2132 = vrot.lane.b32.xlu0 %v2125_v29, %s4022_s2 }
0x2258   :  { %v2129_v34 = vpop.permute.xlu1 %2128  ;;  %v2133_v35 = vpop.permute.xlu0 %2132 }
0x2259   :  { %vm2131_vm11 = vcmp.gt.f32.partialorder %v2104_v6, %v2129_v34  ;;  %v4794_v6 = vld [vmem:[%s5075_s13] ss:$0 sm:$0xff] }
0x225a   :  { %v2134_v37 = vsel %vm2131_vm11, 3, %v2133_v35 }
0x225b   :  { %vm2138_vm12 = vcmp.eq.s32.totalorder %v2134_v37, 1  ;;  %vm2135_vm13 = vcmp.eq.s32.totalorder %v2134_v37, 0  ;;  %vm2141_vm14 = vcmp.eq.s32.totalorder %v2134_v37, 2  ;;  %vm2144_vm2 = vcmp.eq.s32.totalorder %v2134_v37, 3 }
0x225c   :  { %v3240_v38 = vsel %vm2138_vm12, 1.0, %v4018_v0  ;;  %v3239_v40 = vsel %vm2135_vm13, 1.0, %v4018_v0  ;;  %v3241_v43 = vsel %vm2141_vm14, 1.0, %v4018_v0  ;;  %v3242_v15 = vsel %vm2144_vm2, 1.0, %v4018_v0 }
0x225d   :  { %2152 = vrot.lane.b32.xlu0 %v3240_v38, %s4024_s9  ;;  %2148 = vrot.lane.b32.xlu1 %v3239_v40, %s4025_s5 }
0x2261   :  { %2163 = vrot.lane.b32.xlu0 %v2162_v42, %s4024_s9  ;;  %2156 = vrot.lane.b32.xlu1 %v3241_v43, %s4026_s30 }
0x22cf   :  { %v2153_v5 = vpop.permute.xlu0 %2152  ;;  %v2149_v46 = vpop.permute.xlu1 %2148 }
0x22d0   :  { %v2159_v50 = vsel %vm119_vm1, %v2149_v46, %v2153_v5 }
0x22d3   :  { %v2157_v52 = vpop.permute.xlu1 %2156  ;;  %v2164_v53 = vpop.permute.xlu0 %2163 }
0x22d4   :  { %v2160_v47 = vsel %vm309_vm5, %v2159_v50, %v2157_v52  ;;  %v4822_v50 = vld [vmem:[%s5074_s12 + $0x10] sm:$0xff]   ;;  %v4829_v52 = vld [vmem:[%s5074_s12 + $0x8] sm:$0xff]  }
0x22d5   :  { %v2161_v60 = vsel %vm1381_vm15, %v2160_v47, %v3242_v15  ;;  %v4836_v15 = vld [vmem:[%s5074_s12] sm:$0xff]  }
0x22d6   :  { %v2166_v45 = vsel %vm1054_vm6, %v2161_v60, %v2164_v53  ;;  %v4843_v53 = vld [vmem:[%s5077_s15] ss:$0 sm:$0xff] }
0x22d7   :  { %v2167_v61 = vpack.c.bf16 %v2166_v45, %v2166_v45 }
0x22d9   :  { %3702 = vmatmul.mubr.msk.bf16.vlgmr.msra.gmra.mxu0 %vm1093_vm7, %v2167_v61 }
0x22da   :  { %3726 = vmatpush3.bf16.msra.mxu0 %v4634_v23  ;;  %3737 = vmatprep.mubr.msk.bf16.mxu0 %vm4019_vm0, %v4018_v0 }
0x22db   :  { %3727 = vmatprep.subr.bf16.mxu0 %v4018_v0 }
0x22de   :  { %3728 = vmatpush3.bf16.msra.mxu0 %v4643_v24 }
0x22df   :  { %3729 = vmatprep.subr.bf16.mxu0 %v4018_v0 }
0x22e2   :  { %3730 = vmatpush3.bf16.msra.mxu0 %v4650_v19 }
0x22e3   :  { %3731 = vmatprep.subr.bf16.mxu0 %v4018_v0 }
0x22e6   :  { %3732 = vmatpush3.bf16.msra.mxu0 %v4657_v25 }
0x22e7   :  { %3733 = vmatprep.subr.bf16.mxu0 %v4018_v0 }
0x22ea   :  { %3734 = vmatpush3.bf16.msra.mxu0 %v4664_v26 }
0x22eb   :  { %3735 = vmatprep.subr.bf16.mxu0 %v4018_v0 }
0x22ee   :  { %3736 = vmatpush3.bf16.msra.mxu0 %v4671_v27 }
0x22ef   :  { %3761 = vmatprep.subr.bf16.mxu0 %v4018_v0 }
0x2399   :  { %v2205_v17 = vpop.f32.mrf.mxu0 }
0x239a   :  { %v2211_v54 = vadd.f32 %v2205_v17, %v4348_v51 }
0x239b   :  { %v3703_v55 = vpop.f32.mrf.mxu0 }
0x239c   :  { %3940 = vtanh.f32 %v2211_v54  ;;  %v3244_v56 = vmul.f32 -1.442695, %v2211_v54 }
0x239d   :  { %v2208_v62 = vpop.f32.mrf.mxu0 }
0x239e   :  { %3942 = vpow2.f32 %v3244_v56 }
0x239f   :  { %v3704_v63 = vpop.f32.mrf.mxu0 }
0x23a9   :  { %v3941_v49 = vpop.eup %3940 }
0x23aa   :  { %2224 = vrot.lane.b32.xlu1 %v3941_v49, %s4020_s1 }
0x23ab   :  { %v3943_v1 = vpop.eup %3942 }
0x23ac   :  { %v2215_v2 = vadd.f32 1.0, %v3943_v1 }
0x23ae   :  { %3944 = vrcp.f32 %v2215_v2 }
0x23bb   :  { %v3945_v57 = vpop.eup %3944 }
0x23bc   :  { %v2222_v4 = vmul.f32 %v3945_v57, %v2220_v3 }
0x241c   :  { %v2225_v58 = vpop.permute.xlu1 %2224 }
0x241d   :  { %v2227_v32 = vmul.f32 %v3945_v57, %v2225_v58 }
0x241f   :  { %2229 = vrot.lane.b32.xlu0 %v2227_v32, %s4021_s10 }
0x2491   :  { %v2230_v59 = vpop.permute.xlu0 %2229 }
0x2492   :  { %v4763_v9 = vadd.f32 %v2230_v59, %v2222_v4 }
0x2494   :  { %3946 = vtanh.f32 %v4763_v9 }
0x24a1   :  { %v3947_v33 = vpop.eup %3946 }
0x24a2   :  { %2235 = vrot.lane.b32.xlu1 %v3947_v33, %s4020_s1 }
0x24a6   :  { %2244 = vrot.lane.b32.xlu1 %v4705_v12, %s4020_s1  ;;  %v4787_v12 = vld [vmem:[%s5076_s14] sm:$0xff]  }
0x2514   :  { %v2236_v11 = vpop.permute.xlu1 %2235 }
0x2515   :  { %v4769_v16 = vmul.f32 %v3945_v57, %v2236_v11 }
0x2517   :  { %2240 = vrot.lane.b32.xlu0 %v4769_v16, %s4021_s10 }
0x2518   :  { %v2245_v14 = vpop.permute.xlu1 %2244 }
0x2589   :  { %v2241_v36 = vpop.permute.xlu0 %2240 }
0x258a   :  { %v2247_v18 = vsel %vm309_vm5, %v2241_v36, %v2245_v14 }
0x258b   :  { %v2248_v20 = vpack.c.bf16 %v2247_v18, %v2247_v18 }
0x258d   :  { %3714 = vmatmul.mubr.msk.bf16.vlgmr.msra.gmra.mxu1 %vm1054_vm6, %v2248_v20 }
0x258e   :  { %3718 = vmatpush3.bf16.msra.mxu1 %v4778_v41  ;;  %3721 = vmatprep.mubr.msk.bf16.mxu1 %vm4019_vm0, %v4018_v0 }
0x258f   :  { %3719 = vmatprep.subr.bf16.mxu1 %v4018_v0 }
0x2592   :  { %3720 = vmatpush3.bf16.msra.mxu1 %v4787_v12 }
0x2593   :  { %3741 = vmatprep.subr.bf16.mxu1 %v4018_v0 }
0x264d   :  { %v2286_v44 = vpop.f32.mrf.mxu1 }
0x264e   :  { %v2287_v21 = vadd.f32 %v4794_v6, %v2286_v44 }
0x264f   :  { %v3715_v7 = vpop.f32.mrf.mxu1 }
0x2650   :  { %3948 = vtanh.f32 %v2287_v21  ;;  %v3246_v28 = vmul.f32 -1.442695, %v2287_v21 }
0x2651   :  { %v2289_v31 = vpop.f32.mrf.mxu1 }
0x2652   :  { %3950 = vpow2.f32 %v3246_v28 }
0x2653   :  { %v3716_v22 = vpop.f32.mrf.mxu1 }
0x265d   :  { %v3949_v8 = vpop.eup %3948 }
0x265e   :  { %2301 = vrot.lane.b32.xlu0 %v3949_v8, %s4020_s1 }
0x265f   :  { %v3951_v10 = vpop.eup %3950 }
0x2660   :  { %v2295_v39 = vadd.f32 1.0, %v3951_v10 }
0x2662   :  { %3952 = vrcp.f32 %v2295_v39 }
0x266f   :  { %v3953_v29 = vpop.eup %3952 }
0x2670   :  { %v2299_v35 = vmul.f32 %v3953_v29, %v4701_v13  ;;  %v4813_v13 = vld [vmem:[%s5074_s12 + $0x18] sm:$0xff]  }
0x26d0   :  { %v2302_v30 = vpop.permute.xlu0 %2301 }
0x26d1   :  { %v2304_v34 = vmul.f32 %v3953_v29, %v2302_v30 }
0x26d3   :  { %2306 = vrot.lane.b32.xlu1 %v2304_v34, %s4021_s10 }
0x2745   :  { %v2307_v37 = vpop.permute.xlu1 %2306 }
0x2746   :  { %v4800_v38 = vadd.f32 %v2307_v37, %v2299_v35 }
0x2748   :  { %3954 = vtanh.f32 %v4800_v38 }
0x2755   :  { %v3955_v40 = vpop.eup %3954 }
0x2756   :  { %2312 = vrot.lane.b32.xlu0 %v3955_v40, %s4020_s1 }
0x27c8   :  { %v2313_v42 = vpop.permute.xlu0 %2312 }
0x27c9   :  { %v4804_v43 = vmul.f32 %v3953_v29, %v2313_v42  ;;  %v2476_v42 = vrot.slane %v4763_v9, 6 }
0x27cb   :  { %v2316_v5 = vpack.c.bf16 %v4804_v43, %v4804_v43 }
0x27cd   :  { %2318 = vrot.lane.b32.xlu1 %v2316_v5, %s4021_s10 }
0x283f   :  { %v2319_v46 = vpop.permute.xlu1 %2318 }
0x2840   :  { %3722 = vmatmul.mubr.msk.bf16.vlgmr.msra.gmra.mxu1 %vm309_vm5, %v2319_v46 }
0x2841   :  { %3742 = vmatpush3.bf16.msra.mxu1 %v4813_v13  ;;  %3749 = vmatprep.mubr.msk.bf16.mxu1 %vm4019_vm0, %v4018_v0 }
0x2842   :  { %3743 = vmatprep.subr.bf16.mxu1 %v4018_v0 }
0x2845   :  { %3744 = vmatpush3.bf16.msra.mxu1 %v4822_v50 }
0x2846   :  { %3745 = vmatprep.subr.bf16.mxu1 %v4018_v0 }
0x2849   :  { %3746 = vmatpush3.bf16.msra.mxu1 %v4829_v52 }
0x284a   :  { %3747 = vmatprep.subr.bf16.mxu1 %v4018_v0 }
0x284d   :  { %3748 = vmatpush3.bf16.msra.mxu1 %v4836_v15 }
0x284e   :  { %3753 = vmatprep.subr.bf16.mxu1 %v4018_v0 }
0x2900   :  { %v2357_v47 = vpop.f32.mrf.mxu1 }
0x2901   :  { %v2358_v60 = vadd.f32 %v4843_v53, %v2357_v47 }
0x2902   :  { %v3723_v45 = vpop.f32.mrf.mxu1 }
0x2903   :  { %2366 = vrot.lane.b32.xlu0 %v2358_v60, %s4022_s2  ;;  %3248 = vst [vmem:[%s5078_s16 + $0x8] sm:$0x3] %v2358_v60  ;;  %v2500_v45 = vrot.slane %v4804_v43, 6 }
0x2904   :  { %v2360_v61 = vpop.f32.mrf.mxu1 }
0x2906   :  { %v3724_v17 = vpop.f32.mrf.mxu1 }
0x2975   :  { %v2367_v54 = vpop.permute.xlu0 %2366 }
0x2976   :  { %vm2369_vm3 = vcmp.gt.f32.partialorder %v2358_v60, %v2367_v54 }
0x2977   :  { %v2371_v55 = vsel %vm2369_vm3, %v2358_v60, %v2367_v54  ;;  %v2370_v62 = vsel %vm2369_vm3, 1, %v4023_v48 }
0x2978   :  { %2373 = vrot.lane.b32.xlu1 %v2371_v55, %s4022_s2  ;;  %2377 = vrot.lane.b32.xlu0 %v2370_v62, %s4022_s2 }
0x29ea   :  { %v2374_v63 = vpop.permute.xlu1 %2373  ;;  %v2378_v49 = vpop.permute.xlu0 %2377 }
0x29eb   :  { %vm2376_vm4 = vcmp.gt.f32.partialorder %v2358_v60, %v2374_v63 }
0x29ec   :  { %v2379_v56 = vsel %vm2376_vm4, 2, %v2378_v49  ;;  %v2380_v1 = vsel %vm2376_vm4, %v2358_v60, %v2374_v63 }
0x29ed   :  { %2382 = vrot.lane.b32.xlu1 %v2380_v1, %s4022_s2  ;;  %2386 = vrot.lane.b32.xlu0 %v2379_v56, %s4022_s2 }
0x2a5f   :  { %v2383_v2 = vpop.permute.xlu1 %2382  ;;  %v2387_v57 = vpop.permute.xlu0 %2386 }
0x2a60   :  { %vm2385_vm8 = vcmp.gt.f32.partialorder %v2358_v60, %v2383_v2 }
0x2a61   :  { %v2388_v58 = vsel %vm2385_vm8, 3, %v2387_v57 }
0x2a62   :  { %vm2392_vm9 = vcmp.eq.s32.totalorder %v2388_v58, 1  ;;  %vm2389_vm10 = vcmp.eq.s32.totalorder %v2388_v58, 0  ;;  %vm2395_vm11 = vcmp.eq.s32.totalorder %v2388_v58, 2  ;;  %vm2398_vm12 = vcmp.eq.s32.totalorder %v2388_v58, 3 }
0x2a63   :  { %v3250_v32 = vsel %vm2392_vm9, 1.0, %v4018_v0  ;;  %v3249_v3 = vsel %vm2389_vm10, 1.0, %v4018_v0  ;;  %v3251_v4 = vsel %vm2395_vm11, 1.0, %v4018_v0  ;;  %v3252_v36 = vsel %vm2398_vm12, 1.0, %v4018_v0 }
0x2a64   :  { %2406 = vrot.lane.b32.xlu0 %v3250_v32, %s4024_s9  ;;  %2402 = vrot.lane.b32.xlu1 %v3249_v3, %s4025_s5 }
0x2a68   :  { %2416 = vrot.lane.b32.xlu0 %v4769_v16, %s4024_s9  ;;  %2410 = vrot.lane.b32.xlu1 %v3251_v4, %s4026_s30 }
0x2ad6   :  { %v2407_v59 = vpop.permute.xlu0 %2406  ;;  %v2403_v33 = vpop.permute.xlu1 %2402 }
0x2ad7   :  { %v2413_v11 = vsel %vm119_vm1, %v2403_v33, %v2407_v59 }
0x2ada   :  { %v2411_v14 = vpop.permute.xlu1 %2410  ;;  %v2417_v20 = vpop.permute.xlu0 %2416 }
0x2adb   :  { %v2414_v18 = vsel %vm309_vm5, %v2413_v11, %v2411_v14 }
0x2adc   :  { %v2415_v44 = vsel %vm1381_vm15, %v2414_v18, %v3252_v36 }
0x2add   :  { %v2419_v21 = vsel %vm1054_vm6, %v2415_v44, %v2417_v20 }
0x2ade   :  { %v2420_v7 = vpack.c.bf16 %v2419_v21, %v2419_v21 }
0x2ae0   :  { %3738 = vmatmul.mubr.msk.bf16.vlgmr.msra.gmra.mxu0 %vm1093_vm7, %v2420_v7 }
0x2ae1   :  { %3762 = vmatpush3.bf16.msra.mxu0 %v4634_v23  ;;  %3773 = vmatprep.mubr.msk.bf16.mxu0 %vm4019_vm0, %v4018_v0 }
0x2ae2   :  { %3763 = vmatprep.subr.bf16.mxu0 %v4018_v0 }
0x2ae5   :  { %3764 = vmatpush3.bf16.msra.mxu0 %v4643_v24 }
0x2ae6   :  { %3765 = vmatprep.subr.bf16.mxu0 %v4018_v0 }
0x2ae9   :  { %3766 = vmatpush3.bf16.msra.mxu0 %v4650_v19 }
0x2aea   :  { %3767 = vmatprep.subr.bf16.mxu0 %v4018_v0 }
0x2aed   :  { %3768 = vmatpush3.bf16.msra.mxu0 %v4657_v25 }
0x2aee   :  { %3769 = vmatprep.subr.bf16.mxu0 %v4018_v0 }
0x2af1   :  { %3770 = vmatpush3.bf16.msra.mxu0 %v4664_v26 }
0x2af2   :  { %3771 = vmatprep.subr.bf16.mxu0 %v4018_v0 }
0x2af5   :  { %3772 = vmatpush3.bf16.msra.mxu0 %v4671_v27 }
0x2af6   :  { %3797 = vmatprep.subr.bf16.mxu0 %v4018_v0 }
0x2ba0   :  { %v2458_v16 = vpop.f32.mrf.mxu0 }
0x2ba1   :  { %v2465_v31 = vrot.slane %v2458_v16, 6 }
0x2ba2   :  { %v3739_v22 = vpop.f32.mrf.mxu0 }
0x2ba3   :  { %v2467_v8 = vadd.f32 %v2465_v31, %v4348_v51 }
0x2ba4   :  { %v2461_v28 = vpop.f32.mrf.mxu0 }
0x2ba5   :  { %3956 = vtanh.f32 %v2467_v8  ;;  %v3254_v29 = vmul.f32 -1.442695, %v2467_v8 }
0x2ba6   :  { %v3740_v10 = vpop.f32.mrf.mxu0 }
0x2ba7   :  { %3958 = vpow2.f32 %v3254_v29 }
0x2bb2   :  { %v3957_v39 = vpop.eup %3956 }
0x2bb3   :  { %2480 = vrot.lane.b32.xlu1 %v3957_v39, %s4020_s1 }
0x2bb4   :  { %v3959_v30 = vpop.eup %3958 }
0x2bb5   :  { %v2471_v34 = vadd.f32 1.0, %v3959_v30 }
0x2bb7   :  { %3960 = vrcp.f32 %v2471_v34 }
0x2bc4   :  { %v3961_v35 = vpop.eup %3960 }
0x2bc5   :  { %v2478_v5 = vmul.f32 %v3961_v35, %v2476_v42 }
0x2c25   :  { %v2481_v37 = vpop.permute.xlu1 %2480 }
0x2c26   :  { %v2483_v40 = vmul.f32 %v3961_v35, %v2481_v37 }
0x2c28   :  { %2485 = vrot.lane.b32.xlu0 %v2483_v40, %s4021_s10 }
0x2c9a   :  { %v2486_v46 = vpop.permute.xlu0 %2485 }
0x2c9b   :  { %v4887_v47 = vadd.f32 %v2486_v46, %v2478_v5 }
0x2c9d   :  { %3962 = vtanh.f32 %v4887_v47 }
0x2caa   :  { %v3963_v60 = vpop.eup %3962 }
0x2cab   :  { %2491 = vrot.lane.b32.xlu1 %v3963_v60, %s4020_s1 }
0x2caf   :  { %2501 = vrot.lane.b32.xlu1 %v2500_v45, %s4020_s1 }
0x2d1d   :  { %v2492_v61 = vpop.permute.xlu1 %2491 }
0x2d1e   :  { %v4893_v17 = vmul.f32 %v3961_v35, %v2492_v61 }
0x2d20   :  { %2496 = vrot.lane.b32.xlu0 %v4893_v17, %s4021_s10  ;;  %v2675_v60 = vrot.slane %v4893_v17, 2 }
0x2d21   :  { %v2502_v9 = vpop.permute.xlu1 %2501 }
0x2d92   :  { %v2497_v54 = vpop.permute.xlu0 %2496 }
0x2d93   :  { %v2504_v55 = vsel %vm309_vm5, %v2497_v54, %v2502_v9 }
0x2d94   :  { %v2505_v62 = vpack.c.bf16 %v2504_v55, %v2504_v55 }
0x2d96   :  { %v2507_v63 = vrot.slane %v2505_v62, 1 }
0x2d98   :  { %3750 = vmatmul.mubr.msk.bf16.vlgmr.msra.gmra.mxu1 %vm1054_vm6, %v2507_v63 }
0x2d99   :  { %3754 = vmatpush3.bf16.msra.mxu1 %v4778_v41  ;;  %3757 = vmatprep.mubr.msk.bf16.mxu1 %vm4019_vm0, %v4018_v0 }
0x2d9a   :  { %3755 = vmatprep.subr.bf16.mxu1 %v4018_v0 }
0x2d9d   :  { %3756 = vmatpush3.bf16.msra.mxu1 %v4787_v12 }
0x2d9e   :  { %3777 = vmatprep.subr.bf16.mxu1 %v4018_v0 }
0x2e58   :  { %v2545_v43 = vpop.f32.mrf.mxu1 }
0x2e59   :  { %v2546_v49 = vadd.f32 %v4794_v6, %v2545_v43 }
0x2e5a   :  { %v3751_v56 = vpop.f32.mrf.mxu1 }
0x2e5b   :  { %3964 = vtanh.f32 %v2546_v49  ;;  %v3256_v58 = vmul.f32 -1.442695, %v2546_v49 }
0x2e5c   :  { %v2548_v1 = vpop.f32.mrf.mxu1 }
0x2e5d   :  { %3966 = vpow2.f32 %v3256_v58 }
0x2e5e   :  { %v3752_v2 = vpop.f32.mrf.mxu1 }
0x2e68   :  { %v3965_v57 = vpop.eup %3964 }
0x2e69   :  { %2560 = vrot.lane.b32.xlu0 %v3965_v57, %s4020_s1 }
0x2e6a   :  { %v3967_v32 = vpop.eup %3966 }
0x2e6b   :  { %v2554_v3 = vadd.f32 1.0, %v3967_v32 }
0x2e6d   :  { %3968 = vrcp.f32 %v2554_v3 }
0x2e7a   :  { %v3969_v4 = vpop.eup %3968 }
0x2e7b   :  { %v2558_v11 = vmul.f32 %v3969_v4, %v4800_v38 }
0x2edb   :  { %v2561_v59 = vpop.permute.xlu0 %2560 }
0x2edc   :  { %v2563_v33 = vmul.f32 %v3969_v4, %v2561_v59 }
0x2ede   :  { %2565 = vrot.lane.b32.xlu1 %v2563_v33, %s4021_s10 }
0x2f50   :  { %v2566_v14 = vpop.permute.xlu1 %2565 }
0x2f51   :  { %v4909_v36 = vadd.f32 %v2566_v14, %v2558_v11 }
0x2f53   :  { %3970 = vtanh.f32 %v4909_v36 }
0x2f60   :  { %v3971_v18 = vpop.eup %3970 }
0x2f61   :  { %2571 = vrot.lane.b32.xlu0 %v3971_v18, %s4020_s1 }
0x2fd3   :  { %v2572_v20 = vpop.permute.xlu0 %2571 }
0x2fd4   :  { %v4913_v44 = vmul.f32 %v3969_v4, %v2572_v20 }
0x2fd6   :  { %v2575_v21 = vpack.c.bf16 %v4913_v44, %v4913_v44  ;;  %v2760_v20 = vrot.slane %v4913_v44, 4 }
0x2fd8   :  { %2577 = vrot.lane.b32.xlu1 %v2575_v21, %s4021_s10 }
0x304a   :  { %v2578_v7 = vpop.permute.xlu1 %2577 }
0x304b   :  { %3758 = vmatmul.mubr.msk.bf16.vlgmr.msra.gmra.mxu1 %vm309_vm5, %v2578_v7 }
0x304c   :  { %3778 = vmatpush3.bf16.msra.mxu1 %v4813_v13  ;;  %3785 = vmatprep.mubr.msk.bf16.mxu1 %vm4019_vm0, %v4018_v0 }
0x304d   :  { %3779 = vmatprep.subr.bf16.mxu1 %v4018_v0 }
0x3050   :  { %3780 = vmatpush3.bf16.msra.mxu1 %v4822_v50 }
0x3051   :  { %3781 = vmatprep.subr.bf16.mxu1 %v4018_v0 }
0x3054   :  { %3782 = vmatpush3.bf16.msra.mxu1 %v4829_v52 }
0x3055   :  { %3783 = vmatprep.subr.bf16.mxu1 %v4018_v0 }
0x3058   :  { %3784 = vmatpush3.bf16.msra.mxu1 %v4836_v15 }
0x3059   :  { %3789 = vmatprep.subr.bf16.mxu1 %v4018_v0 }
0x310b   :  { %v2616_v38 = vpop.f32.mrf.mxu1 }
0x310c   :  { %v2617_v16 = vadd.f32 %v4843_v53, %v2616_v38 }
0x310d   :  { %v3759_v31 = vpop.f32.mrf.mxu1 }
0x310e   :  { %2625 = vrot.lane.b32.xlu0 %v2617_v16, %s4022_s2  ;;  %3258 = vst [vmem:[%s5078_s16 + $0xa] sm:$0x3] %v2617_v16 }
0x310f   :  { %v2619_v22 = vpop.f32.mrf.mxu1 }
0x3111   :  { %v3760_v8 = vpop.f32.mrf.mxu1 }
0x3180   :  { %v2626_v28 = vpop.permute.xlu0 %2625 }
0x3181   :  { %vm2628_vm13 = vcmp.gt.f32.partialorder %v2617_v16, %v2626_v28 }
0x3182   :  { %v2629_v10 = vsel %vm2628_vm13, 1, %v4023_v48  ;;  %v2630_v39 = vsel %vm2628_vm13, %v2617_v16, %v2626_v28 }
0x3183   :  { %2632 = vrot.lane.b32.xlu1 %v2630_v39, %s4022_s2  ;;  %2636 = vrot.lane.b32.xlu0 %v2629_v10, %s4022_s2 }
0x31f5   :  { %v2633_v29 = vpop.permute.xlu1 %2632  ;;  %v2637_v30 = vpop.permute.xlu0 %2636 }
0x31f6   :  { %vm2635_vm14 = vcmp.gt.f32.partialorder %v2617_v16, %v2633_v29 }
0x31f7   :  { %v2638_v34 = vsel %vm2635_vm14, 2, %v2637_v30  ;;  %v2639_v35 = vsel %vm2635_vm14, %v2617_v16, %v2633_v29 }
0x31f8   :  { %2641 = vrot.lane.b32.xlu1 %v2639_v35, %s4022_s2  ;;  %2645 = vrot.lane.b32.xlu0 %v2638_v34, %s4022_s2 }
0x326a   :  { %v2642_v37 = vpop.permute.xlu1 %2641  ;;  %v2646_v40 = vpop.permute.xlu0 %2645 }
0x326b   :  { %vm2644_vm2 = vcmp.gt.f32.partialorder %v2617_v16, %v2642_v37 }
0x326c   :  { %v2647_v42 = vsel %vm2644_vm2, 3, %v2646_v40 }
0x326d   :  { %vm2651_vm3 = vcmp.eq.s32.totalorder %v2647_v42, 1  ;;  %vm2648_vm4 = vcmp.eq.s32.totalorder %v2647_v42, 0  ;;  %vm2654_vm8 = vcmp.eq.s32.totalorder %v2647_v42, 2  ;;  %vm2657_vm9 = vcmp.eq.s32.totalorder %v2647_v42, 3 }
0x326e   :  { %v3260_v5 = vsel %vm2651_vm3, 1.0, %v4018_v0  ;;  %v3259_v46 = vsel %vm2648_vm4, 1.0, %v4018_v0  ;;  %v3261_v45 = vsel %vm2654_vm8, 1.0, %v4018_v0  ;;  %v3262_v62 = vsel %vm2657_vm9, 1.0, %v4018_v0 }
0x326f   :  { %2665 = vrot.lane.b32.xlu0 %v3260_v5, %s4024_s9  ;;  %2661 = vrot.lane.b32.xlu1 %v3259_v46, %s4025_s5 }
0x3273   :  { %2676 = vrot.lane.b32.xlu0 %v2675_v60, %s4024_s9  ;;  %2669 = vrot.lane.b32.xlu1 %v3261_v45, %s4026_s30 }
0x32e1   :  { %v2666_v61 = vpop.permute.xlu0 %2665  ;;  %v2662_v9 = vpop.permute.xlu1 %2661 }
0x32e2   :  { %v2672_v54 = vsel %vm119_vm1, %v2662_v9, %v2666_v61 }
0x32e5   :  { %v2670_v55 = vpop.permute.xlu1 %2669  ;;  %v2677_v43 = vpop.permute.xlu0 %2676 }
0x32e6   :  { %v2673_v63 = vsel %vm309_vm5, %v2672_v54, %v2670_v55 }
0x32e7   :  { %v2674_v49 = vsel %vm1381_vm15, %v2673_v63, %v3262_v62 }
0x32e8   :  { %v2679_v17 = vsel %vm1054_vm6, %v2674_v49, %v2677_v43 }
0x32e9   :  { %v2680_v56 = vpack.c.bf16 %v2679_v17, %v2679_v17 }
0x32eb   :  { %3774 = vmatmul.mubr.msk.bf16.vlgmr.msra.gmra.mxu0 %vm1093_vm7, %v2680_v56 }
0x32ec   :  { %3798 = vmatpush3.bf16.msra.mxu0 %v4634_v23  ;;  %3809 = vmatprep.mubr.msk.bf16.mxu0 %vm4019_vm0, %v4018_v0 }
0x32ed   :  { %3799 = vmatprep.subr.bf16.mxu0 %v4018_v0 }
0x32f0   :  { %3800 = vmatpush3.bf16.msra.mxu0 %v4643_v24 }
0x32f1   :  { %3801 = vmatprep.subr.bf16.mxu0 %v4018_v0 }
0x32f4   :  { %3802 = vmatpush3.bf16.msra.mxu0 %v4650_v19 }
0x32f5   :  { %3803 = vmatprep.subr.bf16.mxu0 %v4018_v0 }
0x32f8   :  { %3804 = vmatpush3.bf16.msra.mxu0 %v4657_v25 }
0x32f9   :  { %3805 = vmatprep.subr.bf16.mxu0 %v4018_v0 }
0x32fc   :  { %3806 = vmatpush3.bf16.msra.mxu0 %v4664_v26 }
0x32fd   :  { %3807 = vmatprep.subr.bf16.mxu0 %v4018_v0 }
0x3300   :  { %3808 = vmatpush3.bf16.msra.mxu0 %v4671_v27  ;;  %v2736_v27 = vrot.slane %v4887_v47, 6 }
0x33ab   :  { %v2718_v23 = vpop.f32.mrf.mxu0 }
0x33ac   :  { %v2725_v1 = vrot.slane %v2718_v23, 4 }
0x33ad   :  { %v3775_v2 = vpop.f32.mrf.mxu0 }
0x33ae   :  { %v2727_v24 = vadd.f32 %v2725_v1, %v4348_v51 }
0x33af   :  { %v2721_v57 = vpop.f32.mrf.mxu0 }
0x33b0   :  { %3972 = vtanh.f32 %v2727_v24  ;;  %v3264_v25 = vmul.f32 -1.442695, %v2727_v24 }
0x33b1   :  { %v3776_v19 = vpop.f32.mrf.mxu0 }
0x33b2   :  { %3974 = vpow2.f32 %v3264_v25 }
0x33bd   :  { %v3973_v58 = vpop.eup %3972 }
0x33be   :  { %2740 = vrot.lane.b32.xlu1 %v3973_v58, %s4020_s1 }
0x33bf   :  { %v3975_v32 = vpop.eup %3974 }
0x33c0   :  { %v2731_v3 = vadd.f32 1.0, %v3975_v32 }
0x33c2   :  { %3976 = vrcp.f32 %v2731_v3 }
0x33cf   :  { %v3977_v26 = vpop.eup %3976 }
0x33d0   :  { %v2738_v33 = vmul.f32 %v3977_v26, %v2736_v27 }
0x3430   :  { %v2741_v4 = vpop.permute.xlu1 %2740 }
0x3431   :  { %v2743_v59 = vmul.f32 %v3977_v26, %v2741_v4 }
0x3433   :  { %2745 = vrot.lane.b32.xlu0 %v2743_v59, %s4021_s10 }
0x34a5   :  { %v2746_v11 = vpop.permute.xlu0 %2745 }
0x34a6   :  { %v4970_v14 = vadd.f32 %v2746_v11, %v2738_v33 }
0x34a8   :  { %3978 = vtanh.f32 %v4970_v14 }
0x34b5   :  { %v3979_v18 = vpop.eup %3978 }
0x34b6   :  { %2751 = vrot.lane.b32.xlu1 %v3979_v18, %s4020_s1 }
0x34ba   :  { %2761 = vrot.lane.b32.xlu1 %v2760_v20, %s4020_s1 }
0x3528   :  { %v2752_v21 = vpop.permute.xlu1 %2751 }
0x3529   :  { %v4976_v7 = vmul.f32 %v3977_v26, %v2752_v21 }
0x352b   :  { %2756 = vrot.lane.b32.xlu0 %v4976_v7, %s4021_s10  ;;  %v2935_v19 = vrot.slane %v4976_v7, 4 }
0x352c   :  { %v2762_v47 = vpop.permute.xlu1 %2761 }
0x359d   :  { %v2757_v38 = vpop.permute.xlu0 %2756 }
0x359e   :  { %v2764_v16 = vsel %vm309_vm5, %v2757_v38, %v2762_v47 }
0x359f   :  { %v2765_v31 = vpack.c.bf16 %v2764_v16, %v2764_v16 }
0x35a1   :  { %v2767_v22 = vrot.slane %v2765_v31, 2 }
0x35a3   :  { %3786 = vmatmul.mubr.msk.bf16.vlgmr.msra.gmra.mxu1 %vm1054_vm6, %v2767_v22 }
0x35a4   :  { %3790 = vmatpush3.bf16.msra.mxu1 %v4778_v41  ;;  %3793 = vmatprep.mubr.msk.bf16.mxu1 %vm4019_vm0, %v4018_v0 }
0x35a5   :  { %3791 = vmatprep.subr.bf16.mxu1 %v4018_v0 }
0x35a8   :  { %3792 = vmatpush3.bf16.msra.mxu1 %v4787_v12 }
0x35a9   :  { %3813 = vmatprep.subr.bf16.mxu1 %v4018_v0 }
0x3663   :  { %v2805_v44 = vpop.f32.mrf.mxu1 }
0x3664   :  { %v2806_v8 = vadd.f32 %v4794_v6, %v2805_v44 }
0x3665   :  { %v3787_v28 = vpop.f32.mrf.mxu1 }
0x3666   :  { %3980 = vtanh.f32 %v2806_v8  ;;  %v3266_v30 = vmul.f32 -1.442695, %v2806_v8 }
0x3667   :  { %v2808_v10 = vpop.f32.mrf.mxu1 }
0x3668   :  { %3982 = vpow2.f32 %v3266_v30 }
0x3669   :  { %v3788_v39 = vpop.f32.mrf.mxu1 }
0x3673   :  { %v3981_v29 = vpop.eup %3980 }
0x3674   :  { %2820 = vrot.lane.b32.xlu0 %v3981_v29, %s4020_s1  ;;  %v2996_v29 = vrot.slane %v4970_v14, 6 }
0x3675   :  { %v3983_v34 = vpop.eup %3982 }
0x3676   :  { %v2814_v35 = vadd.f32 1.0, %v3983_v34 }
0x3678   :  { %3984 = vrcp.f32 %v2814_v35 }
0x3685   :  { %v3985_v37 = vpop.eup %3984 }
0x3686   :  { %v2818_v5 = vmul.f32 %v3985_v37, %v4909_v36 }
0x36e6   :  { %v2821_v40 = vpop.permute.xlu0 %2820 }
0x36e7   :  { %v2823_v42 = vmul.f32 %v3985_v37, %v2821_v40 }
0x36e9   :  { %2825 = vrot.lane.b32.xlu1 %v2823_v42, %s4021_s10 }
0x375b   :  { %v2826_v46 = vpop.permute.xlu1 %2825 }
0x375c   :  { %v4992_v60 = vadd.f32 %v2826_v46, %v2818_v5 }
0x375e   :  { %3986 = vtanh.f32 %v4992_v60 }
0x376b   :  { %v3987_v45 = vpop.eup %3986 }
0x376c   :  { %2831 = vrot.lane.b32.xlu0 %v3987_v45, %s4020_s1 }
0x37de   :  { %v2832_v61 = vpop.permute.xlu0 %2831 }
0x37df   :  { %v4996_v9 = vmul.f32 %v3985_v37, %v2832_v61 }
0x37e1   :  { %v2835_v54 = vpack.c.bf16 %v4996_v9, %v4996_v9  ;;  %v3020_v37 = vrot.slane %v4996_v9, 2 }
0x37e3   :  { %2837 = vrot.lane.b32.xlu1 %v2835_v54, %s4021_s10 }
0x3855   :  { %v2838_v55 = vpop.permute.xlu1 %2837 }
0x3856   :  { %3794 = vmatmul.mubr.msk.bf16.vlgmr.msra.gmra.mxu1 %vm309_vm5, %v2838_v55 }
0x3857   :  { %3814 = vmatpush3.bf16.msra.mxu1 %v4813_v13  ;;  %3821 = vmatprep.mubr.msk.bf16.mxu1 %vm4019_vm0, %v4018_v0 }
0x3858   :  { %3815 = vmatprep.subr.bf16.mxu1 %v4018_v0 }
0x385b   :  { %3816 = vmatpush3.bf16.msra.mxu1 %v4822_v50 }
0x385c   :  { %3817 = vmatprep.subr.bf16.mxu1 %v4018_v0 }
0x385f   :  { %3818 = vmatpush3.bf16.msra.mxu1 %v4829_v52 }
0x3860   :  { %3819 = vmatprep.subr.bf16.mxu1 %v4018_v0 }
0x3863   :  { %3820 = vmatpush3.bf16.msra.mxu1 %v4836_v15 }
0x3864   :  { %3825 = vmatprep.subr.bf16.mxu1 %v4018_v0 }
0x3916   :  { %v2876_v36 = vpop.f32.mrf.mxu1 }
0x3917   :  { %v2877_v13 = vadd.f32 %v4843_v53, %v2876_v36 }
0x3918   :  { %v3795_v62 = vpop.f32.mrf.mxu1 }
0x3919   :  { %2885 = vrot.lane.b32.xlu0 %v2877_v13, %s4022_s2  ;;  %3268 = vst [vmem:[%s5078_s16 + $0xc] sm:$0x3] %v2877_v13 }
0x391a   :  { %v2879_v50 = vpop.f32.mrf.mxu1 }
0x391c   :  { %v3796_v63 = vpop.f32.mrf.mxu1 }
0x398b   :  { %v2886_v43 = vpop.permute.xlu0 %2885 }
0x398c   :  { %vm2888_vm10 = vcmp.gt.f32.partialorder %v2877_v13, %v2886_v43 }
0x398d   :  { %v2889_v52 = vsel %vm2888_vm10, 1, %v4023_v48  ;;  %v2890_v49 = vsel %vm2888_vm10, %v2877_v13, %v2886_v43 }
0x398e   :  { %2892 = vrot.lane.b32.xlu1 %v2890_v49, %s4022_s2  ;;  %2896 = vrot.lane.b32.xlu0 %v2889_v52, %s4022_s2 }
0x3a00   :  { %v2893_v15 = vpop.permute.xlu1 %2892  ;;  %v2897_v17 = vpop.permute.xlu0 %2896 }
0x3a01   :  { %vm2895_vm11 = vcmp.gt.f32.partialorder %v2877_v13, %v2893_v15 }
0x3a02   :  { %v2898_v56 = vsel %vm2895_vm11, 2, %v2897_v17  ;;  %v2899_v23 = vsel %vm2895_vm11, %v2877_v13, %v2893_v15 }
0x3a03   :  { %2901 = vrot.lane.b32.xlu1 %v2899_v23, %s4022_s2  ;;  %2905 = vrot.lane.b32.xlu0 %v2898_v56, %s4022_s2 }
0x3a75   :  { %v2902_v1 = vpop.permute.xlu1 %2901  ;;  %v2906_v2 = vpop.permute.xlu0 %2905 }
0x3a76   :  { %vm2904_vm12 = vcmp.gt.f32.partialorder %v2877_v13, %v2902_v1 }
0x3a77   :  { %v2907_v24 = vsel %vm2904_vm12, 3, %v2906_v2 }
0x3a78   :  { %vm2911_vm13 = vcmp.eq.s32.totalorder %v2907_v24, 1  ;;  %vm2908_vm14 = vcmp.eq.s32.totalorder %v2907_v24, 0  ;;  %vm2914_vm2 = vcmp.eq.s32.totalorder %v2907_v24, 2  ;;  %vm2917_vm3 = vcmp.eq.s32.totalorder %v2907_v24, 3 }
0x3a79   :  { %v3270_v48 = vsel %vm2911_vm13, 1.0, %v4018_v0  ;;  %v3269_v57 = vsel %vm2908_vm14, 1.0, %v4018_v0  ;;  %v3271_v58 = vsel %vm2914_vm2, 1.0, %v4018_v0  ;;  %v3272_v4 = vsel %vm2917_vm3, 1.0, %v4018_v0 }
0x3a7a   :  { %2925 = vrot.lane.b32.xlu0 %v3270_v48, %s4024_s9  ;;  %2921 = vrot.lane.b32.xlu1 %v3269_v57, %s4025_s5 }
0x3a7e   :  { %2936 = vrot.lane.b32.xlu0 %v2935_v19, %s4024_s9  ;;  %2929 = vrot.lane.b32.xlu1 %v3271_v58, %s4026_s30 }
0x3aec   :  { %v2926_v25 = vpop.permute.xlu0 %2925  ;;  %v2922_v32 = vpop.permute.xlu1 %2921 }
0x3aed   :  { %v2932_v3 = vsel %vm119_vm1, %v2922_v32, %v2926_v25 }
0x3af0   :  { %v2930_v26 = vpop.permute.xlu1 %2929  ;;  %v2937_v27 = vpop.permute.xlu0 %2936 }
0x3af1   :  { %v2933_v59 = vsel %vm309_vm5, %v2932_v3, %v2930_v26 }
0x3af2   :  { %v2934_v33 = vsel %vm1381_vm15, %v2933_v59, %v3272_v4 }
0x3af3   :  { %v2939_v11 = vsel %vm1054_vm6, %v2934_v33, %v2937_v27 }
0x3af4   :  { %v2940_v18 = vpack.c.bf16 %v2939_v11, %v2939_v11 }
0x3af6   :  { %3810 = vmatmul.mubr.msk.bf16.vlgmr.msra.gmra.mxu0 %vm1093_vm7, %v2940_v18 }
0x3bb6   :  { %v2978_v20 = vpop.f32.mrf.mxu0 }
0x3bb7   :  { %v2985_v21 = vrot.slane %v2978_v20, 2 }
0x3bb8   :  { %v3811_v7 = vpop.f32.mrf.mxu0 }
0x3bb9   :  { %v2987_v47 = vadd.f32 %v2985_v21, %v4348_v51 }
0x3bba   :  { %v2981_v38 = vpop.f32.mrf.mxu0 }
0x3bbb   :  { %3988 = vtanh.f32 %v2987_v47  ;;  %v3274_v22 = vmul.f32 -1.442695, %v2987_v47 }
0x3bbc   :  { %v3812_v16 = vpop.f32.mrf.mxu0 }
0x3bbd   :  { %3990 = vpow2.f32 %v3274_v22 }
0x3bc8   :  { %v3989_v31 = vpop.eup %3988 }
0x3bc9   :  { %3000 = vrot.lane.b32.xlu1 %v3989_v31, %s4020_s1 }
0x3bca   :  { %v3991_v44 = vpop.eup %3990 }
0x3bcb   :  { %v2991_v8 = vadd.f32 1.0, %v3991_v44 }
0x3bcd   :  { %3992 = vrcp.f32 %v2991_v8 }
0x3bda   :  { %v3993_v28 = vpop.eup %3992 }
0x3bdb   :  { %v2998_v30 = vmul.f32 %v3993_v28, %v2996_v29 }
0x3c3b   :  { %v3001_v10 = vpop.permute.xlu1 %3000 }
0x3c3c   :  { %v3003_v39 = vmul.f32 %v3993_v28, %v3001_v10 }
0x3c3e   :  { %3005 = vrot.lane.b32.xlu0 %v3003_v39, %s4021_s10 }
0x3cb0   :  { %v3006_v51 = vpop.permute.xlu0 %3005 }
0x3cb1   :  { %v3008_v34 = vadd.f32 %v3006_v51, %v2998_v30 }
0x3cb3   :  { %3994 = vtanh.f32 %v3008_v34 }
0x3cc0   :  { %v3995_v35 = vpop.eup %3994 }
0x3cc1   :  { %3011 = vrot.lane.b32.xlu1 %v3995_v35, %s4020_s1 }
0x3cc5   :  { %3021 = vrot.lane.b32.xlu1 %v3020_v37, %s4020_s1 }
0x3d33   :  { %v3012_v40 = vpop.permute.xlu1 %3011 }
0x3d34   :  { %v3014_v42 = vmul.f32 %v3993_v28, %v3012_v40 }
0x3d36   :  { %3016 = vrot.lane.b32.xlu0 %v3014_v42, %s4021_s10 }
0x3d37   :  { %v3022_v5 = vpop.permute.xlu1 %3021 }
0x3da8   :  { %v3017_v46 = vpop.permute.xlu0 %3016 }
0x3da9   :  { %v3024_v45 = vsel %vm309_vm5, %v3017_v46, %v3022_v5 }
0x3daa   :  { %v3025_v14 = vpack.c.bf16 %v3024_v45, %v3024_v45 }
0x3dac   :  { %v3027_v61 = vrot.slane %v3025_v14, 3 }
0x3dae   :  { %3822 = vmatmul.mubr.msk.bf16.vlgmr.msra.gmra.mxu1 %vm1054_vm6, %v3027_v61 }
0x3daf   :  { %3826 = vmatpush3.bf16.msra.mxu1 %v4778_v41  ;;  %3829 = vmatprep.mubr.msk.bf16.mxu1 %vm4019_vm0, %v4018_v0 }
0x3db0   :  { %3827 = vmatprep.subr.bf16.mxu1 %v4018_v0 }
0x3db3   :  { %3828 = vmatpush3.bf16.msra.mxu1 %v4787_v12 }
0x3e6e   :  { %v3065_v9 = vpop.f32.mrf.mxu1 }
0x3e6f   :  { %v3066_v54 = vadd.f32 %v4794_v6, %v3065_v9 }
0x3e70   :  { %v3823_v55 = vpop.f32.mrf.mxu1 }
0x3e71   :  { %3996 = vtanh.f32 %v3066_v54  ;;  %v3276_v50 = vmul.f32 -1.442695, %v3066_v54 }
0x3e72   :  { %v3068_v36 = vpop.f32.mrf.mxu1 }
0x3e73   :  { %3998 = vpow2.f32 %v3276_v50 }
0x3e74   :  { %v3824_v13 = vpop.f32.mrf.mxu1 }
0x3e7e   :  { %v3997_v62 = vpop.eup %3996 }
0x3e7f   :  { %3080 = vrot.lane.b32.xlu0 %v3997_v62, %s4020_s1 }
0x3e80   :  { %v3999_v41 = vpop.eup %3998 }
0x3e81   :  { %v3074_v63 = vadd.f32 1.0, %v3999_v41 }
0x3e83   :  { %4000 = vrcp.f32 %v3074_v63 }
0x3e90   :  { %v4001_v43 = vpop.eup %4000 }
0x3e91   :  { %v3078_v12 = vmul.f32 %v4001_v43, %v4992_v60 }
0x3ef1   :  { %v3081_v52 = vpop.permute.xlu0 %3080 }
0x3ef2   :  { %v3083_v0 = vmul.f32 %v4001_v43, %v3081_v52 }
0x3ef4   :  { %3085 = vrot.lane.b32.xlu1 %v3083_v0, %s4021_s10 }
0x3f66   :  { %v3086_v6 = vpop.permute.xlu1 %3085 }
0x3f67   :  { %v3088_v49 = vadd.f32 %v3086_v6, %v3078_v12 }
0x3f69   :  { %4002 = vtanh.f32 %v3088_v49 }
0x3f76   :  { %v4003_v15 = vpop.eup %4002 }
0x3f77   :  { %3091 = vrot.lane.b32.xlu0 %v4003_v15, %s4020_s1 }
0x3fe9   :  { %v3092_v17 = vpop.permute.xlu0 %3091 }
0x3fea   :  { %v3094_v56 = vmul.f32 %v4001_v43, %v3092_v17 }
0x3fec   :  { %v3095_v23 = vpack.c.bf16 %v3094_v56, %v3094_v56 }
0x3fee   :  { %3097 = vrot.lane.b32.xlu1 %v3095_v23, %s4021_s10 }
0x4060   :  { %v3098_v1 = vpop.permute.xlu1 %3097 }
0x4061   :  { %3830 = vmatmul.mubr.msk.bf16.vlgmr.msra.gmra.mxu1 %vm309_vm5, %v3098_v1 }
0x4121   :  { %v3136_v2 = vpop.f32.mrf.mxu1 }
0x4122   :  { %v3137_v24 = vadd.f32 %v4843_v53, %v3136_v2 }
0x4123   :  { %v3831_v48 = vpop.f32.mrf.mxu1 }
0x4124   :  { %3278 = vst [vmem:[%s5078_s16 + $0xe] sm:$0x3] %v3137_v24 }
0x4125   :  { %v3139_v60 = vpop.f32.mrf.mxu1 }
0x4127   :  { %v3832_v57 = vpop.f32.mrf.mxu1 }

</bundles_post_ra>
